<compile_context>
chip_gen: v7x
topology: tpu7x:2x2x1
jax: 0.10.0
libtpu: 0.0.40
codegen_flags: <defaults>
</compile_context>

<pallas_src>
import functools

import numpy as np
import jax
import jax.numpy as jnp
from jax import lax
from jax.experimental import pallas as pl
from jax.experimental.pallas import tpu as pltpu

ORI_A = 512                                    # `ori_A` in models_ford.py
DAMPING = 0.1 * jnp.ones((1, 3), jnp.float32)  # nn.Parameter in __init__ (unused in forward)


# ----------------------------------------------------------------------------
# Plain-JAX glue (small, parameter-setup style computation)
# ----------------------------------------------------------------------------
def feature_stub(img, w, stride=8, out_dtype=jnp.float32):
    # TODO(synk): ResNet18 backbone replaced by deterministic strided 1x1-conv stub.
    # out_dtype lets the ground branch emit bf16 directly (cast fused into the
    # producer instead of a separate HBM pass before the pallas_call).
    ds = img[:, :, ::stride, ::stride]
    return jnp.einsum('oc,bchw->bohw', w, ds).astype(out_dtype)


def ori_K_FL():
    K_FL = jnp.array([945.391406, 0.0, 855.502825,
                      0.0, 945.668274, 566.372868,
                      0.0, 0.0, 1.0], jnp.float32).reshape(1, 3, 3)
    H_FL, W_FL, H, W = 860.0, 1656.0, 256.0, 1024.0
    k = jnp.zeros_like(K_FL)
    k = k.at[0, 0].set(K_FL[0, 0] / W_FL * W)
    k = k.at[0, 1].set(K_FL[0, 1] / H_FL * H)
    k = k.at[0, 2].set(K_FL[0, 2])
    return k


def get_K_FL(grd_H, grd_W, ori_grdH, ori_grdW):
    ok = ori_K_FL()
    return jnp.concatenate([ok[:, :1, :] * grd_W / ori_grdW,
                            ok[:, 1:2, :] * grd_H / ori_grdH,
                            ok[:, 2:, :]], axis=1)


def get_warp_sat2real(A):
    r = jnp.arange(A, dtype=jnp.float32)
    ii, jj = jnp.meshgrid(r, r, indexing='ij')           # ii: rows, jj: cols
    uv = jnp.stack([jj, ii], axis=-1)                    # (A, A, 2)
    u0 = v0 = A // 2
    uv_center = uv - jnp.array([u0, v0], jnp.float32)
    mpp = 0.22 * ORI_A / A
    R = jnp.array([[0.0, -1.0], [1.0, 0.0]], jnp.float32)
    XY = jnp.einsum('ij,hwj->hwi', mpp * R, uv_center)
    Z = jnp.ones_like(XY[..., :1])
    return jnp.concatenate([XY, Z], axis=-1)             # (A, A, 3)


def compute_KR(B, feat_H, feat_W, ori_grdH, ori_grdW, R_FL):
    camera_k = get_K_FL(feat_H, feat_W, ori_grdH, ori_grdW)      # (1,3,3)
    K = jnp.tile(camera_k, (B, 1, 1))
    return jnp.matmul(K, jnp.linalg.inv(R_FL))                   # KR_FL, (B,3,3)


# ----------------------------------------------------------------------------
# Host pre-pass: project all BEV pixels once (same f32 math as the kernel) and
# plan per-(batch, BEV-tile) ground-image row bands.
# ----------------------------------------------------------------------------
def _project_rows(A, KR, T_FL, IH, IW):
    AA = A * A
    xyz = get_warp_sat2real(A).reshape(AA, 3)
    d = xyz[None, :, :] - T_FL[:, None, :].astype(jnp.float32)          # (B, AA, 3)
    uvw = jnp.einsum('bij,baj->bai', KR.astype(jnp.float32), d)
    denom = jnp.maximum(uvw[..., 2], 1e-6)
    m1 = denom > 1e-6
    inv = 1.0 / denom
    ix = uvw[..., 0] * inv * m1
    iy = uvw[..., 1] * inv * m1
    eps = 1e-3                                                           # ulp slack vs. kernel
    valid = m1 & (ix >= -eps) & (ix <= IW - 1 + eps) & (iy >= -eps) & (iy <= IH - 1 + eps)
    row = jnp.clip(jnp.floor(iy), 0.0, IH - 1)
    return np.asarray(valid), np.asarray(row)


def _plan_bands(valid, row, IH, IW, tile_aa):
    """Smallest aligned row band (per BEV tile) covering all valid pixels."""
    B, AA = valid.shape
    n_t = AA // tile_aa
    v = valid.reshape(B, n_t, tile_aa)
    r = row.reshape(B, n_t, tile_aa)
    has = v.any(-1)
    r_lo = np.where(v, r, float(IH)).min(-1)
    r_hi = np.where(v, r, -1.0).max(-1)
    # pad down 1 row (floor-boundary ulp safety) and up 2 rows (the +1 bilinear
    # corner row plus 1 row of ulp safety); empty tiles get band 0.
    r_lo = np.where(has, np.clip(r_lo - 1.0, 0, IH - 1), 0.0).astype(np.int64)
    r_hi = np.where(has, np.clip(r_hi + 2.0, 0, IH - 1), 0.0).astype(np.int64)
    # candidate band heights: divisors of IH whose flattened width is lane-aligned
    cands = [d for d in range(1, IH + 1)
             if IH % d == 0 and ((d * IW) % 128 == 0 or d == IH)]
    for band_rows in cands:
        if np.all(r_lo // band_rows == r_hi // band_rows):
            return band_rows, (r_lo // band_rows).astype(np.int32)
    return IH, np.zeros((B, n_t), np.int32)        # full image (always correct)


def _pick_plan(AA, C, IH, IW, valid, row, budget, idx_bytes, w_bytes, user_tile):
    if user_tile is not None:
        cands = [user_tile]
    else:
        cands = [c for c in (2048, 1024, 512, 256, 128) if c <= AA and AA % c == 0]
        if not cands:
            cands = [128]
    plan = None
    for cand in cands:                                    # largest tile that fits VMEM
        band_rows, rowblk = _plan_bands(valid, row, IH, IW, cand)
        nband = band_rows * IW
        est = (2 * nband * cand * idx_bytes               # resident iota (double-buffered)
               + nband * cand * (2 * w_bytes + 2)         # one-hot acc + select temp + bf16 Wmat
               + 2 * C * nband * 2                        # grd band, bf16, double-buffered
               + 2 * 3 * cand * 4                         # xyz tile
               + 2 * (C + 1) * cand * 4)                  # proj + mask output buffers
        plan = (cand, band_rows, rowblk)
        if est <= budget:
            return plan
    return plan                                           # best effort (smallest candidate)


# ----------------------------------------------------------------------------
# Pallas kernel: projection + band-local bilinear BEV sampling.
# Grid = (batch, BEV-pixel tile); each step handles TILE_AA BEV pixels.
# ----------------------------------------------------------------------------
def bev_corr_kernel(kr_ref, t_ref, rb_ref,                # scalar-prefetch (SMEM)
                    p_ref, xyz_ref, grd_ref,              # inputs (VMEM)
                    proj_ref, mask_ref,                    # outputs (VMEM)
                    *, IH, IW, band_rows, n_tiles, idx_dtype, w_dtype):
    b = pl.program_id(0)
    t = pl.program_id(1)

    xyz = xyz_ref[...]                                    # (3, TILE) f32

    # --- seq_warp_real2camera (zero shift/heading => Rw=I, Tw=0) -------------
    xc0 = xyz[0:1, :] - t_ref[b * 3 + 0]
    xc1 = xyz[1:2, :] - t_ref[b * 3 + 1]
    xc2 = xyz[2:3, :] - t_ref[b * 3 + 2]

    k00 = kr_ref[b * 9 + 0]; k01 = kr_ref[b * 9 + 1]; k02 = kr_ref[b * 9 + 2]
    k10 = kr_ref[b * 9 + 3]; k11 = kr_ref[b * 9 + 4]; k12 = kr_ref[b * 9 + 5]
    k20 = kr_ref[b * 9 + 6]; k21 = kr_ref[b * 9 + 7]; k22 = kr_ref[b * 9 + 8]

    uw = k00 * xc0 + k01 * xc1 + k02 * xc2                # (1, TILE)
    vw = k10 * xc0 + k11 * xc1 + k12 * xc2
    ww = k20 * xc0 + k21 * xc1 + k22 * xc2

    denom = jnp.maximum(ww, 1e-6)
    m1 = (denom > 1e-6).astype(jnp.float32)               # mask1
    inv = 1.0 / denom                                     # exact divide -> bit-exact masks
    ix = uw * inv * m1
    iy = vw * inv * m1

    # --- grd_f2BEV: bilinear sample (torch clamps corners in-place first) ----
    ix_nw = jnp.floor(ix); iy_nw = jnp.floor(iy)
    ix_ne = ix_nw + 1.0;   iy_ne = iy_nw
    ix_sw = ix_nw;         iy_sw = iy_nw + 1.0
    ix_se = ix_nw + 1.0;   iy_se = iy_nw + 1.0

    ix_nw = jnp.clip(ix_nw, 0.0, IW - 1); iy_nw = jnp.clip(iy_nw, 0.0, IH - 1)
    ix_ne = jnp.clip(ix_ne, 0.0, IW - 1); iy_ne = jnp.clip(iy_ne, 0.0, IH - 1)
    ix_sw = jnp.clip(ix_sw, 0.0, IW - 1); iy_sw = jnp.clip(iy_sw, 0.0, IH - 1)
    ix_se = jnp.clip(ix_se, 0.0, IW - 1); iy_se = jnp.clip(iy_se, 0.0, IH - 1)

    in_x = (ix >= 0.0) & (ix <= IW - 1)
    in_y = (iy >= 0.0) & (iy <= IH - 1)
    m2 = (in_x & in_y).astype(jnp.float32)                # mask2

    w_nw = (ix_se - ix) * (iy_se - iy) * m2
    w_ne = (ix - ix_sw) * (iy_sw - iy) * m2
    w_sw = (ix_ne - ix) * (iy - iy_ne) * m2
    w_se = (ix - ix_nw) * (iy - iy_nw) * m2

    # --- band-local gather-as-matmul on the MXU ------------------------------
    # rb = row-block index of the ground-image band this BEV tile touches
    # (precomputed host-side, DMA'd via scalar prefetch). Out-of-band corners
    # never match the iota (no contribution) — and they only occur for pixels
    # whose weights are zeroed by m1/m2, so correctness never depends on band.
    row0 = (rb_ref[b * n_tiles + t] * band_rows).astype(jnp.float32)

    def band_idx(iy_c, ix_c):
        return ((iy_c - row0) * IW + ix_c).astype(jnp.int32).astype(idx_dtype)

    idx_nw = band_idx(iy_nw, ix_nw)
    idx_ne = band_idx(iy_ne, ix_ne)
    idx_sw = band_idx(iy_sw, ix_sw)
    idx_se = band_idx(iy_se, ix_se)

    # VMEM-resident iota input (invariant index_map) -> zero per-step iota cost.
    p = p_ref[...]                                        # (Nband, TILE) idx_dtype
    zero_w = jnp.zeros((), dtype=w_dtype)
    w_acc = jnp.where(p == idx_nw, w_nw.astype(w_dtype), zero_w)
    w_acc = w_acc + jnp.where(p == idx_ne, w_ne.astype(w_dtype), zero_w)
    w_acc = w_acc + jnp.where(p == idx_sw, w_sw.astype(w_dtype), zero_w)
    w_acc = w_acc + jnp.where(p == idx_se, w_se.astype(w_dtype), zero_w)
    Wmat = w_acc.astype(jnp.bfloat16)                     # no-op when already bf16

    # NOTE: orientation kept (C,Nband)@(Nband,TILE) so the output stays lane-dense.
    grd = grd_ref[0]                                      # (C, Nband) bf16
    out = jnp.dot(grd, Wmat,
                  preferred_element_type=jnp.float32)     # (C, TILE), f32 acc on MXU

    proj_ref[0] = (out * m1).astype(proj_ref.dtype)       # grd_feat_proj * mask1
    mask_ref[0] = m1 * m2                                 # mask1 * mask2 (float 0/1)


def bev_project_pallas(grd_feat, A, KR, T_FL, *, tile_aa=None, proj_dtype=jnp.float32):
    B, C, IH, IW = grd_feat.shape
    AA = A * A
    Ngrd = IH * IW
    assert AA % 128 == 0, "BEV lane dim must be 128-aligned"
    if tile_aa is not None:
        assert tile_aa % 128 == 0 and AA % tile_aa == 0

    # ---- generation-aware knobs ---------------------------------------------
    try:
        kind = jax.devices()[0].device_kind.lower()
    except Exception:
        kind = ""
    # no native sub-32-bit VALU on v2/v3/v4/v5e -> keep 32-bit one-hot build there
    no_16bit_vpu = any(s in kind for s in ("v2", "v3", "v4", "v5e", "v5 lite", "v5lite"))
    try:
        vmem_cap = int(pltpu.get_tpu_info().vmem_capacity_bytes)
    except Exception:
        vmem_cap = 128 * 1024 * 1024
    # 40 MiB on 64-MiB parts (v7x), 64 MiB on 128-MiB parts (v5e/v6e)
    vmem_limit = (40 if vmem_cap <= 64 * 1024 * 1024 else 64) * 1024 * 1024
    budget = vmem_limit - 6 * 1024 * 1024       # headroom for compiler scratch

    # ---- host pre-pass: per-BEV-tile ground-image row bands -----------------
    valid, row = _project_rows(A, KR, T_FL, IH, IW)

    xyz_t = get_warp_sat2real(A).reshape(AA, 3).T.astype(jnp.float32)     # (3, AA)
    grd_flat = grd_feat.reshape(B, C, Ngrd).astype(jnp.bfloat16)          # no-op: producer is bf16
    kr_flat = KR.reshape(B * 9).astype(jnp.float32)
    t_flat = T_FL.reshape(B * 3).astype(jnp.float32)

    def _attempt(packed):
        idx_bytes, w_bytes = (2, 2) if packed else (4, 4)
        tile, band_rows, rowblk = _pick_plan(AA, C, IH, IW, valid, row,
                                             budget, idx_bytes, w_bytes, tile_aa)
        n_tiles = AA // tile
        nband = band_rows * IW
        use_i16 = packed and nband < (1 << 15)            # int16 index needs Nband < 32768
        idx_dtype = jnp.int16 if use_i16 else jnp.int32
        np_idx = np.int16 if use_i16 else np.int32
        w_dtype = jnp.bfloat16 if packed else jnp.float32

        p_idx = jnp.asarray(np.broadcast_to(
            np.arange(nband, dtype=np_idx)[:, None], (nband, tile)))
        rowblk_flat = jnp.asarray(rowblk.reshape(-1).astype(np.int32))

        kernel = functools.partial(bev_corr_kernel, IH=IH, IW=IW,
                                   band_rows=band_rows, n_tiles=n_tiles,
                                   idx_dtype=idx_dtype, w_dtype=w_dtype)
        # batch-major megacore sharding (each core streams its own grd bands)
        dims = ("parallel", "arbitrary") if B >= 2 else ("parallel", "parallel")

        proj, maskf = pl.pallas_call(
            kernel,
            out_shape=(jax.ShapeDtypeStruct((B, C, AA), proj_dtype),
                       jax.ShapeDtypeStruct((B, 1, AA), jnp.float32)),
            grid_spec=pltpu.PrefetchScalarGridSpec(
                num_scalar_prefetch=3,                     # KR, T_FL, row-block table
                grid=(B, n_tiles),
                in_specs=[
                    # band-local iota: invariant -> stays VMEM-resident
                    pl.BlockSpec((nband, tile), lambda b, t, *refs: (0, 0)),
                    # BEV world coordinates, tiled along the BEV-pixel axis
                    pl.BlockSpec((3, tile), lambda b, t, *refs: (0, t)),
                    # ground feature: data-dependent row band (scalar prefetch)
                    pl.BlockSpec((1, C, nband),
                                 lambda b, t, kr, tt, rb: (b, 0, rb[b * n_tiles + t])),
                ],
                out_specs=[
                    pl.BlockSpec((1, C, tile), lambda b, t, *refs: (b, 0, t)),
                    pl.BlockSpec((1, 1, tile), lambda b, t, *refs: (b, 0, t)),
                ],
            ),
            compiler_params=pltpu.CompilerParams(
                dimension_semantics=dims,
                vmem_limit_bytes=vmem_limit,
            ),
        )(kr_flat, t_flat, rowblk_flat, p_idx, xyz_t, grd_flat)
        jax.block_until_ready((proj, maskf))
        return proj, maskf

    if not no_16bit_vpu:
        try:
            proj, maskf = _attempt(True)                   # int16 / bf16 one-hot build
        except Exception:
            proj, maskf = _attempt(False)                  # safety net: 32-bit build
    else:
        proj, maskf = _attempt(False)

    grd_feat_proj = proj.reshape(B, C, A, A).astype(jnp.float32)
    mask = (maskf.reshape(B, 1, A, A) > 0.5)
    return grd_feat_proj, mask


def bev_corr_forward(sat_map, grd_img_left, R_FL, T_FL, w_sat, w_grd, *, tile_aa=None):
    """BEV_corr.forward up to (and including) the BEV projection of the
    ground feature map. Returns (grd_feat_proj, mask, sat_feat)."""
    B, _, ori_grdH, ori_grdW = grd_img_left.shape
    sat_feat = feature_stub(sat_map, w_sat)                              # TODO(synk): ResNet18
    grd_feat = feature_stub(grd_img_left, w_grd, out_dtype=jnp.bfloat16)  # TODO(synk): ResNet18
    _, _, H, W = grd_feat.shape
    A = sat_feat.shape[-1]
    KR = compute_KR(B, H, W, ori_grdH, ori_grdW, R_FL)
    grd_feat_proj, mask = bev_project_pallas(grd_feat, A, KR, T_FL, tile_aa=tile_aa)
    # TODO(synk): RAFT(grd_feat_proj, sat_feat, mask) and the SVD least-squares
    # pose branch are not implemented (external modules).
    return grd_feat_proj, mask, sat_feat


# ----------------------------------------------------------------------------
# Pure-JAX reference (mirrors torch semantics) for correctness checking
# ----------------------------------------------------------------------------
def bev_project_ref(grd_feat, A, KR, T_FL):
    B, C, IH, IW = grd_feat.shape
    XYZ = get_warp_sat2real(A)
    Xw = jnp.broadcast_to(XYZ[None], (B, A, A, 3))
    uvw = jnp.einsum('bij,bhwj->bhwi', KR, Xw - T_FL[:, None, None, :])
    denom = jnp.maximum(uvw[..., 2:], 1e-6)
    m1 = (denom > 1e-6)
    uv = uvw[..., :2] / denom * m1
    ix, iy = uv[..., 0], uv[..., 1]

    ix_nw = jnp.floor(ix); iy_nw = jnp.floor(iy)
    ix_ne = ix_nw + 1; iy_ne = iy_nw
    ix_sw = ix_nw;     iy_sw = iy_nw + 1
    ix_se = ix_nw + 1; iy_se = iy_nw + 1
    cx = lambda t: jnp.clip(t, 0, IW - 1)
    cy = lambda t: jnp.clip(t, 0, IH - 1)
    ix_nw, iy_nw = cx(ix_nw), cy(iy_nw)
    ix_ne, iy_ne = cx(ix_ne), cy(iy_ne)
    ix_sw, iy_sw = cx(ix_sw), cy(iy_sw)
    ix_se, iy_se = cx(ix_se), cy(iy_se)
    m2 = ((ix >= 0) & (ix <= IW - 1) & (iy >= 0) & (iy <= IH - 1)).astype(jnp.float32)

    nw = (ix_se - ix) * (iy_se - iy) * m2
    ne = (ix - ix_sw) * (iy_sw - iy) * m2
    sw = (ix_ne - ix) * (iy - iy_ne) * m2
    se = (ix - ix_nw) * (iy - iy_nw) * m2

    img = grd_feat.reshape(B, C, IH * IW)

    def gather(iy_, ix_):
        idx = (iy_ * IW + ix_).astype(jnp.int32).reshape(B, 1, A * A)
        v = jnp.take_along_axis(img, jnp.broadcast_to(idx, (B, C, A * A)), axis=2)
        return v.reshape(B, C, A, A)

    out = (gather(iy_nw, ix_nw) * nw[:, None] + gather(iy_ne, ix_ne) * ne[:, None]
           + gather(iy_sw, ix_sw) * sw[:, None] + gather(iy_se, ix_se) * se[:, None])
    m1_map = m1[..., 0][:, None].astype(jnp.float32)
    proj = out * m1_map
    mask = (m1_map * m2[:, None]) > 0.5
    return proj, mask


# ----------------------------------------------------------------------------
if __name__ == "__main__":
    key = jax.random.PRNGKey(0)
    k0, k1, k2, k3, k4 = jax.random.split(key, 5)

    B, Cfeat = 2, 4
    sat_map = jax.random.normal(k0, (B, 3, 128, 128), jnp.float32)   # A_feat = 16
    grd_img = jax.random.normal(k1, (B, 3, 64, 256), jnp.float32)    # feat (8, 32)
    w_sat = 0.1 * jax.random.normal(k2, (Cfeat, 3), jnp.float32)
    w_grd = 0.1 * jax.random.normal(k3, (Cfeat, 3), jnp.float32)

    # deterministic camera extrinsics (R_FL: camera-to-world rotation, T_FL: position)
    base = jnp.array([[0.0, 0.0, 1.0],
                      [-1.0, 0.0, 0.0],
                      [0.0, -1.0, 0.0]], jnp.float32)

    def rz(a):
        c, s = jnp.cos(a), jnp.sin(a)
        return jnp.array([[c, -s, 0.0], [s, c, 0.0], [0.0, 0.0, 1.0]], jnp.float32)

    yaws = jnp.array([0.05, -0.10], jnp.float32)
    R_FL = jnp.stack([rz(yaws[b]) @ base for b in range(B)], axis=0)
    T_FL = 2.0 * jax.random.normal(k4, (B, 3), jnp.float32)

    # tile_aa=128 exercises the multi-tile BEV-pixel grid axis (and the
    # data-dependent row-band index_map) at demo size.
    grd_feat_proj, mask, sat_feat = bev_corr_forward(
        sat_map, grd_img, R_FL, T_FL, w_sat, w_grd, tile_aa=128)
    grd_feat_proj = jax.block_until_ready(grd_feat_proj)
    mask = jax.block_until_ready(mask)

    # reference check (same glue, pure-JAX bilinear sample in f32)
    grd_feat = feature_stub(grd_img, w_grd)
    _, _, H, W = grd_feat.shape
    A = sat_feat.shape[-1]
    KR = compute_KR(B, H, W, grd_img.shape[2], grd_img.shape[3], R_FL)
    proj_ref, mask_ref = bev_project_ref(grd_feat, A, KR, T_FL)

    # tolerance accounts for bf16 MXU operands (features + bilinear weights)
    # with f32 accumulation; masks must still match exactly.
    np.testing.assert_allclose(np.asarray(grd_feat_proj), np.asarray(proj_ref),
                               rtol=5e-3, atol=5e-3)
    assert np.array_equal(np.asarray(mask), np.asarray(mask_ref))
    print("KERNEL_OK")
</pallas_src>

<mosaic_0001>
module attributes {stable_mosaic.version = 11 : i64} {
  func.func @bev_corr_kernel(%arg0: i32, %arg1: i32, %arg2: memref<18xf32, #tpu.memory_space<smem>>, %arg3: memref<6xf32, #tpu.memory_space<smem>>, %arg4: memref<4xi32, #tpu.memory_space<smem>>, %arg5: memref<128x128xi16, #tpu.memory_space<vmem>>, %arg6: memref<3x128xf32, #tpu.memory_space<vmem>>, %arg7: memref<1x4x128xbf16, #tpu.memory_space<vmem>>, %arg8: memref<1x4x128xf32, #tpu.memory_space<vmem>>, %arg9: memref<1x1x128xf32, #tpu.memory_space<vmem>>) attributes {dimension_semantics = [#tpu.dimension_semantics<parallel>, #tpu.dimension_semantics<arbitrary>], iteration_bounds = array<i64: 2, 2>, scalar_prefetch = 3 : i64, scratch_operands = 0 : i64, tpu.core_type = #tpu.core_type<tc>, window_params = [{pipeline_mode = #tpu.pipeline_mode<synchronous>, transform_indices = @transform_0, window_bounds = array<i64: 128, 128>}, {transform_indices = @transform_1, window_bounds = array<i64: 3, 128>}, {transform_indices = @transform_2, window_bounds = array<i64: 1, 4, 128>}, {transform_indices = @transform_3, window_bounds = array<i64: 1, 4, 128>}, {transform_indices = @transform_4, window_bounds = array<i64: 1, 1, 128>}]} {
    %c0 = arith.constant 0 : index
    %c0_0 = arith.constant 0 : index
    %0 = vector.load %arg6[%c0, %c0_0] : memref<3x128xf32, #tpu.memory_space<vmem>>, vector<3x128xf32>
    %1 = vector.extract_strided_slice %0 {offsets = [0, 0], sizes = [1, 128], strides = [1, 1]} : vector<3x128xf32> to vector<1x128xf32>
    %c3_i32 = arith.constant 3 : i32
    %2 = arith.muli %arg0, %c3_i32 : i32
    %c0_i32 = arith.constant 0 : i32
    %3 = arith.addi %2, %c0_i32 : i32
    %4 = arith.index_cast %3 : i32 to index
    %5 = memref.load %arg3[%4] : memref<6xf32, #tpu.memory_space<smem>>
    %6 = vector.broadcast %5 : f32 to vector<1x128xf32>
    %7 = arith.subf %1, %6 : vector<1x128xf32>
    %8 = vector.extract_strided_slice %0 {offsets = [1, 0], sizes = [1, 128], strides = [1, 1]} : vector<3x128xf32> to vector<1x128xf32>
    %c3_i32_1 = arith.constant 3 : i32
    %9 = arith.muli %arg0, %c3_i32_1 : i32
    %c1_i32 = arith.constant 1 : i32
    %10 = arith.addi %9, %c1_i32 : i32
    %11 = arith.index_cast %10 : i32 to index
    %12 = memref.load %arg3[%11] : memref<6xf32, #tpu.memory_space<smem>>
    %13 = vector.broadcast %12 : f32 to vector<1x128xf32>
    %14 = arith.subf %8, %13 : vector<1x128xf32>
    %15 = vector.extract_strided_slice %0 {offsets = [2, 0], sizes = [1, 128], strides = [1, 1]} : vector<3x128xf32> to vector<1x128xf32>
    %c3_i32_2 = arith.constant 3 : i32
    %16 = arith.muli %arg0, %c3_i32_2 : i32
    %c2_i32 = arith.constant 2 : i32
    %17 = arith.addi %16, %c2_i32 : i32
    %18 = arith.index_cast %17 : i32 to index
    %19 = memref.load %arg3[%18] : memref<6xf32, #tpu.memory_space<smem>>
    %20 = vector.broadcast %19 : f32 to vector<1x128xf32>
    %21 = arith.subf %15, %20 : vector<1x128xf32>
    %c9_i32 = arith.constant 9 : i32
    %22 = arith.muli %arg0, %c9_i32 : i32
    %c0_i32_3 = arith.constant 0 : i32
    %23 = arith.addi %22, %c0_i32_3 : i32
    %24 = arith.index_cast %23 : i32 to index
    %25 = memref.load %arg2[%24] : memref<18xf32, #tpu.memory_space<smem>>
    %c9_i32_4 = arith.constant 9 : i32
    %26 = arith.muli %arg0, %c9_i32_4 : i32
    %c1_i32_5 = arith.constant 1 : i32
    %27 = arith.addi %26, %c1_i32_5 : i32
    %28 = arith.index_cast %27 : i32 to index
    %29 = memref.load %arg2[%28] : memref<18xf32, #tpu.memory_space<smem>>
    %c9_i32_6 = arith.constant 9 : i32
    %30 = arith.muli %arg0, %c9_i32_6 : i32
    %c2_i32_7 = arith.constant 2 : i32
    %31 = arith.addi %30, %c2_i32_7 : i32
    %32 = arith.index_cast %31 : i32 to index
    %33 = memref.load %arg2[%32] : memref<18xf32, #tpu.memory_space<smem>>
    %c9_i32_8 = arith.constant 9 : i32
    %34 = arith.muli %arg0, %c9_i32_8 : i32
    %c3_i32_9 = arith.constant 3 : i32
    %35 = arith.addi %34, %c3_i32_9 : i32
    %36 = arith.index_cast %35 : i32 to index
    %37 = memref.load %arg2[%36] : memref<18xf32, #tpu.memory_space<smem>>
    %c9_i32_10 = arith.constant 9 : i32
    %38 = arith.muli %arg0, %c9_i32_10 : i32
    %c4_i32 = arith.constant 4 : i32
    %39 = arith.addi %38, %c4_i32 : i32
    %40 = arith.index_cast %39 : i32 to index
    %41 = memref.load %arg2[%40] : memref<18xf32, #tpu.memory_space<smem>>
    %c9_i32_11 = arith.constant 9 : i32
    %42 = arith.muli %arg0, %c9_i32_11 : i32
    %c5_i32 = arith.constant 5 : i32
    %43 = arith.addi %42, %c5_i32 : i32
    %44 = arith.index_cast %43 : i32 to index
    %45 = memref.load %arg2[%44] : memref<18xf32, #tpu.memory_space<smem>>
    %c9_i32_12 = arith.constant 9 : i32
    %46 = arith.muli %arg0, %c9_i32_12 : i32
    %c6_i32 = arith.constant 6 : i32
    %47 = arith.addi %46, %c6_i32 : i32
    %48 = arith.index_cast %47 : i32 to index
    %49 = memref.load %arg2[%48] : memref<18xf32, #tpu.memory_space<smem>>
    %c9_i32_13 = arith.constant 9 : i32
    %50 = arith.muli %arg0, %c9_i32_13 : i32
    %c7_i32 = arith.constant 7 : i32
    %51 = arith.addi %50, %c7_i32 : i32
    %52 = arith.index_cast %51 : i32 to index
    %53 = memref.load %arg2[%52] : memref<18xf32, #tpu.memory_space<smem>>
    %c9_i32_14 = arith.constant 9 : i32
    %54 = arith.muli %arg0, %c9_i32_14 : i32
    %c8_i32 = arith.constant 8 : i32
    %55 = arith.addi %54, %c8_i32 : i32
    %56 = arith.index_cast %55 : i32 to index
    %57 = memref.load %arg2[%56] : memref<18xf32, #tpu.memory_space<smem>>
    %58 = vector.broadcast %25 : f32 to vector<1x128xf32>
    %59 = arith.mulf %58, %7 : vector<1x128xf32>
    %60 = vector.broadcast %29 : f32 to vector<1x128xf32>
    %61 = arith.mulf %60, %14 : vector<1x128xf32>
    %62 = arith.addf %59, %61 : vector<1x128xf32>
    %63 = vector.broadcast %33 : f32 to vector<1x128xf32>
    %64 = arith.mulf %63, %21 : vector<1x128xf32>
    %65 = arith.addf %62, %64 : vector<1x128xf32>
    %66 = vector.broadcast %37 : f32 to vector<1x128xf32>
    %67 = arith.mulf %66, %7 : vector<1x128xf32>
    %68 = vector.broadcast %41 : f32 to vector<1x128xf32>
    %69 = arith.mulf %68, %14 : vector<1x128xf32>
    %70 = arith.addf %67, %69 : vector<1x128xf32>
    %71 = vector.broadcast %45 : f32 to vector<1x128xf32>
    %72 = arith.mulf %71, %21 : vector<1x128xf32>
    %73 = arith.addf %70, %72 : vector<1x128xf32>
    %74 = vector.broadcast %49 : f32 to vector<1x128xf32>
    %75 = arith.mulf %74, %7 : vector<1x128xf32>
    %76 = vector.broadcast %53 : f32 to vector<1x128xf32>
    %77 = arith.mulf %76, %14 : vector<1x128xf32>
    %78 = arith.addf %75, %77 : vector<1x128xf32>
    %79 = vector.broadcast %57 : f32 to vector<1x128xf32>
    %80 = arith.mulf %79, %21 : vector<1x128xf32>
    %81 = arith.addf %78, %80 : vector<1x128xf32>
    %cst = arith.constant 9.99999997E-7 : f32
    %82 = vector.broadcast %cst : f32 to vector<1x128xf32>
    %83 = arith.maximumf %81, %82 : vector<1x128xf32>
    %cst_15 = arith.constant 9.99999997E-7 : f32
    %84 = vector.broadcast %cst_15 : f32 to vector<1x128xf32>
    %85 = arith.cmpf ogt, %83, %84 : vector<1x128xf32>
    %86 = arith.extui %85 : vector<1x128xi1> to vector<1x128xi32>
    %87 = arith.sitofp %86 : vector<1x128xi32> to vector<1x128xf32>
    %cst_16 = arith.constant 1.000000e+00 : f32
    %88 = vector.broadcast %cst_16 : f32 to vector<1x128xf32>
    %89 = arith.divf %88, %83 : vector<1x128xf32>
    %90 = arith.mulf %65, %89 : vector<1x128xf32>
    %91 = arith.mulf %90, %87 : vector<1x128xf32>
    %92 = arith.mulf %73, %89 : vector<1x128xf32>
    %93 = arith.mulf %92, %87 : vector<1x128xf32>
    %94 = math.floor %91 : vector<1x128xf32>
    %95 = math.floor %93 : vector<1x128xf32>
    %cst_17 = arith.constant 1.000000e+00 : f32
    %96 = vector.broadcast %cst_17 : f32 to vector<1x128xf32>
    %97 = arith.addf %94, %96 : vector<1x128xf32>
    %cst_18 = arith.constant 1.000000e+00 : f32
    %98 = vector.broadcast %cst_18 : f32 to vector<1x128xf32>
    %99 = arith.addf %95, %98 : vector<1x128xf32>
    %cst_19 = arith.constant 1.000000e+00 : f32
    %100 = vector.broadcast %cst_19 : f32 to vector<1x128xf32>
    %101 = arith.addf %94, %100 : vector<1x128xf32>
    %cst_20 = arith.constant 1.000000e+00 : f32
    %102 = vector.broadcast %cst_20 : f32 to vector<1x128xf32>
    %103 = arith.addf %95, %102 : vector<1x128xf32>
    %cst_21 = arith.constant 0.000000e+00 : f32
    %c31_i32 = arith.constant 31 : i32
    %104 = vector.broadcast %cst_21 : f32 to vector<1x128xf32>
    %105 = arith.maximumf %104, %94 : vector<1x128xf32>
    %106 = arith.sitofp %c31_i32 : i32 to f32
    %107 = vector.broadcast %106 : f32 to vector<1x128xf32>
    %108 = arith.minimumf %107, %105 : vector<1x128xf32>
    %cst_22 = arith.constant 0.000000e+00 : f32
    %c7_i32_23 = arith.constant 7 : i32
    %109 = vector.broadcast %cst_22 : f32 to vector<1x128xf32>
    %110 = arith.maximumf %109, %95 : vector<1x128xf32>
    %111 = arith.sitofp %c7_i32_23 : i32 to f32
    %112 = vector.broadcast %111 : f32 to vector<1x128xf32>
    %113 = arith.minimumf %112, %110 : vector<1x128xf32>
    %cst_24 = arith.constant 0.000000e+00 : f32
    %c31_i32_25 = arith.constant 31 : i32
    %114 = vector.broadcast %cst_24 : f32 to vector<1x128xf32>
    %115 = arith.maximumf %114, %97 : vector<1x128xf32>
    %116 = arith.sitofp %c31_i32_25 : i32 to f32
    %117 = vector.broadcast %116 : f32 to vector<1x128xf32>
    %118 = arith.minimumf %117, %115 : vector<1x128xf32>
    %cst_26 = arith.constant 0.000000e+00 : f32
    %c7_i32_27 = arith.constant 7 : i32
    %119 = vector.broadcast %cst_26 : f32 to vector<1x128xf32>
    %120 = arith.maximumf %119, %95 : vector<1x128xf32>
    %121 = arith.sitofp %c7_i32_27 : i32 to f32
    %122 = vector.broadcast %121 : f32 to vector<1x128xf32>
    %123 = arith.minimumf %122, %120 : vector<1x128xf32>
    %cst_28 = arith.constant 0.000000e+00 : f32
    %c31_i32_29 = arith.constant 31 : i32
    %124 = vector.broadcast %cst_28 : f32 to vector<1x128xf32>
    %125 = arith.maximumf %124, %94 : vector<1x128xf32>
    %126 = arith.sitofp %c31_i32_29 : i32 to f32
    %127 = vector.broadcast %126 : f32 to vector<1x128xf32>
    %128 = arith.minimumf %127, %125 : vector<1x128xf32>
    %cst_30 = arith.constant 0.000000e+00 : f32
    %c7_i32_31 = arith.constant 7 : i32
    %129 = vector.broadcast %cst_30 : f32 to vector<1x128xf32>
    %130 = arith.maximumf %129, %99 : vector<1x128xf32>
    %131 = arith.sitofp %c7_i32_31 : i32 to f32
    %132 = vector.broadcast %131 : f32 to vector<1x128xf32>
    %133 = arith.minimumf %132, %130 : vector<1x128xf32>
    %cst_32 = arith.constant 0.000000e+00 : f32
    %c31_i32_33 = arith.constant 31 : i32
    %134 = vector.broadcast %cst_32 : f32 to vector<1x128xf32>
    %135 = arith.maximumf %134, %101 : vector<1x128xf32>
    %136 = arith.sitofp %c31_i32_33 : i32 to f32
    %137 = vector.broadcast %136 : f32 to vector<1x128xf32>
    %138 = arith.minimumf %137, %135 : vector<1x128xf32>
    %cst_34 = arith.constant 0.000000e+00 : f32
    %c7_i32_35 = arith.constant 7 : i32
    %139 = vector.broadcast %cst_34 : f32 to vector<1x128xf32>
    %140 = arith.maximumf %139, %103 : vector<1x128xf32>
    %141 = arith.sitofp %c7_i32_35 : i32 to f32
    %142 = vector.broadcast %141 : f32 to vector<1x128xf32>
    %143 = arith.minimumf %142, %140 : vector<1x128xf32>
    %cst_36 = arith.constant 0.000000e+00 : f32
    %144 = vector.broadcast %cst_36 : f32 to vector<1x128xf32>
    %145 = arith.cmpf oge, %91, %144 : vector<1x128xf32>
    %cst_37 = arith.constant 3.100000e+01 : f32
    %146 = vector.broadcast %cst_37 : f32 to vector<1x128xf32>
    %147 = arith.cmpf ole, %91, %146 : vector<1x128xf32>
    %148 = arith.andi %145, %147 : vector<1x128xi1>
    %cst_38 = arith.constant 0.000000e+00 : f32
    %149 = vector.broadcast %cst_38 : f32 to vector<1x128xf32>
    %150 = arith.cmpf oge, %93, %149 : vector<1x128xf32>
    %cst_39 = arith.constant 7.000000e+00 : f32
    %151 = vector.broadcast %cst_39 : f32 to vector<1x128xf32>
    %152 = arith.cmpf ole, %93, %151 : vector<1x128xf32>
    %153 = arith.andi %150, %152 : vector<1x128xi1>
    %154 = arith.andi %148, %153 : vector<1x128xi1>
    %155 = arith.extui %154 : vector<1x128xi1> to vector<1x128xi32>
    %156 = arith.sitofp %155 : vector<1x128xi32> to vector<1x128xf32>
    %157 = arith.subf %138, %91 : vector<1x128xf32>
    %158 = arith.subf %143, %93 : vector<1x128xf32>
    %159 = arith.mulf %157, %158 : vector<1x128xf32>
    %160 = arith.mulf %159, %156 : vector<1x128xf32>
    %161 = arith.subf %91, %128 : vector<1x128xf32>
    %162 = arith.subf %133, %93 : vector<1x128xf32>
    %163 = arith.mulf %161, %162 : vector<1x128xf32>
    %164 = arith.mulf %163, %156 : vector<1x128xf32>
    %165 = arith.subf %118, %91 : vector<1x128xf32>
    %166 = arith.subf %93, %123 : vector<1x128xf32>
    %167 = arith.mulf %165, %166 : vector<1x128xf32>
    %168 = arith.mulf %167, %156 : vector<1x128xf32>
    %169 = arith.subf %91, %108 : vector<1x128xf32>
    %170 = arith.subf %93, %113 : vector<1x128xf32>
    %171 = arith.mulf %169, %170 : vector<1x128xf32>
    %172 = arith.mulf %171, %156 : vector<1x128xf32>
    %c2_i32_40 = arith.constant 2 : i32
    %173 = arith.muli %arg0, %c2_i32_40 : i32
    %174 = arith.addi %173, %arg1 : i32
    %175 = arith.index_cast %174 : i32 to index
    %176 = memref.load %arg4[%175] : memref<4xi32, #tpu.memory_space<smem>>
    %c4_i32_41 = arith.constant 4 : i32
    %177 = arith.muli %176, %c4_i32_41 : i32
    %178 = arith.sitofp %177 : i32 to f32
    %179 = vector.broadcast %178 : f32 to vector<1x128xf32>
    %180 = arith.subf %113, %179 : vector<1x128xf32>
    %cst_42 = arith.constant 3.200000e+01 : f32
    %181 = vector.broadcast %cst_42 : f32 to vector<1x128xf32>
    %182 = arith.mulf %180, %181 : vector<1x128xf32>
    %183 = arith.addf %182, %108 : vector<1x128xf32>
    %184 = arith.fptosi %183 : vector<1x128xf32> to vector<1x128xi32>
    %185 = arith.trunci %184 : vector<1x128xi32> to vector<1x128xi16>
    %186 = vector.broadcast %178 : f32 to vector<1x128xf32>
    %187 = arith.subf %123, %186 : vector<1x128xf32>
    %cst_43 = arith.constant 3.200000e+01 : f32
    %188 = vector.broadcast %cst_43 : f32 to vector<1x128xf32>
    %189 = arith.mulf %187, %188 : vector<1x128xf32>
    %190 = arith.addf %189, %118 : vector<1x128xf32>
    %191 = arith.fptosi %190 : vector<1x128xf32> to vector<1x128xi32>
    %192 = arith.trunci %191 : vector<1x128xi32> to vector<1x128xi16>
    %193 = vector.broadcast %178 : f32 to vector<1x128xf32>
    %194 = arith.subf %133, %193 : vector<1x128xf32>
    %cst_44 = arith.constant 3.200000e+01 : f32
    %195 = vector.broadcast %cst_44 : f32 to vector<1x128xf32>
    %196 = arith.mulf %194, %195 : vector<1x128xf32>
    %197 = arith.addf %196, %128 : vector<1x128xf32>
    %198 = arith.fptosi %197 : vector<1x128xf32> to vector<1x128xi32>
    %199 = arith.trunci %198 : vector<1x128xi32> to vector<1x128xi16>
    %200 = vector.broadcast %178 : f32 to vector<1x128xf32>
    %201 = arith.subf %143, %200 : vector<1x128xf32>
    %cst_45 = arith.constant 3.200000e+01 : f32
    %202 = vector.broadcast %cst_45 : f32 to vector<1x128xf32>
    %203 = arith.mulf %201, %202 : vector<1x128xf32>
    %204 = arith.addf %203, %138 : vector<1x128xf32>
    %205 = arith.fptosi %204 : vector<1x128xf32> to vector<1x128xi32>
    %206 = arith.trunci %205 : vector<1x128xi32> to vector<1x128xi16>
    %c0_46 = arith.constant 0 : index
    %c0_47 = arith.constant 0 : index
    %207 = vector.load %arg5[%c0_46, %c0_47] : memref<128x128xi16, #tpu.memory_space<vmem>>, vector<128x128xi16>
    %208 = vector.broadcast %185 : vector<1x128xi16> to vector<128x128xi16>
    %209 = arith.cmpi eq, %207, %208 : vector<128x128xi16>
    %210 = arith.truncf %160 : vector<1x128xf32> to vector<1x128xbf16>
    %cst_48 = arith.constant 0.000000e+00 : bf16
    %211 = vector.shape_cast %210 : vector<1x128xbf16> to vector<1x128xbf16>
    %212 = vector.broadcast %211 : vector<1x128xbf16> to vector<128x128xbf16>
    %213 = vector.broadcast %cst_48 : bf16 to vector<128x128xbf16>
    %214 = arith.select %209, %212, %213 : vector<128x128xi1>, vector<128x128xbf16>
    %215 = vector.broadcast %192 : vector<1x128xi16> to vector<128x128xi16>
    %216 = arith.cmpi eq, %207, %215 : vector<128x128xi16>
    %217 = arith.truncf %164 : vector<1x128xf32> to vector<1x128xbf16>
    %cst_49 = arith.constant 0.000000e+00 : bf16
    %218 = vector.shape_cast %217 : vector<1x128xbf16> to vector<1x128xbf16>
    %219 = vector.broadcast %218 : vector<1x128xbf16> to vector<128x128xbf16>
    %220 = vector.broadcast %cst_49 : bf16 to vector<128x128xbf16>
    %221 = arith.select %216, %219, %220 : vector<128x128xi1>, vector<128x128xbf16>
    %222 = arith.addf %214, %221 : vector<128x128xbf16>
    %223 = vector.broadcast %199 : vector<1x128xi16> to vector<128x128xi16>
    %224 = arith.cmpi eq, %207, %223 : vector<128x128xi16>
    %225 = arith.truncf %168 : vector<1x128xf32> to vector<1x128xbf16>
    %cst_50 = arith.constant 0.000000e+00 : bf16
    %226 = vector.shape_cast %225 : vector<1x128xbf16> to vector<1x128xbf16>
    %227 = vector.broadcast %226 : vector<1x128xbf16> to vector<128x128xbf16>
    %228 = vector.broadcast %cst_50 : bf16 to vector<128x128xbf16>
    %229 = arith.select %224, %227, %228 : vector<128x128xi1>, vector<128x128xbf16>
    %230 = arith.addf %222, %229 : vector<128x128xbf16>
    %231 = vector.broadcast %206 : vector<1x128xi16> to vector<128x128xi16>
    %232 = arith.cmpi eq, %207, %231 : vector<128x128xi16>
    %233 = arith.truncf %172 : vector<1x128xf32> to vector<1x128xbf16>
    %cst_51 = arith.constant 0.000000e+00 : bf16
    %234 = vector.shape_cast %233 : vector<1x128xbf16> to vector<1x128xbf16>
    %235 = vector.broadcast %234 : vector<1x128xbf16> to vector<128x128xbf16>
    %236 = vector.broadcast %cst_51 : bf16 to vector<128x128xbf16>
    %237 = arith.select %232, %235, %236 : vector<128x128xi1>, vector<128x128xbf16>
    %238 = arith.addf %230, %237 : vector<128x128xbf16>
    %c0_52 = arith.constant 0 : index
    %c0_53 = arith.constant 0 : index
    %c0_54 = arith.constant 0 : index
    %239 = vector.load %arg7[%c0_52, %c0_53, %c0_54] : memref<1x4x128xbf16, #tpu.memory_space<vmem>>, vector<1x4x128xbf16>
    %240 = vector.shape_cast %239 : vector<1x4x128xbf16> to vector<4x128xbf16>
    %cst_55 = arith.constant dense<0.000000e+00> : vector<4x128xf32>
    %241 = tpu.matmul %240, %238, %cst_55 {dimension_numbers = #tpu.dot_dimension_numbers<[1], [0], [0], [1], [0, 0, 1, 1], [], []>} : vector<4x128xbf16>, vector<128x128xbf16>, vector<4x128xf32> -> vector<4x128xf32>
    %242 = vector.broadcast %87 : vector<1x128xf32> to vector<4x128xf32>
    %243 = arith.mulf %241, %242 : vector<4x128xf32>
    %c0_56 = arith.constant 0 : index
    %c0_57 = arith.constant 0 : index
    %c0_58 = arith.constant 0 : index
    %244 = vector.load %arg8[%c0_56, %c0_57, %c0_58] : memref<1x4x128xf32, #tpu.memory_space<vmem>>, vector<1x4x128xf32>
    %245 = vector.shape_cast %244 : vector<1x4x128xf32> to vector<4x128xf32>
    %246 = vector.shape_cast %243 : vector<4x128xf32> to vector<1x4x128xf32>
    tpu.vector_store %arg8[%c0_56, %c0_57, %c0_58], %246 {strides = array<i32>} : memref<1x4x128xf32, #tpu.memory_space<vmem>>, vector<1x4x128xf32>,
    %247 = arith.mulf %87, %156 : vector<1x128xf32>
    %c0_59 = arith.constant 0 : index
    %c0_60 = arith.constant 0 : index
    %c0_61 = arith.constant 0 : index
    %248 = vector.load %arg9[%c0_59, %c0_60, %c0_61] : memref<1x1x128xf32, #tpu.memory_space<vmem>>, vector<1x1x128xf32>
    %249 = vector.shape_cast %248 : vector<1x1x128xf32> to vector<1x128xf32>
    %250 = vector.shape_cast %247 : vector<1x128xf32> to vector<1x1x128xf32>
    tpu.vector_store %arg9[%c0_59, %c0_60, %c0_61], %250 {strides = array<i32>} : memref<1x1x128xf32, #tpu.memory_space<vmem>>, vector<1x1x128xf32>,
    return
  }
  func.func @transform_0(%arg0: i32, %arg1: i32, %arg2: memref<18xf32, #tpu.memory_space<smem>>, %arg3: memref<6xf32, #tpu.memory_space<smem>>, %arg4: memref<4xi32, #tpu.memory_space<smem>>) -> (i32, i32) {
    %c0_i32 = arith.constant 0 : i32
    %c0_i32_0 = arith.constant 0 : i32
    %c0_i32_1 = arith.constant 0 : i32
    return %c0_i32, %c0_i32_0 : i32, i32
  }
  func.func @transform_1(%arg0: i32, %arg1: i32, %arg2: memref<18xf32, #tpu.memory_space<smem>>, %arg3: memref<6xf32, #tpu.memory_space<smem>>, %arg4: memref<4xi32, #tpu.memory_space<smem>>) -> (i32, i32) {
    %c0_i32 = arith.constant 0 : i32
    %c0_i32_0 = arith.constant 0 : i32
    return %c0_i32, %arg1 : i32, i32
  }
  func.func @transform_2(%arg0: i32, %arg1: i32, %arg2: memref<18xf32, #tpu.memory_space<smem>>, %arg3: memref<6xf32, #tpu.memory_space<smem>>, %arg4: memref<4xi32, #tpu.memory_space<smem>>) -> (i32, i32, i32) {
    %c2_i32 = arith.constant 2 : i32
    %0 = arith.muli %arg0, %c2_i32 : i32
    %1 = arith.addi %0, %arg1 : i32
    %2 = arith.index_cast %1 : i32 to index
    %3 = memref.load %arg4[%2] : memref<4xi32, #tpu.memory_space<smem>>
    %c0_i32 = arith.constant 0 : i32
    %c0_i32_0 = arith.constant 0 : i32
    return %arg0, %c0_i32, %3 : i32, i32, i32
  }
  func.func @transform_3(%arg0: i32, %arg1: i32, %arg2: memref<18xf32, #tpu.memory_space<smem>>, %arg3: memref<6xf32, #tpu.memory_space<smem>>, %arg4: memref<4xi32, #tpu.memory_space<smem>>) -> (i32, i32, i32) {
    %c0_i32 = arith.constant 0 : i32
    %c0_i32_0 = arith.constant 0 : i32
    return %arg0, %c0_i32, %arg1 : i32, i32, i32
  }
  func.func @transform_4(%arg0: i32, %arg1: i32, %arg2: memref<18xf32, #tpu.memory_space<smem>>, %arg3: memref<6xf32, #tpu.memory_space<smem>>, %arg4: memref<4xi32, #tpu.memory_space<smem>>) -> (i32, i32, i32) {
    %c0_i32 = arith.constant 0 : i32
    %c0_i32_0 = arith.constant 0 : i32
    return %arg0, %c0_i32, %arg1 : i32, i32, i32
  }
}

module attributes {stable_mosaic.version = 11 : i64} {
  func.func @bev_corr_kernel(%arg0: i32, %arg1: i32, %arg2: memref<18xf32, #tpu.memory_space<smem>>, %arg3: memref<6xf32, #tpu.memory_space<smem>>, %arg4: memref<4xi32, #tpu.memory_space<smem>>, %arg5: memref<128x128xi32, #tpu.memory_space<vmem>>, %arg6: memref<3x128xf32, #tpu.memory_space<vmem>>, %arg7: memref<1x4x128xbf16, #tpu.memory_space<vmem>>, %arg8: memref<1x4x128xf32, #tpu.memory_space<vmem>>, %arg9: memref<1x1x128xf32, #tpu.memory_space<vmem>>) attributes {dimension_semantics = [#tpu.dimension_semantics<parallel>, #tpu.dimension_semantics<arbitrary>], iteration_bounds = array<i64: 2, 2>, scalar_prefetch = 3 : i64, scratch_operands = 0 : i64, tpu.core_type = #tpu.core_type<tc>, window_params = [{pipeline_mode = #tpu.pipeline_mode<synchronous>, transform_indices = @transform_0, window_bounds = array<i64: 128, 128>}, {transform_indices = @transform_1, window_bounds = array<i64: 3, 128>}, {transform_indices = @transform_2, window_bounds = array<i64: 1, 4, 128>}, {transform_indices = @transform_3, window_bounds = array<i64: 1, 4, 128>}, {transform_indices = @transform_4, window_bounds = array<i64: 1, 1, 128>}]} {
    %c0 = arith.constant 0 : index
    %c0_0 = arith.constant 0 : index
    %0 = vector.load %arg6[%c0, %c0_0] : memref<3x128xf32, #tpu.memory_space<vmem>>, vector<3x128xf32>
    %1 = vector.extract_strided_slice %0 {offsets = [0, 0], sizes = [1, 128], strides = [1, 1]} : vector<3x128xf32> to vector<1x128xf32>
    %c3_i32 = arith.constant 3 : i32
    %2 = arith.muli %arg0, %c3_i32 : i32
    %c0_i32 = arith.constant 0 : i32
    %3 = arith.addi %2, %c0_i32 : i32
    %4 = arith.index_cast %3 : i32 to index
    %5 = memref.load %arg3[%4] : memref<6xf32, #tpu.memory_space<smem>>
    %6 = vector.broadcast %5 : f32 to vector<1x128xf32>
    %7 = arith.subf %1, %6 : vector<1x128xf32>
    %8 = vector.extract_strided_slice %0 {offsets = [1, 0], sizes = [1, 128], strides = [1, 1]} : vector<3x128xf32> to vector<1x128xf32>
    %c3_i32_1 = arith.constant 3 : i32
    %9 = arith.muli %arg0, %c3_i32_1 : i32
    %c1_i32 = arith.constant 1 : i32
    %10 = arith.addi %9, %c1_i32 : i32
    %11 = arith.index_cast %10 : i32 to index
    %12 = memref.load %arg3[%11] : memref<6xf32, #tpu.memory_space<smem>>
    %13 = vector.broadcast %12 : f32 to vector<1x128xf32>
    %14 = arith.subf %8, %13 : vector<1x128xf32>
    %15 = vector.extract_strided_slice %0 {offsets = [2, 0], sizes = [1, 128], strides = [1, 1]} : vector<3x128xf32> to vector<1x128xf32>
    %c3_i32_2 = arith.constant 3 : i32
    %16 = arith.muli %arg0, %c3_i32_2 : i32
    %c2_i32 = arith.constant 2 : i32
    %17 = arith.addi %16, %c2_i32 : i32
    %18 = arith.index_cast %17 : i32 to index
    %19 = memref.load %arg3[%18] : memref<6xf32, #tpu.memory_space<smem>>
    %20 = vector.broadcast %19 : f32 to vector<1x128xf32>
    %21 = arith.subf %15, %20 : vector<1x128xf32>
    %c9_i32 = arith.constant 9 : i32
    %22 = arith.muli %arg0, %c9_i32 : i32
    %c0_i32_3 = arith.constant 0 : i32
    %23 = arith.addi %22, %c0_i32_3 : i32
    %24 = arith.index_cast %23 : i32 to index
    %25 = memref.load %arg2[%24] : memref<18xf32, #tpu.memory_space<smem>>
    %c9_i32_4 = arith.constant 9 : i32
    %26 = arith.muli %arg0, %c9_i32_4 : i32
    %c1_i32_5 = arith.constant 1 : i32
    %27 = arith.addi %26, %c1_i32_5 : i32
    %28 = arith.index_cast %27 : i32 to index
    %29 = memref.load %arg2[%28] : memref<18xf32, #tpu.memory_space<smem>>
    %c9_i32_6 = arith.constant 9 : i32
    %30 = arith.muli %arg0, %c9_i32_6 : i32
    %c2_i32_7 = arith.constant 2 : i32
    %31 = arith.addi %30, %c2_i32_7 : i32
    %32 = arith.index_cast %31 : i32 to index
    %33 = memref.load %arg2[%32] : memref<18xf32, #tpu.memory_space<smem>>
    %c9_i32_8 = arith.constant 9 : i32
    %34 = arith.muli %arg0, %c9_i32_8 : i32
    %c3_i32_9 = arith.constant 3 : i32
    %35 = arith.addi %34, %c3_i32_9 : i32
    %36 = arith.index_cast %35 : i32 to index
    %37 = memref.load %arg2[%36] : memref<18xf32, #tpu.memory_space<smem>>
    %c9_i32_10 = arith.constant 9 : i32
    %38 = arith.muli %arg0, %c9_i32_10 : i32
    %c4_i32 = arith.constant 4 : i32
    %39 = arith.addi %38, %c4_i32 : i32
    %40 = arith.index_cast %39 : i32 to index
    %41 = memref.load %arg2[%40] : memref<18xf32, #tpu.memory_space<smem>>
    %c9_i32_11 = arith.constant 9 : i32
    %42 = arith.muli %arg0, %c9_i32_11 : i32
    %c5_i32 = arith.constant 5 : i32
    %43 = arith.addi %42, %c5_i32 : i32
    %44 = arith.index_cast %43 : i32 to index
    %45 = memref.load %arg2[%44] : memref<18xf32, #tpu.memory_space<smem>>
    %c9_i32_12 = arith.constant 9 : i32
    %46 = arith.muli %arg0, %c9_i32_12 : i32
    %c6_i32 = arith.constant 6 : i32
    %47 = arith.addi %46, %c6_i32 : i32
    %48 = arith.index_cast %47 : i32 to index
    %49 = memref.load %arg2[%48] : memref<18xf32, #tpu.memory_space<smem>>
    %c9_i32_13 = arith.constant 9 : i32
    %50 = arith.muli %arg0, %c9_i32_13 : i32
    %c7_i32 = arith.constant 7 : i32
    %51 = arith.addi %50, %c7_i32 : i32
    %52 = arith.index_cast %51 : i32 to index
    %53 = memref.load %arg2[%52] : memref<18xf32, #tpu.memory_space<smem>>
    %c9_i32_14 = arith.constant 9 : i32
    %54 = arith.muli %arg0, %c9_i32_14 : i32
    %c8_i32 = arith.constant 8 : i32
    %55 = arith.addi %54, %c8_i32 : i32
    %56 = arith.index_cast %55 : i32 to index
    %57 = memref.load %arg2[%56] : memref<18xf32, #tpu.memory_space<smem>>
    %58 = vector.broadcast %25 : f32 to vector<1x128xf32>
    %59 = arith.mulf %58, %7 : vector<1x128xf32>
    %60 = vector.broadcast %29 : f32 to vector<1x128xf32>
    %61 = arith.mulf %60, %14 : vector<1x128xf32>
    %62 = arith.addf %59, %61 : vector<1x128xf32>
    %63 = vector.broadcast %33 : f32 to vector<1x128xf32>
    %64 = arith.mulf %63, %21 : vector<1x128xf32>
    %65 = arith.addf %62, %64 : vector<1x128xf32>
    %66 = vector.broadcast %37 : f32 to vector<1x128xf32>
    %67 = arith.mulf %66, %7 : vector<1x128xf32>
    %68 = vector.broadcast %41 : f32 to vector<1x128xf32>
    %69 = arith.mulf %68, %14 : vector<1x128xf32>
    %70 = arith.addf %67, %69 : vector<1x128xf32>
    %71 = vector.broadcast %45 : f32 to vector<1x128xf32>
    %72 = arith.mulf %71, %21 : vector<1x128xf32>
    %73 = arith.addf %70, %72 : vector<1x128xf32>
    %74 = vector.broadcast %49 : f32 to vector<1x128xf32>
    %75 = arith.mulf %74, %7 : vector<1x128xf32>
    %76 = vector.broadcast %53 : f32 to vector<1x128xf32>
    %77 = arith.mulf %76, %14 : vector<1x128xf32>
    %78 = arith.addf %75, %77 : vector<1x128xf32>
    %79 = vector.broadcast %57 : f32 to vector<1x128xf32>
    %80 = arith.mulf %79, %21 : vector<1x128xf32>
    %81 = arith.addf %78, %80 : vector<1x128xf32>
    %cst = arith.constant 9.99999997E-7 : f32
    %82 = vector.broadcast %cst : f32 to vector<1x128xf32>
    %83 = arith.maximumf %81, %82 : vector<1x128xf32>
    %cst_15 = arith.constant 9.99999997E-7 : f32
    %84 = vector.broadcast %cst_15 : f32 to vector<1x128xf32>
    %85 = arith.cmpf ogt, %83, %84 : vector<1x128xf32>
    %86 = arith.extui %85 : vector<1x128xi1> to vector<1x128xi32>
    %87 = arith.sitofp %86 : vector<1x128xi32> to vector<1x128xf32>
    %cst_16 = arith.constant 1.000000e+00 : f32
    %88 = vector.broadcast %cst_16 : f32 to vector<1x128xf32>
    %89 = arith.divf %88, %83 : vector<1x128xf32>
    %90 = arith.mulf %65, %89 : vector<1x128xf32>
    %91 = arith.mulf %90, %87 : vector<1x128xf32>
    %92 = arith.mulf %73, %89 : vector<1x128xf32>
    %93 = arith.mulf %92, %87 : vector<1x128xf32>
    %94 = math.floor %91 : vector<1x128xf32>
    %95 = math.floor %93 : vector<1x128xf32>
    %cst_17 = arith.constant 1.000000e+00 : f32
    %96 = vector.broadcast %cst_17 : f32 to vector<1x128xf32>
    %97 = arith.addf %94, %96 : vector<1x128xf32>
    %cst_18 = arith.constant 1.000000e+00 : f32
    %98 = vector.broadcast %cst_18 : f32 to vector<1x128xf32>
    %99 = arith.addf %95, %98 : vector<1x128xf32>
    %cst_19 = arith.constant 1.000000e+00 : f32
    %100 = vector.broadcast %cst_19 : f32 to vector<1x128xf32>
    %101 = arith.addf %94, %100 : vector<1x128xf32>
    %cst_20 = arith.constant 1.000000e+00 : f32
    %102 = vector.broadcast %cst_20 : f32 to vector<1x128xf32>
    %103 = arith.addf %95, %102 : vector<1x128xf32>
    %cst_21 = arith.constant 0.000000e+00 : f32
    %c31_i32 = arith.constant 31 : i32
    %104 = vector.broadcast %cst_21 : f32 to vector<1x128xf32>
    %105 = arith.maximumf %104, %94 : vector<1x128xf32>
    %106 = arith.sitofp %c31_i32 : i32 to f32
    %107 = vector.broadcast %106 : f32 to vector<1x128xf32>
    %108 = arith.minimumf %107, %105 : vector<1x128xf32>
    %cst_22 = arith.constant 0.000000e+00 : f32
    %c7_i32_23 = arith.constant 7 : i32
    %109 = vector.broadcast %cst_22 : f32 to vector<1x128xf32>
    %110 = arith.maximumf %109, %95 : vector<1x128xf32>
    %111 = arith.sitofp %c7_i32_23 : i32 to f32
    %112 = vector.broadcast %111 : f32 to vector<1x128xf32>
    %113 = arith.minimumf %112, %110 : vector<1x128xf32>
    %cst_24 = arith.constant 0.000000e+00 : f32
    %c31_i32_25 = arith.constant 31 : i32
    %114 = vector.broadcast %cst_24 : f32 to vector<1x128xf32>
    %115 = arith.maximumf %114, %97 : vector<1x128xf32>
    %116 = arith.sitofp %c31_i32_25 : i32 to f32
    %117 = vector.broadcast %116 : f32 to vector<1x128xf32>
    %118 = arith.minimumf %117, %115 : vector<1x128xf32>
    %cst_26 = arith.constant 0.000000e+00 : f32
    %c7_i32_27 = arith.constant 7 : i32
    %119 = vector.broadcast %cst_26 : f32 to vector<1x128xf32>
    %120 = arith.maximumf %119, %95 : vector<1x128xf32>
    %121 = arith.sitofp %c7_i32_27 : i32 to f32
    %122 = vector.broadcast %121 : f32 to vector<1x128xf32>
    %123 = arith.minimumf %122, %120 : vector<1x128xf32>
    %cst_28 = arith.constant 0.000000e+00 : f32
    %c31_i32_29 = arith.constant 31 : i32
    %124 = vector.broadcast %cst_28 : f32 to vector<1x128xf32>
    %125 = arith.maximumf %124, %94 : vector<1x128xf32>
    %126 = arith.sitofp %c31_i32_29 : i32 to f32
    %127 = vector.broadcast %126 : f32 to vector<1x128xf32>
    %128 = arith.minimumf %127, %125 : vector<1x128xf32>
    %cst_30 = arith.constant 0.000000e+00 : f32
    %c7_i32_31 = arith.constant 7 : i32
    %129 = vector.broadcast %cst_30 : f32 to vector<1x128xf32>
    %130 = arith.maximumf %129, %99 : vector<1x128xf32>
    %131 = arith.sitofp %c7_i32_31 : i32 to f32
    %132 = vector.broadcast %131 : f32 to vector<1x128xf32>
    %133 = arith.minimumf %132, %130 : vector<1x128xf32>
    %cst_32 = arith.constant 0.000000e+00 : f32
    %c31_i32_33 = arith.constant 31 : i32
    %134 = vector.broadcast %cst_32 : f32 to vector<1x128xf32>
    %135 = arith.maximumf %134, %101 : vector<1x128xf32>
    %136 = arith.sitofp %c31_i32_33 : i32 to f32
    %137 = vector.broadcast %136 : f32 to vector<1x128xf32>
    %138 = arith.minimumf %137, %135 : vector<1x128xf32>
    %cst_34 = arith.constant 0.000000e+00 : f32
    %c7_i32_35 = arith.constant 7 : i32
    %139 = vector.broadcast %cst_34 : f32 to vector<1x128xf32>
    %140 = arith.maximumf %139, %103 : vector<1x128xf32>
    %141 = arith.sitofp %c7_i32_35 : i32 to f32
    %142 = vector.broadcast %141 : f32 to vector<1x128xf32>
    %143 = arith.minimumf %142, %140 : vector<1x128xf32>
    %cst_36 = arith.constant 0.000000e+00 : f32
    %144 = vector.broadcast %cst_36 : f32 to vector<1x128xf32>
    %145 = arith.cmpf oge, %91, %144 : vector<1x128xf32>
    %cst_37 = arith.constant 3.100000e+01 : f32
    %146 = vector.broadcast %cst_37 : f32 to vector<1x128xf32>
    %147 = arith.cmpf ole, %91, %146 : vector<1x128xf32>
    %148 = arith.andi %145, %147 : vector<1x128xi1>
    %cst_38 = arith.constant 0.000000e+00 : f32
    %149 = vector.broadcast %cst_38 : f32 to vector<1x128xf32>
    %150 = arith.cmpf oge, %93, %149 : vector<1x128xf32>
    %cst_39 = arith.constant 7.000000e+00 : f32
    %151 = vector.broadcast %cst_39 : f32 to vector<1x128xf32>
    %152 = arith.cmpf ole, %93, %151 : vector<1x128xf32>
    %153 = arith.andi %150, %152 : vector<1x128xi1>
    %154 = arith.andi %148, %153 : vector<1x128xi1>
    %155 = arith.extui %154 : vector<1x128xi1> to vector<1x128xi32>
    %156 = arith.sitofp %155 : vector<1x128xi32> to vector<1x128xf32>
    %157 = arith.subf %138, %91 : vector<1x128xf32>
    %158 = arith.subf %143, %93 : vector<1x128xf32>
    %159 = arith.mulf %157, %158 : vector<1x128xf32>
    %160 = arith.mulf %159, %156 : vector<1x128xf32>
    %161 = arith.subf %91, %128 : vector<1x128xf32>
    %162 = arith.subf %133, %93 : vector<1x128xf32>
    %163 = arith.mulf %161, %162 : vector<1x128xf32>
    %164 = arith.mulf %163, %156 : vector<1x128xf32>
    %165 = arith.subf %118, %91 : vector<1x128xf32>
    %166 = arith.subf %93, %123 : vector<1x128xf32>
    %167 = arith.mulf %165, %166 : vector<1x128xf32>
    %168 = arith.mulf %167, %156 : vector<1x128xf32>
    %169 = arith.subf %91, %108 : vector<1x128xf32>
    %170 = arith.subf %93, %113 : vector<1x128xf32>
    %171 = arith.mulf %169, %170 : vector<1x128xf32>
    %172 = arith.mulf %171, %156 : vector<1x128xf32>
    %c2_i32_40 = arith.constant 2 : i32
    %173 = arith.muli %arg0, %c2_i32_40 : i32
    %174 = arith.addi %173, %arg1 : i32
    %175 = arith.index_cast %174 : i32 to index
    %176 = memref.load %arg4[%175] : memref<4xi32, #tpu.memory_space<smem>>
    %c4_i32_41 = arith.constant 4 : i32
    %177 = arith.muli %176, %c4_i32_41 : i32
    %178 = arith.sitofp %177 : i32 to f32
    %179 = vector.broadcast %178 : f32 to vector<1x128xf32>
    %180 = arith.subf %113, %179 : vector<1x128xf32>
    %cst_42 = arith.constant 3.200000e+01 : f32
    %181 = vector.broadcast %cst_42 : f32 to vector<1x128xf32>
    %182 = arith.mulf %180, %181 : vector<1x128xf32>
    %183 = arith.addf %182, %108 : vector<1x128xf32>
    %184 = arith.fptosi %183 : vector<1x128xf32> to vector<1x128xi32>
    %185 = vector.broadcast %178 : f32 to vector<1x128xf32>
    %186 = arith.subf %123, %185 : vector<1x128xf32>
    %cst_43 = arith.constant 3.200000e+01 : f32
    %187 = vector.broadcast %cst_43 : f32 to vector<1x128xf32>
    %188 = arith.mulf %186, %187 : vector<1x128xf32>
    %189 = arith.addf %188, %118 : vector<1x128xf32>
    %190 = arith.fptosi %189 : vector<1x128xf32> to vector<1x128xi32>
    %191 = vector.broadcast %178 : f32 to vector<1x128xf32>
    %192 = arith.subf %133, %191 : vector<1x128xf32>
    %cst_44 = arith.constant 3.200000e+01 : f32
    %193 = vector.broadcast %cst_44 : f32 to vector<1x128xf32>
    %194 = arith.mulf %192, %193 : vector<1x128xf32>
    %195 = arith.addf %194, %128 : vector<1x128xf32>
    %196 = arith.fptosi %195 : vector<1x128xf32> to vector<1x128xi32>
    %197 = vector.broadcast %178 : f32 to vector<1x128xf32>
    %198 = arith.subf %143, %197 : vector<1x128xf32>
    %cst_45 = arith.constant 3.200000e+01 : f32
    %199 = vector.broadcast %cst_45 : f32 to vector<1x128xf32>
    %200 = arith.mulf %198, %199 : vector<1x128xf32>
    %201 = arith.addf %200, %138 : vector<1x128xf32>
    %202 = arith.fptosi %201 : vector<1x128xf32> to vector<1x128xi32>
    %c0_46 = arith.constant 0 : index
    %c0_47 = arith.constant 0 : index
    %203 = vector.load %arg5[%c0_46, %c0_47] : memref<128x128xi32, #tpu.memory_space<vmem>>, vector<128x128xi32>
    %204 = vector.broadcast %184 : vector<1x128xi32> to vector<128x128xi32>
    %205 = arith.cmpi eq, %203, %204 : vector<128x128xi32>
    %cst_48 = arith.constant 0.000000e+00 : f32
    %206 = vector.shape_cast %160 : vector<1x128xf32> to vector<1x128xf32>
    %207 = vector.broadcast %206 : vector<1x128xf32> to vector<128x128xf32>
    %208 = vector.broadcast %cst_48 : f32 to vector<128x128xf32>
    %209 = arith.select %205, %207, %208 : vector<128x128xi1>, vector<128x128xf32>
    %210 = vector.broadcast %190 : vector<1x128xi32> to vector<128x128xi32>
    %211 = arith.cmpi eq, %203, %210 : vector<128x128xi32>
    %cst_49 = arith.constant 0.000000e+00 : f32
    %212 = vector.shape_cast %164 : vector<1x128xf32> to vector<1x128xf32>
    %213 = vector.broadcast %212 : vector<1x128xf32> to vector<128x128xf32>
    %214 = vector.broadcast %cst_49 : f32 to vector<128x128xf32>
    %215 = arith.select %211, %213, %214 : vector<128x128xi1>, vector<128x128xf32>
    %216 = arith.addf %209, %215 : vector<128x128xf32>
    %217 = vector.broadcast %196 : vector<1x128xi32> to vector<128x128xi32>
    %218 = arith.cmpi eq, %203, %217 : vector<128x128xi32>
    %cst_50 = arith.constant 0.000000e+00 : f32
    %219 = vector.shape_cast %168 : vector<1x128xf32> to vector<1x128xf32>
    %220 = vector.broadcast %219 : vector<1x128xf32> to vector<128x128xf32>
    %221 = vector.broadcast %cst_50 : f32 to vector<128x128xf32>
    %222 = arith.select %218, %220, %221 : vector<128x128xi1>, vector<128x128xf32>
    %223 = arith.addf %216, %222 : vector<128x128xf32>
    %224 = vector.broadcast %202 : vector<1x128xi32> to vector<128x128xi32>
    %225 = arith.cmpi eq, %203, %224 : vector<128x128xi32>
    %cst_51 = arith.constant 0.000000e+00 : f32
    %226 = vector.shape_cast %172 : vector<1x128xf32> to vector<1x128xf32>
    %227 = vector.broadcast %226 : vector<1x128xf32> to vector<128x128xf32>
    %228 = vector.broadcast %cst_51 : f32 to vector<128x128xf32>
    %229 = arith.select %225, %227, %228 : vector<128x128xi1>, vector<128x128xf32>
    %230 = arith.addf %223, %229 : vector<128x128xf32>
    %231 = arith.truncf %230 : vector<128x128xf32> to vector<128x128xbf16>
    %c0_52 = arith.constant 0 : index
    %c0_53 = arith.constant 0 : index
    %c0_54 = arith.constant 0 : index
    %232 = vector.load %arg7[%c0_52, %c0_53, %c0_54] : memref<1x4x128xbf16, #tpu.memory_space<vmem>>, vector<1x4x128xbf16>
    %233 = vector.shape_cast %232 : vector<1x4x128xbf16> to vector<4x128xbf16>
    %cst_55 = arith.constant dense<0.000000e+00> : vector<4x128xf32>
    %234 = tpu.matmul %233, %231, %cst_55 {dimension_numbers = #tpu.dot_dimension_numbers<[1], [0], [0], [1], [0, 0, 1, 1], [], []>} : vector<4x128xbf16>, vector<128x128xbf16>, vector<4x128xf32> -> vector<4x128xf32>
    %235 = vector.broadcast %87 : vector<1x128xf32> to vector<4x128xf32>
    %236 = arith.mulf %234, %235 : vector<4x128xf32>
    %c0_56 = arith.constant 0 : index
    %c0_57 = arith.constant 0 : index
    %c0_58 = arith.constant 0 : index
    %237 = vector.load %arg8[%c0_56, %c0_57, %c0_58] : memref<1x4x128xf32, #tpu.memory_space<vmem>>, vector<1x4x128xf32>
    %238 = vector.shape_cast %237 : vector<1x4x128xf32> to vector<4x128xf32>
    %239 = vector.shape_cast %236 : vector<4x128xf32> to vector<1x4x128xf32>
    tpu.vector_store %arg8[%c0_56, %c0_57, %c0_58], %239 {strides = array<i32>} : memref<1x4x128xf32, #tpu.memory_space<vmem>>, vector<1x4x128xf32>,
    %240 = arith.mulf %87, %156 : vector<1x128xf32>
    %c0_59 = arith.constant 0 : index
    %c0_60 = arith.constant 0 : index
    %c0_61 = arith.constant 0 : index
    %241 = vector.load %arg9[%c0_59, %c0_60, %c0_61] : memref<1x1x128xf32, #tpu.memory_space<vmem>>, vector<1x1x128xf32>
    %242 = vector.shape_cast %241 : vector<1x1x128xf32> to vector<1x128xf32>
    %243 = vector.shape_cast %240 : vector<1x128xf32> to vector<1x1x128xf32>
    tpu.vector_store %arg9[%c0_59, %c0_60, %c0_61], %243 {strides = array<i32>} : memref<1x1x128xf32, #tpu.memory_space<vmem>>, vector<1x1x128xf32>,
    return
  }
  func.func @transform_0(%arg0: i32, %arg1: i32, %arg2: memref<18xf32, #tpu.memory_space<smem>>, %arg3: memref<6xf32, #tpu.memory_space<smem>>, %arg4: memref<4xi32, #tpu.memory_space<smem>>) -> (i32, i32) {
    %c0_i32 = arith.constant 0 : i32
    %c0_i32_0 = arith.constant 0 : i32
    %c0_i32_1 = arith.constant 0 : i32
    return %c0_i32, %c0_i32_0 : i32, i32
  }
  func.func @transform_1(%arg0: i32, %arg1: i32, %arg2: memref<18xf32, #tpu.memory_space<smem>>, %arg3: memref<6xf32, #tpu.memory_space<smem>>, %arg4: memref<4xi32, #tpu.memory_space<smem>>) -> (i32, i32) {
    %c0_i32 = arith.constant 0 : i32
    %c0_i32_0 = arith.constant 0 : i32
    return %c0_i32, %arg1 : i32, i32
  }
  func.func @transform_2(%arg0: i32, %arg1: i32, %arg2: memref<18xf32, #tpu.memory_space<smem>>, %arg3: memref<6xf32, #tpu.memory_space<smem>>, %arg4: memref<4xi32, #tpu.memory_space<smem>>) -> (i32, i32, i32) {
    %c2_i32 = arith.constant 2 : i32
    %0 = arith.muli %arg0, %c2_i32 : i32
    %1 = arith.addi %0, %arg1 : i32
    %2 = arith.index_cast %1 : i32 to index
    %3 = memref.load %arg4[%2] : memref<4xi32, #tpu.memory_space<smem>>
    %c0_i32 = arith.constant 0 : i32
    %c0_i32_0 = arith.constant 0 : i32
    return %arg0, %c0_i32, %3 : i32, i32, i32
  }
  func.func @transform_3(%arg0: i32, %arg1: i32, %arg2: memref<18xf32, #tpu.memory_space<smem>>, %arg3: memref<6xf32, #tpu.memory_space<smem>>, %arg4: memref<4xi32, #tpu.memory_space<smem>>) -> (i32, i32, i32) {
    %c0_i32 = arith.constant 0 : i32
    %c0_i32_0 = arith.constant 0 : i32
    return %arg0, %c0_i32, %arg1 : i32, i32, i32
  }
  func.func @transform_4(%arg0: i32, %arg1: i32, %arg2: memref<18xf32, #tpu.memory_space<smem>>, %arg3: memref<6xf32, #tpu.memory_space<smem>>, %arg4: memref<4xi32, #tpu.memory_space<smem>>) -> (i32, i32, i32) {
    %c0_i32 = arith.constant 0 : i32
    %c0_i32_0 = arith.constant 0 : i32
    return %arg0, %c0_i32, %arg1 : i32, i32, i32
  }
}

</mosaic_0001>

<bundles_post_ra>
// kernel: tpu_custom_call.1
= control target key start
LH: loop header
LB: loop body
LE: loop exit
PB: predicated region body
PF: predicated region fallthrough
CT: control target
= control target key end

     0   :  { %s2255_s0 = inlined_call_operand.hbm [shape: f32[18], index: 0, kind: input, shape index: {}]   ;;  %s2256_s3 = inlined_call_operand.hbm [shape: s16[128,128], index: 3, kind: input, shape index: {}]   ;;  %s2257_s4 = inlined_call_operand.hbm [shape: f32[3,256], index: 4, kind: input, shape index: {}]   ;;  %s2258_s5 = inlined_call_operand.hbm [shape: bf16[2,4,256], index: 5, kind: input, shape index: {}]   ;;  %s2259_s6 = inlined_call_operand.hbm [shape: f32[2,4,256], index: 6, kind: output, shape index: {0}]   ;;  %s2260_s7 = inlined_call_operand.hbm [shape: f32[2,1,256], index: 7, kind: output, shape index: {1}]   ;;  %s2261_s1 = inlined_call_operand.hbm [shape: f32[6], index: 1, kind: input, shape index: {}]   ;;  %s2262_s2 = inlined_call_operand.hbm [shape: s32[4], index: 2, kind: input, shape index: {}]  }
   0x1   :  { %2282 = sst [smem:[#allocation34_spill]] %s2256_s3  ;;  %s1247_s26 = scalar_lea.hbm %s2255_s0, 16 }
   0x2   :  { %2283 = sst [smem:[#allocation35_spill]] %s2257_s4  ;;  %p1248_p0 = scmp.ne.s32.totalorder %s2255_s0, %s1247_s26 }
   0x3   :  { %2284 = sst [smem:[#allocation36_spill]] %s2259_s6  ;;  %p1251_p1 = scmp.lt.u32.totalorder %s1247_s26, %s2255_s0 }
   0x4   :  { %2285 = sst [smem:[#allocation37_spill]] %s2260_s7 }
   0x5   :  { %p1253_p2 = pnand %p1251_p1, %p1248_p0 }
   0x7   :  { %1256 = shalt.err (!%p1253_p2)  }
   0x8   :  { %s1555_s8 = smov [#allocation3]   ;;  %s1257_s13 = scalar_lea.hbm %s2261_s1, 16 }
   0x9   :  { %14 = dma.hbm_to_smem %s2255_s0, 16, %s1555_s8, [#allocation2] }
   0xa   :  { %p1258_p3 = scmp.ne.s32.totalorder %s2261_s1, %s1257_s13  ;;  %p1261_p4 = scmp.lt.u32.totalorder %s1257_s13, %s2261_s1 }
   0xc   :  { %p1263_p5 = pnand %p1261_p4, %p1258_p3 }
   0xe   :  { %1266 = shalt.err (!%p1263_p5)  }
   0xf   :  { %s1556_s18 = smov [#allocation4]   ;;  %s1267_s22 = scalar_lea.hbm %s2262_s2, 16 }
  0x10   :  { %16 = dma.hbm_to_smem %s2261_s1, 16, %s1556_s18, [#allocation2] }
  0x11   :  { %p1268_p6 = scmp.ne.s32.totalorder %s2262_s2, %s1267_s22  ;;  %p1271_p7 = scmp.lt.u32.totalorder %s1267_s22, %s2262_s2 }
  0x13   :  { %p1273_p8 = pnand %p1271_p7, %p1268_p6 }
  0x15   :  { %1276 = shalt.err (!%p1273_p8)  }
  0x16   :  { %s1557_s27 = smov [#allocation5]  }
  0x17   :  { %18 = dma.hbm_to_smem %s2262_s2, 16, %s1557_s27, [#allocation2] }
  0x18   :  { %1477 = dma.done.wait [#allocation2], 48 }
  0x19   :  { %1478 = vsyncadd [#allocation2], 4294967248 }
  0x1a   :  { %20 = sfence }
  0x1b   :  { %21 = vsyncpa [#allocation7], 0 }
  0x1c   :  { %22 = vsyncpa [#allocation10], 0 }
  0x1d   :  { %24 = vsyncpa [#allocation10 + $0x1], 0 }
  0x1e   :  { %25 = vsyncpa [#allocation8], 0 }
  0x1f   :  { %27 = vsyncpa [#allocation8 + $0x1], 0 }
  0x20   :  { %28 = vsyncpa [#allocation14], 0 }
  0x21   :  { %30 = vsyncpa [#allocation14 + $0x1], 0  ;;  %s1643_s1 = smov 0   ;;  %s1645_s30 = smov 0  }
  0x22   :  { %s1647_s8 = smov 0   ;;  %s1649_s9 = smov 0  }
  0x23   :  { %s1651_s10 = smov 0   ;;  %s1653_s2 = smov 0  }
  0x24   :  { %s1655_s11 = smov 0   ;;  %s1657_s12 = smov 0  }
  0x25   :  { %s1659_s13 = smov 0   ;;  %s1661_s14 = smov 0  }
  0x26   :  { %s1663_s15 = smov 0   ;;  %s1665_s16 = smov 0  }
  0x27   :  { %s1667_s17 = smov 0   ;;  %s1669_s18 = smov 0  }
  0x28 LB: > { %2286 = sst [smem:[#allocation23_spill]] %s1501_s1  ;;  %s45_s19 = sadd.s32 1, %s1545_s16  ;;  %s1553_s18 = sphi %s1669_s18, %s36_s18   ;;  %s1549_s17 = sphi %s1667_s17, %s2352_s17   ;;  %s1545_s16 = sphi %s1665_s16, %s2342_s16   ;;  %s1541_s15 = sphi %s1663_s15, %s2351_s15   ;;  %s1537_s14 = sphi %s1661_s14, %s2341_s14   ;;  %s1533_s13 = sphi %s1659_s13, %s2340_s13   ;;  %s1529_s12 = sphi %s1657_s12, %s2350_s12   ;;  %s1525_s11 = sphi %s1655_s11, %s2349_s11   ;;  %s1521_s2 = sphi %s1653_s2, %s2348_s2   ;;  %s1517_s10 = sphi %s1651_s10, %s2347_s10   ;;  %s1513_s9 = sphi %s1649_s9, %s2346_s9   ;;  %s1509_s8 = sphi %s1647_s8, %s2338_s8   ;;  %s1505_s30 = sphi %s1645_s30, %s2345_s30   ;;  %s1501_s1 = sphi %s1643_s1, %s2344_s1  }
  0x29   : > { %2287 = sst [smem:[#allocation24_spill]] %s1509_s8  ;;  %s76_s20 = sadd.s32 1, %s1533_s13 }
  0x2a   : > { %2288 = sst [smem:[#allocation25_spill]] %s1533_s13  ;;  %p1715_p9 = scmp.ge.s32.totalorder %s45_s19, 2 }
  0x2b   : > { %2289 = sst [smem:[#allocation26_spill]] %s1537_s14  ;;  %p83_p10 = scmp.ne.s32.totalorder %s1533_s13, %s1529_s12 }
  0x2c   : > { %2290 = sst [smem:[#allocation27_spill]] %s1545_s16  ;;  %p2266_p11 = scmp.eq.s32.totalorder %s1553_s18, 0 }
  0x2d   : > { %s2291_s0 = scalar_select %p1715_p9, 1, 0 }
  0x2e   : > { %s2354_s19 = smov (%p1715_p9, %s45_s19), 0  ;;  %p85_p13 = por %p2266_p11, %p83_p10 }
  0x2f   : > { %2292 = sst [smem:[#allocation28_spill]] %s2354_s19  ;;  %s1732_s21 = ssub.s32 %s1545_s16, %s2354_s19 }
  0x30   : > { %p2265_p0 = scmp.lt.s32.totalorder %s1553_s18, 4  ;;  %p74_p1 = scmp.eq.s32.totalorder %s1732_s21, 0 }
  0x31   : > { %s216_s22 = sand.u32 1, %s1553_s18   ;;  %s218_s23 = sand.u32 1, %s1533_s13  }
  0x32   : > { %s1739_s24 = scalar_select %p74_p1, %s1533_s13, %s76_s20  }
  0x33   : > { %s1012_s25 = sshll.u32 %s218_s23, 2  ;;  %s1013_s26 = sshll.u32 %s1545_s16, 6 }
  0x34   : > { %2293 = sst [smem:[#allocation29_spill]] %s1739_s24  ;;  %s2294_s4 = sld [smem:[#allocation35_spill]] }
  0x35   : > { %s220_s6 = scalar_lea.vmem [#allocation9], %s1012_s25  ;;  %p1749_p2 = pnand %p2265_p0, %p85_p13 }
  0x36   : > { %s227_s7 = sshll.u32 %s220_s6, 4  ;;  %s1755_s20 = scalar_lea.sflag [#allocation10], %s216_s22  ;;  %s1753_s7 = int_to_ptr.vmem [resolvable:$true] %s227_s7 }
  0x37   : > { %p1279_p4 = pneg %p1749_p2 }
  0x3a   : > { %s1745_s29 = scalar_lea.hbm %s2294_s4, %s1013_s26  ;;  %s1282_s26 = scalar_lea.hbm %s2294_s4, 128 }
  0x3b   : > { %s1277_s23 = scalar_lea.hbm %s1745_s29, 64  ;;  %p1283_p7 = scmp.lt.u32.totalorder %s1745_s29, %s2294_s4 }
  0x3c   : > { %p1278_p3 = scmp.ne.s32.totalorder %s1745_s29, %s1277_s23  ;;  %p1284_p8 = scmp.lt.u32.totalorder %s1282_s26, %s1277_s23 }
  0x3d   : > { %p1286_p13 = scmp.lt.u32.totalorder %s1277_s23, %s1745_s29 }
  0x3e   : > { %p1280_p5 = pnand %p1279_p4, %p1278_p3  ;;  %p1285_p10 = por %p1284_p8, %p1283_p7 }
  0x40   : > { %p1281_p6 = pneg %p1280_p5  ;;  %p1287_p1 = por %p1286_p13, %p1285_p10 }
  0x42   : > { %p1288_p0 = pnand %p1287_p1, %p1281_p6 }
  0x44   : > { %1291 = shalt.err (!%p1288_p0)
}
  0x45   : > { %s1292_s22 = scalar_lea.vmem %s1753_s7, 64  ;;  %s1558_s6 = smov [#allocation9]  }
  0x46   : > { %p1293_p3 = scmp.ne.s32.totalorder %s1753_s7, %s1292_s22  ;;  %s1297_s25 = sshll.u32 %s1558_s6, 4  ;;  %s1298_s25 = int_to_ptr.vmem [resolvable:$false] %s1297_s25 }
  0x47   : > { %s1299_s27 = scalar_lea.vmem %s1298_s25, 128  ;;  %p1300_p12 = scmp.lt.s32.totalorder %s1753_s7, %s1298_s25 }
  0x48   : > { %p1295_p5 = pnand %p1293_p3, %p1279_p4  ;;  %p1301_p7 = scmp.lt.s32.totalorder %s1299_s27, %s1292_s22 }
  0x4a   : > { %p1296_p11 = pneg %p1295_p5  ;;  %p1302_p8 = por %p1301_p7, %p1300_p12 }
  0x4c   : > { %p1303_p10 = pnand %p1302_p8, %p1296_p11 }
  0x4e   : > { %1306 = shalt.err (!%p1303_p10)
}
  0x4f   : > { %1108 = dma.hbm_to_vmem [thread:$0]  (!%p1749_p2), %s1745_s29, 64, %s1753_s7, %s1755_s20  }
  0x50   : > { %s1784_s23 = sadd.s32 4294967295, %s1553_s18   ;;  %s1006_s14 = sadd.s32 4294967294, %s1553_s18  }
  0x51   : > { %p2269_p11 = scmp.eq.s32.totalorder %s1784_s23, 0  ;;  %p148_p12 = scmp.ne.s32.totalorder %s1509_s8, %s1505_s30 }
  0x52   : > { %p149_p0 = scmp.eq.s32.totalorder %s1784_s23, 3  ;;  %p154_p4 = scmp.ne.s32.totalorder %s1505_s30, %s1501_s1 }
  0x53   : > { %p2296_p6 = scmp.ne.s32.totalorder %s1529_s12, %s1525_s11  ;;  %p155_p1 = scmp.eq.s32.totalorder %s1006_s14, 3 }
  0x54   : > { %p1802_p3 = por %p149_p0, %p148_p12  ;;  %p1009_p2 = scmp.ge.s32.totalorder %s1553_s18, 1 }
  0x55   : > { %p1798_p13 = por %p2269_p11, %p2296_p6  ;;  %p1807_p5 = por %p155_p1, %p154_p4 }
  0x56   : > { %s2298_s7 = scalar_select %p1802_p3, 1, 0 }
  0x57   : > { %s2297_s26 = scalar_select %p1798_p13, 1, 0 }
  0x58   : > { %2299 = sst [smem:[#allocation30_spill]] %s2298_s7  ;;  %p190_p7 = scmp.lt.s32.totalorder %s1553_s18, 5 }
  0x59   : > { %s2300_s29 = scalar_select %p1807_p5, 1, 0 }
  0x5a   : > { %p1812_p8 = pnand %p1009_p2, %p190_p7  ;;  %s1559_s11 = smov [#allocation6]  }
  0x5b   : > { %2301 = sst [smem:[#allocation31_spill]] %s2300_s29  ;;  %s202_s22 = sshll.u32 %s1559_s11, 4  ;;  %s203_s22 = int_to_ptr.vmem [resolvable:$true] %s202_s22 }
  0x5c   : > { %s2302_s28 = scalar_select %p1812_p8, 1, 0 }
  0x5d   : > { %p1101_p10 = pneg %p1812_p8  ;;  %s2304_s3 = sld [smem:[#allocation34_spill]] }
  0x5f   : > { %p1820_p12 = pnand %p1101_p10, %p2269_p11 }
  0x61   : > { %p1309_p4 = pneg %p1820_p12 }
  0x63   : > { %s1307_s14 = scalar_lea.hbm %s2304_s3, 1024 }
  0x64   : > { %p1308_p0 = scmp.ne.s32.totalorder %s2304_s3, %s1307_s14  ;;  %p1314_p2 = scmp.lt.u32.totalorder %s1307_s14, %s2304_s3 }
  0x66   : > { %p1310_p6 = pnand %p1309_p4, %p1308_p0 }
  0x68   : > { %p1311_p1 = pneg %p1310_p6 }
  0x6a   : > { %p1316_p7 = pnand %p1314_p2, %p1311_p1 }
  0x6c   : > { %1319 = shalt.err (!%p1316_p7)
}
  0x6d   : > { %s1320_s29 = scalar_lea.vmem %s203_s22, 1024  ;;  %p1328_p3 = scmp.lt.s32.totalorder %s203_s22, %s203_s22 }
  0x6e   : > { %p1321_p10 = scmp.ne.s32.totalorder %s203_s22, %s1320_s29  ;;  %p1329_p13 = scmp.lt.s32.totalorder %s1320_s29, %s1320_s29 }
  0x70   : > { %p1323_p11 = pnand %p1321_p10, %p1309_p4  ;;  %p1330_p8 = por %p1329_p13, %p1328_p3 }
  0x72   : > { %p1324_p5 = pneg %p1323_p11 }
  0x74   : > { %p1331_p9 = pnand %p1330_p8, %p1324_p5 }
  0x76   : > { %1334 = shalt.err (!%p1331_p9)
}
  0x77   : > { %s1560_s4 = smov 64   ;;  %s1561_s13 = smov 4  }
  0x78   : > { %1104 = dma.hbm_to_vmem [thread:$0]  (!%p1820_p12), %s2304_s3, 1024, %s203_s22, [#allocation7], %s1560_s4, %s1560_s4, %s1561_s13  }
  0x79   : > { %s48_s25 = sadd.s32 1, %s1549_s17  ;;  %s2274_s27 = sshll.u32 %s1549_s17, 1 }
  0x7a   : > { %p2305_p9 = scmp.ne.s32.totalorder %s2291_s0, 0  ;;  %s100_s14 = sadd.s32 %s1545_s16, %s2274_s27 }
  0x7b   : > { %s101_s11 = sld [smem:[#allocation5 + %s100_s14]]  ;;  %p123_p13 = scmp.ne.s32.totalorder %s1517_s10, %s1513_s9 }
  0x7c   : > { %s2356_s25 = smov (!%p2305_p9, %s48_s25), %s1549_s17  ;;  %p117_p3 = scmp.ne.s32.totalorder %s1521_s2, %s1517_s10 }
  0x7d   : > { %p50_p11 = scmp.ge.s32.totalorder %s2356_s25, 2  ;;  %p2307_p5 = scmp.eq.s32.totalorder %s1784_s23, 0 }
  0x7e   : > { %p2309_p0 = scmp.eq.s32.totalorder %s1553_s18, 0  ;;  %s138_s29 = sadd.s32 1, %s1509_s8 }
  0x7f   : > { %s2358_s25 = smov (%p50_p11, %s2356_s25), 0  ;;  %p1856_p8 = por %p123_p13, %p2307_p5 }
  0x80   : > { %2306 = sst [smem:[#allocation32_spill]] %s2358_s25  ;;  %s1008_s0 = sshll.u32 %s2358_s25, 1 }
  0x81   : > { %s105_s6 = ssub.s32 %s1549_s17, %s2358_s25  ;;  %s103_s4 = sadd.s32 %s1008_s0, %s2354_s19 }
  0x82   : > { %s135_s13 = sor.u32 %s105_s6, %s1732_s21  ;;  %s104_s24 = sld [smem:[#allocation5 + %s103_s4]] }
  0x83   : > { %p136_p12 = scmp.eq.s32.totalorder %s135_s13, 0  ;;  %p1867_p4 = por %p117_p3, %p2309_p0 }
  0x84   : > { %s236_s3 = sand.u32 1, %s1521_s2   ;;  %p2312_p6 = scmp.lt.s32.totalorder %s1553_s18, 4 }
  0x85   : > { %s1873_s27 = scalar_select %p136_p12, %s1509_s8, %s138_s29  }
  0x86   : > { %p1880_p1 = pnand %p2312_p6, %p1867_p4  ;;  %s110_s13 = sadd.s32 1, %s1521_s2 }
  0x87   : > { %2311 = sst [smem:[#allocation33_spill]] %s1873_s27  ;;  %s1014_s19 = sshll.u32 %s236_s3, 1 }
  0x88   : > { %s1090_s0 = scalar_select %p1867_p4, [#allocation5], [#allocation15] }
  0x89   : > { %s106_s4 = ssub.s32 %s101_s11, %s104_s24  ;;  %s2360_s14 = smov (!%p1867_p4, %s100_s14), 0 }
  0x8a   : > { %s107_s25 = sor.u32 %s106_s4, %s105_s6  ;;  %p2314_p7 = pmov %p2312_p6 }
  0x8b   : > { %p108_p2 = scmp.eq.s32.totalorder %s107_s25, 0  ;;  %p2315_p10 = pmov %p2312_p6 }
  0x8c   : > { %s2362_s0 = smov (!%p2314_p7, %s1090_s0), [#allocation16]  ;;  %s238_s27 = scalar_lea.vmem [#allocation11], %s1014_s19 }
  0x8d   : > { %s1890_s29 = scalar_select %p108_p2, %s1521_s2, %s110_s13  }
  0x8e   : > { %s2364_s14 = smov (!%p2315_p10, %s2360_s14), 0  ;;  %s250_s8 = sshll.u32 %s238_s27, 4  ;;  %s1898_s8 = int_to_ptr.vmem [resolvable:$true] %s250_s8 }
  0x8f   : > { %s241_s16 = sld [smem:[%s2362_s0 + %s2364_s14]]  ;;  %s2316_s1 = sshll.u32 %s1549_s17, 1 }
  0x90   : > { %p1337_p11 = pneg %p1880_p1  ;;  %s1340_s27 = scalar_lea.hbm %s2258_s5, 128 }
  0x95   : > { %s246_s7 = sadd.s32 %s2316_s1, %s241_s16 }
  0x96   : > { %s1017_s11 = sshll.u32 %s246_s7, 5 }
  0x97   : > { %s248_s25 = scalar_lea.hbm %s2258_s5, %s1017_s11 }
  0x98   : > { %s1335_s24 = scalar_lea.hbm %s248_s25, 32  ;;  %p1341_p5 = scmp.lt.u32.totalorder %s248_s25, %s2258_s5 }
  0x99   : > { %p1336_p9 = scmp.ne.s32.totalorder %s248_s25, %s1335_s24  ;;  %p1342_p12 = scmp.lt.u32.totalorder %s1340_s27, %s1335_s24 }
  0x9a   : > { %p1344_p4 = scmp.lt.u32.totalorder %s1335_s24, %s248_s25 }
  0x9b   : > { %p1338_p13 = pnand %p1337_p11, %p1336_p9  ;;  %p1343_p0 = por %p1342_p12, %p1341_p5 }
  0x9d   : > { %p1339_p3 = pneg %p1338_p13  ;;  %p1345_p6 = por %p1344_p4, %p1343_p0 }
  0x9f   : > { %p1346_p2 = pnand %p1345_p6, %p1339_p3 }
  0xa1   : > { %1349 = shalt.err (!%p1346_p2)
}
  0xa2   : > { %s1350_s7 = scalar_lea.vmem %s1898_s8, 32  ;;  %s1562_s9 = smov [#allocation11]  }
  0xa3   : > { %p1351_p7 = scmp.ne.s32.totalorder %s1898_s8, %s1350_s7  ;;  %s1355_s0 = sshll.u32 %s1562_s9, 4  ;;  %s1356_s0 = int_to_ptr.vmem [resolvable:$false] %s1355_s0 }
  0xa4   : > { %s1357_s4 = scalar_lea.vmem %s1356_s0, 64  ;;  %p1358_p13 = scmp.lt.s32.totalorder %s1898_s8, %s1356_s0 }
  0xa5   : > { %p1353_p10 = pnand %p1351_p7, %p1337_p11  ;;  %p1359_p5 = scmp.lt.s32.totalorder %s1357_s4, %s1350_s7 }
  0xa7   : > { %p1354_p9 = pneg %p1353_p10  ;;  %p1360_p12 = por %p1359_p5, %p1358_p13 }
  0xa9   : > { %p1361_p0 = pnand %p1360_p12, %p1354_p9 }
  0xab   : > { %1364 = shalt.err (!%p1361_p0)
}
  0xac   : > { %1113 = dma.hbm_to_vmem [thread:$0]  (!%p1880_p1), %s248_s25, 32, %s1898_s8, %s1755_s20  }
  0xad   : > { %p2317_p3 = scmp.ne.s32.totalorder %s2302_s28, 0 }
  0xae   : > { %p2318_p11 = scmp.eq.s32.totalorder (!%p2317_p3), %s1784_s23, 0 }
  0xaf   : > { %259 = sbr.rel (%p2317_p3) target bundleno = 538 (0x21a), region = 32 }
  0xb6   : > { %1480 = dma.done.wait (%p2318_p11), [#allocation7], 1024   ;;  %p2319_p4 = pmov %p2318_p11 }
  0xb7   : > { %s265_s13 = sand.u32 1, %s1784_s23   ;;  %s267_s11 = sand.u32 1, %s1529_s12  }
  0xb8   : > { %1482 = vsyncadd (%p2319_p4), [#allocation7], 4294966272  ;;  %s1020_s6 = sshll.u32 %s267_s11, 2  ;;  %s266_s3 = scalar_lea.sflag [#allocation10], %s265_s13 }
  0xb9   : > { %s269_s21 = scalar_lea.vmem [#allocation9], %s1020_s6  ;;  %p2320_p6 = scmp.ne.s32.totalorder %s2297_s26, 0 }
  0xbb   : > { %1484 = dma.done.wait (%p2320_p6), %s266_s3, 64  }
  0xbc   : > { %1486 = vsyncadd (%p2320_p6), %s266_s3, 4294967232  ;;  %s276_s8 = sand.u32 1, %s1517_s10  }
  0xbd   : > { %s1937_s20 = sshll.u32 %s276_s8, 1 }
  0xbe   : > { %1488 = dma.done.wait (%p1856_p8), %s266_s3, 32  }
  0xbf   : > { %1490 = vsyncadd (%p1856_p8), %s266_s3, 4294967264  ;;  %s317_s23 = smul.u32 3, %s1541_s15  ;;  %v1563_v0 = vmov 0.0   ;;  %vm1564_vm0 = vmmov 0   ;;  %v316_v1 = vld [vmem:[%s269_s21] sm:$0x7]  ;;  %v472_v58 = vlaneseq }
  0xc0   : > { %1059 = vmatprep.subr.bf16.mxu0 %v1563_v0  ;;  %1075 = vmatprep.mubr.msk.bf16.mxu0 %vm1564_vm0, %v1563_v0  ;;  %s329_s27 = smul.u32 9, %s1541_s15  ;;  %s2321_s21 = sld [smem:[#allocation26_spill]] }
  0xc1   : > { %s321_s26 = sadd.s32 1, %s317_s23  ;;  %s325_s25 = sadd.s32 2, %s317_s23 }
  0xc2   : > { %s318_s24 = sld [smem:[#allocation4 + %s317_s23]]  ;;  %s331_s1 = sadd.s32 1, %s329_s27 }
  0xc3   : > { %s322_s14 = sld [smem:[#allocation4 + %s321_s26]]  ;;  %s333_s16 = sadd.s32 2, %s329_s27 }
  0xc4   : > { %s326_s19 = sld [smem:[#allocation4 + %s325_s25]]  ;;  %s341_s7 = sadd.s32 6, %s329_s27 }
  0xc5   : > { %s337_s22 = sadd.s32 4, %s329_s27  ;;  %s342_s9 = sld [smem:[#allocation3 + %s341_s7]] }
  0xc6   : > { %s343_s0 = sadd.s32 7, %s329_s27  ;;  %s345_s4 = sadd.s32 8, %s329_s27 }
  0xc7   : > { %s344_s13 = sld [smem:[#allocation3 + %s343_s0]]  ;;  %s335_s8 = sadd.s32 3, %s329_s27 }
  0xc8   : > { %v319_v2 = vstv %s318_s24  ;;  %s346_s11 = sld [smem:[#allocation3 + %s345_s4]]  ;;  %s339_s23 = sadd.s32 5, %s329_s27 }
  0xc9   : > { %v323_v3 = vstv %s322_s14  ;;  %s332_s6 = sld [smem:[#allocation3 + %s331_s1]]  ;;  %v320_v5 = vsub.f32 %v316_v1, %v319_v2  ;;  %s1025_s24 = sshll.u32 %s1541_s15, 1 }
  0xca   : > { %v327_v4 = vstv %s326_s19  ;;  %s338_s3 = sld [smem:[#allocation3 + %s337_s22]]  ;;  %v324_v6 = vsub.f32 %v316_v1, %v323_v3  ;;  %s1950_s14 = sadd.s32 %s2321_s21, %s1025_s24 }
  0xcb   : > { %v328_v7 = vsub.f32 %v316_v1, %v327_v4  ;;  %s330_s26 = sld [smem:[#allocation3 + %s329_s27]]  ;;  %v375_v8 = vstv %s342_s9  ;;  %s2327_s1 = scalar_lea.vmem [#allocation11], %s1937_s20 }
  0xcc   : > { %s334_s25 = sld [smem:[#allocation3 + %s333_s16]]  ;;  %v376_v11 = vmul.f32 %v375_v8, %v320_v5  ;;  %s2141_s16 = sand.u32 1, %s1505_s30  }
  0xcd   : > { %s336_s28 = sld [smem:[#allocation3 + %s335_s8]]  ;;  %v377_v9 = vstv %s344_s13  ;;  %s311_s22 = scalar_lea.vmem [#allocation13], %s2141_s16 }
  0xce   : > { %s340_s7 = sld [smem:[#allocation3 + %s339_s23]]  ;;  %v383_v10 = vstv %s346_s11  ;;  %v378_v12 = vmul.f32 %v377_v9, %v324_v6  ;;  %s1047_s9 = sshll.u32 %s1950_s14, 4 }
  0xcf   : > { %v384_v13 = vmul.f32 %v383_v10, %v328_v7  ;;  %v349_v14 = vstv %s332_s6  ;;  %s434_s19 = sld [smem:[#allocation5 + %s1950_s14]]  ;;  %s858_s0 = sshll.u32 %s311_s22, 4  ;;  %s859_s0 = int_to_ptr.vmem [resolvable:$true] %s858_s0 }
  0xd0   : > { %v363_v15 = vstv %s338_s3  ;;  %v380_v16 = vrot.slane %v378_v12, 1  ;;  %v350_v20 = vmul.f32 %v349_v14, %v324_v6  ;;  %s2326_s27 = sld [smem:[#allocation30_spill]]  ;;  %s2328_s11 = sld [smem:[#allocation37_spill]] }
  0xd1   : > { %v386_v17 = vrot.slane %v384_v13, 2  ;;  %v347_v19 = vstv %s330_s26  ;;  %v364_v22 = vmul.f32 %v363_v15, %v324_v6  ;;  %s829_s20 = scalar_lea.sflag [#allocation14], %s2141_s16  ;;  %s1365_s8 = scalar_lea.vmem %s859_s0, 16 }
  0xd2   : > { %v382_v18 = vadd.f32 %v380_v16, %v376_v11  ;;  %v355_v21 = vstv %s334_s25  ;;  %v348_v26 = vmul.f32 %v347_v19, %v320_v5  ;;  %v352_v29 = vrot.slane %v350_v20, 1  ;;  %p1366_p8 = scmp.ne.s32.totalorder %s859_s0, %s1365_s8  ;;  %s1565_s23 = smov [#allocation13]  }
  0xd3   : > { %v361_v23 = vstv %s336_s28  ;;  %v356_v27 = vmul.f32 %v355_v21, %v328_v7  ;;  %v366_v31 = vrot.slane %v364_v22, 1  ;;  %s1369_s26 = sshll.u32 %s1565_s23, 4  ;;  %s1370_s26 = int_to_ptr.vmem [resolvable:$false] %s1369_s26 }
  0xd4   : > { %v369_v24 = vstv %s340_s7  ;;  %v388_v25 = vadd.f32 %v386_v17, %v382_v18  ;;  %v362_v30 = vmul.f32 %v361_v23, %v320_v5  ;;  %v354_v33 = vadd.f32 %v352_v29, %v348_v26  ;;  %s1371_s25 = scalar_lea.vmem %s1370_s26, 32  ;;  %p1372_p10 = scmp.lt.s32.totalorder %s859_s0, %s1370_s26 }
  0xd5   : > { %v370_v32 = vmul.f32 %v369_v24, %v328_v7  ;;  %v358_v34 = vrot.slane %v356_v27, 2  ;;  %s1026_s15 = sshll.u32 %s434_s19, 2  ;;  %v473_v7 = vshrl.u32 %v472_v58, 7  ;;  %p1373_p9 = scmp.lt.s32.totalorder %s1371_s25, %s1365_s8 }
  0xd6   : > { %v389_v28 = vmax.f32 %v388_v25, 1e-06  ;;  %v368_v35 = vadd.f32 %v366_v31, %v362_v30  ;;  %s436_s28 = scvt.s32.f32 %s1026_s15  ;;  %s2329_s6 = smov %s2328_s11 }
  0xd7   : > { %v372_v36 = vrot.slane %v370_v32, 2  ;;  %v360_v37 = vadd.f32 %v358_v34, %v354_v33  ;;  %v1977_v23 = vsub.s32 0, %v473_v7  ;;  %s2150_s3 = scalar_lea.hbm %s2328_s11, %s1047_s9  ;;  %p2330_p1 = scmp.ne.s32.totalorder %s2326_s27, 0 }
  0xd8   : > { %1245 = vrcp.f32 %v389_v28  ;;  %vm390_vm1 = vcmp.gt.f32.partialorder %v389_v28, 1e-06  ;;  %v437_v53 = vstv %s436_s28  ;;  %p1374_p13 = por %p1373_p9, %p1372_p10 }
  0xd9   : > { %v374_v38 = vadd.f32 %v372_v36, %v368_v35  ;;  %v1954_v40 = vsel %vm390_vm1, 1.0, %v1563_v0  ;;  %p1367_p2 = pnand %p1366_p8, %p2330_p1 }
  0xdb   : > { %p1368_p7 = pneg %p1367_p2 }
  0xdd   : > { %p1375_p5 = pnand %p1374_p13, %p1368_p7 }
  0xe2   : > { %v1246_v39 = vpop.eup %1245 }
  0xe3   : > { %v395_v41 = vmul.f32 %v1246_v39, %v360_v37  ;;  %v397_v42 = vmul.f32 %v1246_v39, %v374_v38 }
  0xe5   : > { %v396_v43 = vmul.f32 %v1954_v40, %v395_v41  ;;  %v398_v44 = vmul.f32 %v1954_v40, %v397_v42 }
  0xe7   : > { %v399_v45 = vfloor.f32 %v396_v43  ;;  %v400_v46 = vfloor.f32 %v398_v44  ;;  %vm411_vm2 = vcmp.ge.f32.partialorder %v396_v43, 0.0  ;;  %vm412_vm3 = vcmp.le.f32.partialorder %v396_v43, 31.0 }
  0xe8   : > { %vm414_vm4 = vcmp.ge.f32.partialorder %v398_v44, 0.0  ;;  %vm415_vm5 = vcmp.le.f32.partialorder %v398_v44, 7.0  ;;  %vm1958_vm6 = vmand %vm411_vm2, %vm412_vm3 }
  0xe9   : > { %v401_v47 = vadd.f32 1.0, %v399_v45  ;;  %v402_v48 = vadd.f32 1.0, %v400_v46  ;;  %v403_v49 = vmax.f32 %v399_v45, 0.0  ;;  %v405_v50 = vmax.f32 %v400_v46, 0.0  ;;  %vm1962_vm7 = vmand %vm414_vm4, %vm415_vm5 }
  0xea   : > { %vm417_vm8 = vmand %vm1958_vm6, %vm1962_vm7 }
  0xeb   : > { %v404_v54 = vmin.f32 %v403_v49, 31.0  ;;  %v406_v55 = vmin.f32 %v405_v50, 7.0  ;;  %v407_v56 = vmax.f32 %v401_v47, 0.0  ;;  %v409_v57 = vmax.f32 %v402_v48, 0.0 }
  0xec   : > { %v1971_v5 = vsel %vm417_vm8, 1.0, %v1563_v0 }
  0xed   : > { %v408_v59 = vmin.f32 %v407_v56, 31.0  ;;  %v410_v60 = vmin.f32 %v409_v57, 7.0  ;;  %v424_v61 = vsub.f32 %v396_v43, %v404_v54  ;;  %v427_v62 = vsub.f32 %v398_v44, %v406_v55 }
  0xee   : > { %v438_v63 = vsub.f32 %v406_v55, %v437_v53  ;;  %v455_v55 = vld [vmem:[#allocation6 + $0x4] sm:$0xf] }
  0xef   : > { %v420_v1 = vsub.f32 %v408_v59, %v396_v43  ;;  %v421_v2 = vsub.f32 %v410_v60, %v398_v44  ;;  %v430_v3 = vmul.f32 %v427_v62, %v424_v61  ;;  %v446_v4 = vsub.f32 %v410_v60, %v437_v53 }
  0xf0   : > { %v439_v6 = vmul.f32 32.0, %v438_v63 }
  0xf1   : > { %v422_v8 = vmul.f32 %v421_v2, %v420_v1  ;;  %v425_v9 = vmul.f32 %v424_v61, %v421_v2  ;;  %v428_v10 = vmul.f32 %v427_v62, %v420_v1  ;;  %v431_v11 = vmul.f32 %v1971_v5, %v430_v3  ;;  %v456_v3 = vld [vmem:[#allocation6 + $0x8] sm:$0xf] }
  0xf2   : > { %v440_v12 = vadd.f32 %v439_v6, %v404_v54  ;;  %v443_v13 = vadd.f32 %v439_v6, %v408_v59  ;;  %v447_v14 = vmul.f32 32.0, %v446_v4  ;;  %v457_v4 = vld [vmem:[#allocation6 + $0xc] sm:$0xf] }
  0xf3   : > { %v423_v15 = vmul.f32 %v1971_v5, %v422_v8  ;;  %v426_v16 = vmul.f32 %v1971_v5, %v425_v9  ;;  %v429_v17 = vmul.f32 %v1971_v5, %v428_v10  ;;  %v682_v18 = vpack.c.bf16 %v431_v11, %v431_v11 }
  0xf4   : > { %v1079_v19 = vtrunc.f32 %v440_v12  ;;  %v1081_v20 = vtrunc.f32 %v443_v13  ;;  %v448_v21 = vadd.f32 %v447_v14, %v404_v54  ;;  %v451_v22 = vadd.f32 %v447_v14, %v408_v59  ;;  %v454_v54 = vld [vmem:[#allocation6] sm:$0xf] }
  0xf5   : > { %v494_v24 = vpack.c.bf16 %v423_v15, %v423_v15  ;;  %v546_v25 = vpack.c.bf16 %v426_v16, %v426_v16  ;;  %v614_v26 = vpack.c.bf16 %v429_v17, %v429_v17  ;;  %v684_v34 = vpack.i.b16 %v682_v18, %v682_v18 }
  0xf6   : > { %v1080_v27 = vcvt.f32.s32 %v1079_v19  ;;  %v1082_v28 = vcvt.f32.s32 %v1081_v20  ;;  %v1083_v29 = vtrunc.f32 %v448_v21  ;;  %v1085_v30 = vtrunc.f32 %v451_v22 }
  0xf7   : > { %v496_v31 = vpack.i.b16 %v494_v24, %v494_v24  ;;  %v548_v32 = vpack.i.b16 %v546_v25, %v546_v25  ;;  %v616_v33 = vpack.i.b16 %v614_v26, %v614_v26  ;;  %v689_v47 = vrot.slane %v684_v34, %v1977_v23  ;;  %v458_v25 = vld [vmem:[#allocation6 + $0x10] sm:$0xf]  ;;  %v459_v26 = vld [vmem:[#allocation6 + $0x14] sm:$0xf] }
  0xf8   : > { %v442_v35 = vpack.c.b16 %v1080_v27, %v1080_v27  ;;  %v445_v36 = vpack.c.b16 %v1082_v28, %v1082_v28  ;;  %v1084_v37 = vcvt.f32.s32 %v1083_v29  ;;  %v1086_v38 = vcvt.f32.s32 %v1085_v30 }
  0xf9   : > { %v501_v39 = vrot.slane %v496_v31, %v1977_v23  ;;  %v553_v41 = vrot.slane %v548_v32, %v1977_v23  ;;  %v621_v46 = vrot.slane %v616_v33, %v1977_v23  ;;  %v1997_v61 = vcombine.low %v689_v47, %v689_v47 }
  0xfa   : > { %v450_v42 = vpack.c.b16 %v1084_v37, %v1084_v37  ;;  %v453_v43 = vpack.c.b16 %v1086_v38, %v1086_v38  ;;  %v471_v44 = vpack.i.b16 %v442_v35, %v442_v35  ;;  %v523_v45 = vpack.i.b16 %v445_v36, %v445_v36 }
  0xfb   : > { %v1985_v52 = vcombine.low %v501_v39, %v501_v39  ;;  %v1987_v53 = vcombine.low %v553_v41, %v553_v41  ;;  %v1995_v60 = vcombine.low %v621_v46, %v621_v46  ;;  %v460_v39 = vld [vmem:[#allocation6 + $0x18] sm:$0xf] }
  0xfc   : > { %v475_v48 = vrot.slane %v471_v44, %v1977_v23  ;;  %v527_v49 = vrot.slane %v523_v45, %v1977_v23  ;;  %v591_v50 = vpack.i.b16 %v450_v42, %v450_v42  ;;  %v659_v51 = vpack.i.b16 %v453_v43, %v453_v43  ;;  %v461_v45 = vld [vmem:[#allocation6 + $0x1c] sm:$0xf] }
  0xfe   : > { %v1989_v56 = vcombine.low %v475_v48, %v475_v48  ;;  %v1991_v57 = vcombine.low %v527_v49, %v527_v49  ;;  %v595_v58 = vrot.slane %v591_v50, %v1977_v23  ;;  %v663_v59 = vrot.slane %v659_v51, %v1977_v23 }
 0x100   : > { %v1999_v62 = vcombine.low %v595_v58, %v595_v58  ;;  %v2001_v63 = vcombine.low %v663_v59, %v663_v59  ;;  %vm478_vm9 = vcmp.eq.s16.totalorder %v454_v54, %v1989_v56  ;;  %vm479_vm10 = vcmp.eq.s16.totalorder %v455_v55, %v1989_v56 }
 0x101   : > { %v506_v1 = vsel %vm478_vm9, %v1985_v52, 0  ;;  %v507_v2 = vsel %vm479_vm10, %v1985_v52, 0  ;;  %vm530_vm11 = vcmp.eq.s16.totalorder %v454_v54, %v1991_v57  ;;  %vm531_vm12 = vcmp.eq.s16.totalorder %v455_v55, %v1991_v57 }
 0x102   : > { %v558_v6 = vsel %vm530_vm11, %v1987_v53, 0  ;;  %v559_v7 = vsel %vm531_vm12, %v1987_v53, 0  ;;  %vm598_vm13 = vcmp.eq.s16.totalorder %v454_v54, %v1999_v62  ;;  %vm599_vm14 = vcmp.eq.s16.totalorder %v455_v55, %v1999_v62 }
 0x103   : > { %v574_v8 = vadd.bf16 %v558_v6, %v506_v1  ;;  %v575_v9 = vadd.bf16 %v559_v7, %v507_v2  ;;  %v626_v10 = vsel %vm598_vm13, %v1995_v60, 0  ;;  %v627_v11 = vsel %vm599_vm14, %v1995_v60, 0 }
 0x104   : > { %vm666_vm15 = vcmp.eq.s16.totalorder %v454_v54, %v2001_v63  ;;  %vm667_vm0 = vcmp.eq.s16.totalorder %v455_v55, %v2001_v63  ;;  %vm480_vm1 = vcmp.eq.s16.totalorder %v456_v3, %v1989_v56  ;;  %vm481_vm2 = vcmp.eq.s16.totalorder %v457_v4, %v1989_v56 }
 0x105   : > { %v642_v12 = vadd.bf16 %v626_v10, %v574_v8  ;;  %v643_v13 = vadd.bf16 %v627_v11, %v575_v9  ;;  %v694_v14 = vsel %vm666_vm15, %v1997_v61, 0  ;;  %v695_v15 = vsel %vm667_vm0, %v1997_v61, 0  ;;  %v463_v8 = vld [vmem:[#allocation6 + $0x24] sm:$0xf] }
 0x106   : > { %v508_v16 = vsel %vm480_vm1, %v1985_v52, 0  ;;  %v509_v17 = vsel %vm481_vm2, %v1985_v52, 0  ;;  %vm532_vm3 = vcmp.eq.s16.totalorder %v456_v3, %v1991_v57  ;;  %vm533_vm4 = vcmp.eq.s16.totalorder %v457_v4, %v1991_v57 }
 0x107   : > { %v710_v18 = vadd.bf16 %v694_v14, %v642_v12  ;;  %v711_v19 = vadd.bf16 %v695_v15, %v643_v13  ;;  %v560_v20 = vsel %vm532_vm3, %v1987_v53, 0  ;;  %v561_v21 = vsel %vm533_vm4, %v1987_v53, 0 }
 0x108   : > { %v576_v22 = vadd.bf16 %v560_v20, %v508_v16  ;;  %v577_v24 = vadd.bf16 %v561_v21, %v509_v17  ;;  %vm600_vm5 = vcmp.eq.s16.totalorder %v456_v3, %v1999_v62  ;;  %vm601_vm6 = vcmp.eq.s16.totalorder %v457_v4, %v1999_v62  ;;  %v464_v20 = vld [vmem:[#allocation6 + $0x28] sm:$0xf] }
 0x109   : > { %v1035_v27 = vcombine.low %v710_v18, %v711_v19  ;;  %v628_v28 = vsel %vm600_vm5, %v1995_v60, 0  ;;  %v629_v29 = vsel %vm601_vm6, %v1995_v60, 0  ;;  %vm668_vm7 = vcmp.eq.s16.totalorder %v456_v3, %v2001_v63 }
 0x10a   : > { %v644_v30 = vadd.bf16 %v628_v28, %v576_v22  ;;  %v645_v31 = vadd.bf16 %v629_v29, %v577_v24  ;;  %vm669_vm8 = vcmp.eq.s16.totalorder %v457_v4, %v2001_v63  ;;  %v696_v32 = vsel %vm668_vm7, %v1997_v61, 0  ;;  %v462_v4 = vld [vmem:[#allocation6 + $0x20] sm:$0xf]  ;;  %v465_v24 = vld [vmem:[#allocation6 + $0x2c] sm:$0xf] }
 0x10b   : > { %1060 = vmatpush3.bf16.msra.mxu0 %v1035_v27  ;;  %v697_v33 = vsel %vm669_vm8, %v1997_v61, 0  ;;  %vm482_vm9 = vcmp.eq.s16.totalorder %v458_v25, %v1989_v56  ;;  %vm483_vm10 = vcmp.eq.s16.totalorder %v459_v26, %v1989_v56  ;;  %vm534_vm11 = vcmp.eq.s16.totalorder %v458_v25, %v1991_v57 }
 0x10c   : > { %1061 = vmatprep.subr.bf16.mxu0 %v1563_v0  ;;  %v712_v34 = vadd.bf16 %v696_v32, %v644_v30  ;;  %v713_v35 = vadd.bf16 %v697_v33, %v645_v31  ;;  %v510_v36 = vsel %vm482_vm9, %v1985_v52, 0  ;;  %v511_v37 = vsel %vm483_vm10, %v1985_v52, 0 }
 0x10d   : > { %vm535_vm12 = vcmp.eq.s16.totalorder %v459_v26, %v1991_v57  ;;  %v562_v38 = vsel %vm534_vm11, %v1987_v53, 0  ;;  %vm602_vm13 = vcmp.eq.s16.totalorder %v458_v25, %v1999_v62  ;;  %vm603_vm14 = vcmp.eq.s16.totalorder %v459_v26, %v1999_v62 }
 0x10e   : > { %v1036_v41 = vcombine.low %v712_v34, %v713_v35  ;;  %v563_v42 = vsel %vm535_vm12, %v1987_v53, 0  ;;  %v578_v43 = vadd.bf16 %v562_v38, %v510_v36  ;;  %v630_v44 = vsel %vm602_vm13, %v1995_v60, 0  ;;  %v466_v38 = vld [vmem:[#allocation6 + $0x30] sm:$0xf] }
 0x10f   : > { %v579_v46 = vadd.bf16 %v563_v42, %v511_v37  ;;  %v631_v47 = vsel %vm603_vm14, %v1995_v60, 0  ;;  %vm670_vm15 = vcmp.eq.s16.totalorder %v458_v25, %v2001_v63  ;;  %vm671_vm0 = vcmp.eq.s16.totalorder %v459_v26, %v2001_v63 }
 0x110   : > { %1062 = vmatpush3.bf16.msra.mxu0 %v1036_v41  ;;  %v646_v48 = vadd.bf16 %v630_v44, %v578_v43  ;;  %v698_v49 = vsel %vm670_vm15, %v1997_v61, 0  ;;  %v699_v50 = vsel %vm671_vm0, %v1997_v61, 0  ;;  %vm484_vm1 = vcmp.eq.s16.totalorder %v460_v39, %v1989_v56  ;;  %v467_v43 = vld [vmem:[#allocation6 + $0x34] sm:$0xf] }
 0x111   : > { %1063 = vmatprep.subr.bf16.mxu0 %v1563_v0  ;;  %v647_v51 = vadd.bf16 %v631_v47, %v579_v46  ;;  %vm485_vm2 = vcmp.eq.s16.totalorder %v461_v45, %v1989_v56  ;;  %v512_v54 = vsel %vm484_vm1, %v1985_v52, 0  ;;  %vm536_vm3 = vcmp.eq.s16.totalorder %v460_v39, %v1991_v57 }
 0x112   : > { %v714_v55 = vadd.bf16 %v698_v49, %v646_v48  ;;  %v513_v58 = vsel %vm485_vm2, %v1985_v52, 0  ;;  %vm537_vm4 = vcmp.eq.s16.totalorder %v461_v45, %v1991_v57  ;;  %v564_v59 = vsel %vm536_vm3, %v1987_v53, 0 }
 0x113   : > { %v715_v1 = vadd.bf16 %v699_v50, %v647_v51  ;;  %v565_v2 = vsel %vm537_vm4, %v1987_v53, 0  ;;  %v580_v3 = vadd.bf16 %v564_v59, %v512_v54  ;;  %vm604_vm5 = vcmp.eq.s16.totalorder %v460_v39, %v1999_v62 }
 0x114   : > { %v581_v6 = vadd.bf16 %v565_v2, %v513_v58  ;;  %vm605_vm6 = vcmp.eq.s16.totalorder %v461_v45, %v1999_v62  ;;  %v632_v7 = vsel %vm604_vm5, %v1995_v60, 0  ;;  %vm672_vm7 = vcmp.eq.s16.totalorder %v460_v39, %v2001_v63 }
 0x115   : > { %v1037_v9 = vcombine.low %v714_v55, %v715_v1  ;;  %v633_v10 = vsel %vm605_vm6, %v1995_v60, 0  ;;  %v648_v11 = vadd.bf16 %v632_v7, %v580_v3  ;;  %vm673_vm8 = vcmp.eq.s16.totalorder %v461_v45, %v2001_v63  ;;  %v469_v7 = vld [vmem:[#allocation6 + $0x3c] sm:$0xf] }
 0x116   : > { %v649_v12 = vadd.bf16 %v633_v10, %v581_v6  ;;  %v700_v13 = vsel %vm672_vm7, %v1997_v61, 0  ;;  %v701_v14 = vsel %vm673_vm8, %v1997_v61, 0  ;;  %vm486_vm9 = vcmp.eq.s16.totalorder %v462_v4, %v1989_v56  ;;  %v468_v6 = vld [vmem:[#allocation6 + $0x38] sm:$0xf] }
 0x117   : > { %1064 = vmatpush3.bf16.msra.mxu0 %v1037_v9  ;;  %v716_v15 = vadd.bf16 %v700_v13, %v648_v11  ;;  %vm487_vm10 = vcmp.eq.s16.totalorder %v463_v8, %v1989_v56  ;;  %v514_v16 = vsel %vm486_vm9, %v1985_v52, 0  ;;  %vm538_vm11 = vcmp.eq.s16.totalorder %v462_v4, %v1991_v57 }
 0x118   : > { %1065 = vmatprep.subr.bf16.mxu0 %v1563_v0  ;;  %v717_v17 = vadd.bf16 %v701_v14, %v649_v12  ;;  %v515_v18 = vsel %vm487_vm10, %v1985_v52, 0  ;;  %vm539_vm12 = vcmp.eq.s16.totalorder %v463_v8, %v1991_v57  ;;  %v566_v19 = vsel %vm538_vm11, %v1987_v53, 0 }
 0x119   : > { %v567_v21 = vsel %vm539_vm12, %v1987_v53, 0  ;;  %v582_v22 = vadd.bf16 %v566_v19, %v514_v16  ;;  %vm606_vm13 = vcmp.eq.s16.totalorder %v462_v4, %v1999_v62  ;;  %vm607_vm14 = vcmp.eq.s16.totalorder %v463_v8, %v1999_v62 }
 0x11a   : > { %v1038_v25 = vcombine.low %v716_v15, %v717_v17  ;;  %v583_v26 = vadd.bf16 %v567_v21, %v515_v18  ;;  %v634_v27 = vsel %vm606_vm13, %v1995_v60, 0  ;;  %v635_v28 = vsel %vm607_vm14, %v1995_v60, 0 }
 0x11b   : > { %v650_v29 = vadd.bf16 %v634_v27, %v582_v22  ;;  %vm674_vm15 = vcmp.eq.s16.totalorder %v462_v4, %v2001_v63  ;;  %vm675_vm0 = vcmp.eq.s16.totalorder %v463_v8, %v2001_v63  ;;  %vm488_vm1 = vcmp.eq.s16.totalorder %v464_v20, %v1989_v56 }
 0x11c   : > { %1066 = vmatpush3.bf16.msra.mxu0 %v1038_v25  ;;  %v651_v30 = vadd.bf16 %v635_v28, %v583_v26  ;;  %v702_v31 = vsel %vm674_vm15, %v1997_v61, 0  ;;  %v703_v32 = vsel %vm675_vm0, %v1997_v61, 0  ;;  %vm489_vm2 = vcmp.eq.s16.totalorder %v465_v24, %v1989_v56 }
 0x11d   : > { %1067 = vmatprep.subr.bf16.mxu0 %v1563_v0  ;;  %v718_v33 = vadd.bf16 %v702_v31, %v650_v29  ;;  %v516_v34 = vsel %vm488_vm1, %v1985_v52, 0  ;;  %v517_v35 = vsel %vm489_vm2, %v1985_v52, 0  ;;  %vm540_vm3 = vcmp.eq.s16.totalorder %v464_v20, %v1991_v57 }
 0x11e   : > { %v719_v36 = vadd.bf16 %v703_v32, %v651_v30  ;;  %vm541_vm4 = vcmp.eq.s16.totalorder %v465_v24, %v1991_v57  ;;  %v568_v37 = vsel %vm540_vm3, %v1987_v53, 0  ;;  %vm608_vm5 = vcmp.eq.s16.totalorder %v464_v20, %v1999_v62 }
 0x11f   : > { %v569_v39 = vsel %vm541_vm4, %v1987_v53, 0  ;;  %v584_v41 = vadd.bf16 %v568_v37, %v516_v34  ;;  %vm609_vm6 = vcmp.eq.s16.totalorder %v465_v24, %v1999_v62  ;;  %v636_v42 = vsel %vm608_vm5, %v1995_v60, 0 }
 0x120   : > { %v1039_v44 = vcombine.low %v718_v33, %v719_v36  ;;  %v585_v45 = vadd.bf16 %v569_v39, %v517_v35  ;;  %v637_v46 = vsel %vm609_vm6, %v1995_v60, 0  ;;  %vm676_vm7 = vcmp.eq.s16.totalorder %v464_v20, %v2001_v63 }
 0x121   : > { %v652_v47 = vadd.bf16 %v636_v42, %v584_v41  ;;  %vm677_vm8 = vcmp.eq.s16.totalorder %v465_v24, %v2001_v63  ;;  %v704_v48 = vsel %vm676_vm7, %v1997_v61, 0  ;;  %vm490_vm9 = vcmp.eq.s16.totalorder %v466_v38, %v1989_v56 }
 0x122   : > { %1068 = vmatpush3.bf16.msra.mxu0 %v1039_v44  ;;  %v653_v49 = vadd.bf16 %v637_v46, %v585_v45  ;;  %v705_v50 = vsel %vm677_vm8, %v1997_v61, 0  ;;  %vm491_vm10 = vcmp.eq.s16.totalorder %v467_v43, %v1989_v56  ;;  %v518_v51 = vsel %vm490_vm9, %v1985_v52, 0 }
 0x123   : > { %1069 = vmatprep.subr.bf16.mxu0 %v1563_v0  ;;  %v720_v54 = vadd.bf16 %v704_v48, %v652_v47  ;;  %v519_v55 = vsel %vm491_vm10, %v1985_v52, 0  ;;  %vm542_vm11 = vcmp.eq.s16.totalorder %v466_v38, %v1991_v57  ;;  %vm543_vm12 = vcmp.eq.s16.totalorder %v467_v43, %v1991_v57 }
 0x124   : > { %v721_v58 = vadd.bf16 %v705_v50, %v653_v49  ;;  %v570_v59 = vsel %vm542_vm11, %v1987_v53, 0  ;;  %v571_v1 = vsel %vm543_vm12, %v1987_v53, 0  ;;  %vm610_vm13 = vcmp.eq.s16.totalorder %v466_v38, %v1999_v62 }
 0x125   : > { %v586_v2 = vadd.bf16 %v570_v59, %v518_v51  ;;  %v587_v3 = vadd.bf16 %v571_v1, %v519_v55  ;;  %vm611_vm14 = vcmp.eq.s16.totalorder %v467_v43, %v1999_v62  ;;  %v638_v4 = vsel %vm610_vm13, %v1995_v60, 0 }
 0x126   : > { %v1040_v8 = vcombine.low %v720_v54, %v721_v58  ;;  %v639_v9 = vsel %vm611_vm14, %v1995_v60, 0  ;;  %vm678_vm15 = vcmp.eq.s16.totalorder %v466_v38, %v2001_v63  ;;  %vm679_vm0 = vcmp.eq.s16.totalorder %v467_v43, %v2001_v63 }
 0x127   : > { %v654_v10 = vadd.bf16 %v638_v4, %v586_v2  ;;  %v655_v11 = vadd.bf16 %v639_v9, %v587_v3  ;;  %v706_v12 = vsel %vm678_vm15, %v1997_v61, 0  ;;  %v707_v13 = vsel %vm679_vm0, %v1997_v61, 0 }
 0x128   : > { %1070 = vmatpush3.bf16.msra.mxu0 %v1040_v8  ;;  %vm492_vm1 = vcmp.eq.s16.totalorder %v468_v6, %v1989_v56  ;;  %vm493_vm2 = vcmp.eq.s16.totalorder %v469_v7, %v1989_v56  ;;  %vm544_vm3 = vcmp.eq.s16.totalorder %v468_v6, %v1991_v57  ;;  %vm545_vm4 = vcmp.eq.s16.totalorder %v469_v7, %v1991_v57 }
 0x129   : > { %1071 = vmatprep.subr.bf16.mxu0 %v1563_v0  ;;  %v722_v14 = vadd.bf16 %v706_v12, %v654_v10  ;;  %v723_v15 = vadd.bf16 %v707_v13, %v655_v11  ;;  %v520_v16 = vsel %vm492_vm1, %v1985_v52, 0  ;;  %v521_v17 = vsel %vm493_vm2, %v1985_v52, 0 }
 0x12a   : > { %v572_v18 = vsel %vm544_vm3, %v1987_v53, 0  ;;  %v573_v19 = vsel %vm545_vm4, %v1987_v53, 0  ;;  %vm612_vm5 = vcmp.eq.s16.totalorder %v468_v6, %v1999_v62  ;;  %vm613_vm6 = vcmp.eq.s16.totalorder %v469_v7, %v1999_v62 }
 0x12b   : > { %v1041_v56 = vcombine.low %v722_v14, %v723_v15  ;;  %v588_v20 = vadd.bf16 %v572_v18, %v520_v16  ;;  %v589_v57 = vadd.bf16 %v573_v19, %v521_v17  ;;  %v640_v21 = vsel %vm612_vm5, %v1995_v60, 0 }
 0x12c   : > { %v641_v22 = vsel %vm613_vm6, %v1995_v60, 0  ;;  %vm680_vm7 = vcmp.eq.s16.totalorder %v468_v6, %v2001_v63  ;;  %vm681_vm8 = vcmp.eq.s16.totalorder %v469_v7, %v2001_v63  ;;  %v726_v60 = vld [vmem:[%s2327_s1] sm:$0x3]  ;;  %v821_v63 = vmul.f32 %v1971_v5, %v1954_v40 }
 0x12d   : > { %1072 = vmatpush3.bf16.msra.mxu0 %v1041_v56  ;;  %v656_v52 = vadd.bf16 %v640_v21, %v588_v20  ;;  %v657_v53 = vadd.bf16 %v641_v22, %v589_v57  ;;  %v708_v24 = vsel %vm680_vm7, %v1997_v61, 0  ;;  %v709_v62 = vsel %vm681_vm8, %v1997_v61, 0 }
 0x12e   : > { %1073 = vmatprep.subr.bf16.mxu0 %v1563_v0  ;;  %822 = vst [vmem:[%s311_s22] sm:$0x1] %v821_v63 }
 0x12f   : > { %v724_v25 = vadd.bf16 %v708_v24, %v656_v52  ;;  %v725_v26 = vadd.bf16 %v709_v62, %v657_v53 }
 0x131   : > { %v1042_v27 = vcombine.low %v724_v25, %v725_v26 }
 0x133   : > { %1074 = vmatpush3.bf16.msra.mxu0 %v1042_v27 }
 0x136   : > { %1076 = vmatmul.mubr.bf16.vlgmr.msra.gmra.mrb[0].mxu0 %v726_v60 }
 0x137   : > { %1378 = shalt.err (!%p1375_p5)
}
 0x138   : > { %s1379_s7 = scalar_lea.hbm %s2150_s3, 16  ;;  %s1383_s19 = scalar_lea.hbm %s2329_s6, 64 }
 0x139   : > { %p1380_p12 = scmp.ne.s32.totalorder %s2150_s3, %s1379_s7  ;;  %p1384_p11 = scmp.lt.u32.totalorder %s2150_s3, %s2329_s6 }
 0x13a   : > { %p1385_p4 = scmp.lt.u32.totalorder %s1383_s19, %s1379_s7  ;;  %p1387_p8 = scmp.lt.u32.totalorder %s1379_s7, %s2150_s3 }
 0x13b   : > { %p1381_p0 = pnand %p1380_p12, %p2330_p1 }
 0x13c   : > { %p1386_p6 = por %p1385_p4, %p1384_p11 }
 0x13d   : > { %p1382_p3 = pneg %p1381_p0 }
 0x13e   : > { %p1388_p2 = por %p1387_p8, %p1386_p6 }
 0x140   : > { %p1389_p7 = pnand %p1388_p2, %p1382_p3 }
 0x142   : > { %1392 = shalt.err (!%p1389_p7)
}
 0x143   : > { %1098 = dma.vmem_to_hbm [thread:$0]  (%p2330_p1), %s859_s0, 16, %s2150_s3, %s829_s20   ;;  %v818_v0 = vrot.slane %v1954_v40, %v1977_v23 }
 0x144   : > { %s1022_s1 = sshll.u32 %s2141_s16, 2  ;;  %s1045_s22 = sshll.u32 %s1950_s14, 6 }
 0x145   : > { %s305_s9 = scalar_lea.vmem [#allocation12], %s1022_s1  ;;  %s2331_s8 = sld [smem:[#allocation36_spill]] }
 0x146   : > { %s843_s4 = sshll.u32 %s305_s9, 4  ;;  %s824_s0 = scalar_lea.sflag [#allocation8], %s2141_s16  ;;  %s2179_s4 = int_to_ptr.vmem [resolvable:$true] %s843_s4 }
 0x147   : > { %s1393_s14 = scalar_lea.vmem %s2179_s4, 64  ;;  %s1566_s3 = smov [#allocation12]  }
 0x148   : > { %p1394_p10 = scmp.ne.s32.totalorder %s2179_s4, %s1393_s14  ;;  %s1397_s20 = sshll.u32 %s1566_s3, 4  ;;  %s1398_s20 = int_to_ptr.vmem [resolvable:$false] %s1397_s20 }
 0x149   : > { %s1399_s25 = scalar_lea.vmem %s1398_s20, 128  ;;  %p1400_p5 = scmp.lt.s32.totalorder %s2179_s4, %s1398_s20 }
 0x14a   : > { %p1395_p9 = pnand %p1394_p10, %p2330_p1  ;;  %p1401_p12 = scmp.lt.s32.totalorder %s1399_s25, %s1393_s14 }
 0x14b   : > { %s2332_s23 = smov %s2331_s8  ;;  %s2177_s26 = scalar_lea.hbm %s2331_s8, %s1045_s22 }
 0x14c   : > { %p1396_p13 = pneg %p1395_p9  ;;  %p1402_p0 = por %p1401_p12, %p1400_p5 }
 0x14e   : > { %p1403_p3 = pnand %p1402_p0, %p1396_p13 }
 0x209   : > { %v809_v5 = vpop.f32.mrb[0].mxu0 }
 0x20a   : > { %v819_v61 = vmul.f32 %v818_v0, %v809_v5  ;;  %v1077_v28 = vpop.f32.mrb[1].mxu0 }
 0x20b   : > { %v812_v29 = vpop.f32.mrb[2].mxu0 }
 0x20c   : > { %820 = vst [vmem:[%s305_s9] sm:$0xf] %v819_v61  ;;  %v1078_v30 = vpop.f32.mrb[3].mxu0 }
 0x20d   : > { %1406 = shalt.err (!%p1403_p3)
}
 0x20e   : > { %s1407_s16 = scalar_lea.hbm %s2177_s26, 64  ;;  %s1411_s24 = scalar_lea.hbm %s2332_s23, 256 }
 0x20f   : > { %p1408_p11 = scmp.ne.s32.totalorder %s2177_s26, %s1407_s16  ;;  %p1412_p8 = scmp.lt.u32.totalorder %s2177_s26, %s2332_s23 }
 0x210   : > { %p1413_p2 = scmp.lt.u32.totalorder %s1411_s24, %s1407_s16  ;;  %p1415_p10 = scmp.lt.u32.totalorder %s1407_s16, %s2177_s26 }
 0x211   : > { %p1409_p4 = pnand %p1408_p11, %p2330_p1 }
 0x212   : > { %p1414_p7 = por %p1413_p2, %p1412_p8 }
 0x213   : > { %p1410_p6 = pneg %p1409_p4 }
 0x214   : > { %p1416_p9 = por %p1415_p10, %p1414_p7 }
 0x216   : > { %p1417_p13 = pnand %p1416_p9, %p1410_p6 }
 0x218   : > { %1420 = shalt.err (!%p1417_p13)
}
 0x219   : > { %1097 = dma.vmem_to_hbm [thread:$0]  (%p2330_p1), %s2179_s4, 64, %s2177_s26, %s824_s0  }
 0x21a PF: > { %s2333_s28 = sld [smem:[#allocation23_spill]]  ;;  %s2334_s1 = sld [smem:[#allocation31_spill]] }
 0x21b   : > { %p1124_p5 = scmp.ge.s32.totalorder %s1553_s18, 2 }
 0x220   : > { %s870_s22 = sand.u32 1, %s2333_s28   ;;  %p2335_p12 = scmp.ne.s32.totalorder %s2334_s1, 0 }
 0x221   : > { %s871_s9 = scalar_lea.sflag [#allocation8], %s870_s22 }
 0x222   : > { %p1115_p0 = pnand %p1124_p5, %p2335_p12 }
 0x224   : > { %1492 = dma.done.wait (!%p1115_p0), %s871_s9, 64  }
 0x225   : > { %1494 = vsyncadd (!%p1115_p0), %s871_s9, 4294967232  ;;  %s880_s13 = scalar_lea.sflag [#allocation14], %s870_s22 }
 0x226   : > { %1496 = dma.done.wait (!%p1115_p0), %s880_s13, 16  }
 0x227   : > { %1498 = vsyncadd (!%p1115_p0), %s880_s13, 4294967280  ;;  %s36_s18 = sadd.s32 1, %s1553_s18   ;;  %s2337_s4 = sld [smem:[#allocation24_spill]] }
 0x228   : > { %p2208_p3 = scmp.ge.s32.totalorder %s36_s18, 6   ;;  %s2338_s8 = sld [smem:[#allocation33_spill]] }
 0x229   : > { %s2339_s26 = sld [smem:[#allocation25_spill]]  ;;  %s2340_s13 = sld [smem:[#allocation29_spill]] }
 0x22a   : > { %s2341_s14 = sld [smem:[#allocation27_spill]]  ;;  %s2342_s16 = sld [smem:[#allocation28_spill]] }
 0x22b   : > { %s2343_s0 = sld [smem:[#allocation32_spill]]  ;;  %s2344_s1 = smov %s1505_s30 }
 0x22c   : > { %s2346_s9 = smov %s1517_s10  ;;  %s2347_s10 = smov %s1521_s2 }
 0x22d   : > { %s2345_s30 = smov %s2337_s4  ;;  %s2348_s2 = smov %s1890_s29 }
 0x22e   : > { %s2349_s11 = smov %s1529_s12  ;;  %s2351_s15 = smov %s1549_s17 }
 0x22f   : > { %s2350_s12 = smov %s2339_s26  ;;  %35 = sbr.rel (!%p2208_p3) target bundleno = 40 (0x28), region = 110 }
 0x231   : > { %s2352_s17 = smov %s2343_s0 }
 0x236   :  { %884 = vsyncpa [#allocation7], 1 }
 0x237   :  { %886 = vsyncpa [#allocation7 + $0x1], 1 }
 0x238   :  { %887 = vsyncpa [#allocation10], 1 }
 0x239   :  { %889 = vsyncpa [#allocation10 + $0x1], 1 }
 0x23a   :  { %890 = vsyncpa [#allocation8], 1 }
 0x23b   :  { %892 = vsyncpa [#allocation8 + $0x1], 1 }
 0x23c   :  { %893 = vsyncpa [#allocation14], 1 }
 0x23d   :  { %895 = vsyncpa [#allocation14 + $0x1], 1 }

// kernel: tpu_custom_call.1
= control target key start
LH: loop header
LB: loop body
LE: loop exit
PB: predicated region body
PF: predicated region fallthrough
CT: control target
= control target key end

     0   :  { %s2147_s0 = inlined_call_operand.hbm [shape: f32[18], index: 0, kind: input, shape index: {}]   ;;  %s2148_s3 = inlined_call_operand.hbm [shape: s32[128,128], index: 3, kind: input, shape index: {}]   ;;  %s2149_s4 = inlined_call_operand.hbm [shape: f32[3,256], index: 4, kind: input, shape index: {}]   ;;  %s2150_s5 = inlined_call_operand.hbm [shape: bf16[2,4,256], index: 5, kind: input, shape index: {}]   ;;  %s2151_s6 = inlined_call_operand.hbm [shape: f32[2,4,256], index: 6, kind: output, shape index: {0}]   ;;  %s2152_s7 = inlined_call_operand.hbm [shape: f32[2,1,256], index: 7, kind: output, shape index: {1}]   ;;  %s2153_s1 = inlined_call_operand.hbm [shape: f32[6], index: 1, kind: input, shape index: {}]   ;;  %s2154_s2 = inlined_call_operand.hbm [shape: s32[4], index: 2, kind: input, shape index: {}]  }
   0x1   :  { %2174 = sst [smem:[#allocation34_spill]] %s2148_s3  ;;  %s1139_s26 = scalar_lea.hbm %s2147_s0, 16 }
   0x2   :  { %2175 = sst [smem:[#allocation35_spill]] %s2149_s4  ;;  %p1140_p0 = scmp.ne.s32.totalorder %s2147_s0, %s1139_s26 }
   0x3   :  { %2176 = sst [smem:[#allocation36_spill]] %s2151_s6  ;;  %p1143_p1 = scmp.lt.u32.totalorder %s1139_s26, %s2147_s0 }
   0x4   :  { %2177 = sst [smem:[#allocation37_spill]] %s2152_s7 }
   0x5   :  { %p1145_p2 = pnand %p1143_p1, %p1140_p0 }
   0x7   :  { %1148 = shalt.err (!%p1145_p2)  }
   0x8   :  { %s1447_s8 = smov [#allocation3]   ;;  %s1149_s13 = scalar_lea.hbm %s2153_s1, 16 }
   0x9   :  { %14 = dma.hbm_to_smem %s2147_s0, 16, %s1447_s8, [#allocation2] }
   0xa   :  { %p1150_p3 = scmp.ne.s32.totalorder %s2153_s1, %s1149_s13  ;;  %p1153_p4 = scmp.lt.u32.totalorder %s1149_s13, %s2153_s1 }
   0xc   :  { %p1155_p5 = pnand %p1153_p4, %p1150_p3 }
   0xe   :  { %1158 = shalt.err (!%p1155_p5)  }
   0xf   :  { %s1448_s18 = smov [#allocation4]   ;;  %s1159_s22 = scalar_lea.hbm %s2154_s2, 16 }
  0x10   :  { %16 = dma.hbm_to_smem %s2153_s1, 16, %s1448_s18, [#allocation2] }
  0x11   :  { %p1160_p6 = scmp.ne.s32.totalorder %s2154_s2, %s1159_s22  ;;  %p1163_p7 = scmp.lt.u32.totalorder %s1159_s22, %s2154_s2 }
  0x13   :  { %p1165_p8 = pnand %p1163_p7, %p1160_p6 }
  0x15   :  { %1168 = shalt.err (!%p1165_p8)  }
  0x16   :  { %s1449_s27 = smov [#allocation5]  }
  0x17   :  { %18 = dma.hbm_to_smem %s2154_s2, 16, %s1449_s27, [#allocation2] }
  0x18   :  { %1369 = dma.done.wait [#allocation2], 48 }
  0x19   :  { %1370 = vsyncadd [#allocation2], 4294967248 }
  0x1a   :  { %20 = sfence }
  0x1b   :  { %21 = vsyncpa [#allocation7], 0 }
  0x1c   :  { %22 = vsyncpa [#allocation10], 0 }
  0x1d   :  { %24 = vsyncpa [#allocation10 + $0x1], 0 }
  0x1e   :  { %25 = vsyncpa [#allocation8], 0 }
  0x1f   :  { %27 = vsyncpa [#allocation8 + $0x1], 0 }
  0x20   :  { %28 = vsyncpa [#allocation14], 0 }
  0x21   :  { %30 = vsyncpa [#allocation14 + $0x1], 0  ;;  %s1535_s1 = smov 0   ;;  %s1537_s30 = smov 0  }
  0x22   :  { %s1539_s8 = smov 0   ;;  %s1541_s9 = smov 0  }
  0x23   :  { %s1543_s10 = smov 0   ;;  %s1545_s2 = smov 0  }
  0x24   :  { %s1547_s11 = smov 0   ;;  %s1549_s12 = smov 0  }
  0x25   :  { %s1551_s13 = smov 0   ;;  %s1553_s14 = smov 0  }
  0x26   :  { %s1555_s15 = smov 0   ;;  %s1557_s16 = smov 0  }
  0x27   :  { %s1559_s17 = smov 0   ;;  %s1561_s18 = smov 0  }
  0x28 LB: > { %2178 = sst [smem:[#allocation23_spill]] %s1393_s1  ;;  %s45_s19 = sadd.s32 1, %s1437_s16  ;;  %s1445_s18 = sphi %s1561_s18, %s36_s18   ;;  %s1441_s17 = sphi %s1559_s17, %s2244_s17   ;;  %s1437_s16 = sphi %s1557_s16, %s2234_s16   ;;  %s1433_s15 = sphi %s1555_s15, %s2243_s15   ;;  %s1429_s14 = sphi %s1553_s14, %s2233_s14   ;;  %s1425_s13 = sphi %s1551_s13, %s2232_s13   ;;  %s1421_s12 = sphi %s1549_s12, %s2242_s12   ;;  %s1417_s11 = sphi %s1547_s11, %s2241_s11   ;;  %s1413_s2 = sphi %s1545_s2, %s2240_s2   ;;  %s1409_s10 = sphi %s1543_s10, %s2239_s10   ;;  %s1405_s9 = sphi %s1541_s9, %s2238_s9   ;;  %s1401_s8 = sphi %s1539_s8, %s2230_s8   ;;  %s1397_s30 = sphi %s1537_s30, %s2237_s30   ;;  %s1393_s1 = sphi %s1535_s1, %s2236_s1  }
  0x29   : > { %2179 = sst [smem:[#allocation24_spill]] %s1401_s8  ;;  %s76_s20 = sadd.s32 1, %s1425_s13 }
  0x2a   : > { %2180 = sst [smem:[#allocation25_spill]] %s1425_s13  ;;  %p1607_p9 = scmp.ge.s32.totalorder %s45_s19, 2 }
  0x2b   : > { %2181 = sst [smem:[#allocation26_spill]] %s1429_s14  ;;  %p83_p10 = scmp.ne.s32.totalorder %s1425_s13, %s1421_s12 }
  0x2c   : > { %2182 = sst [smem:[#allocation27_spill]] %s1437_s16  ;;  %p2158_p11 = scmp.eq.s32.totalorder %s1445_s18, 0 }
  0x2d   : > { %s2183_s0 = scalar_select %p1607_p9, 1, 0 }
  0x2e   : > { %s2246_s19 = smov (%p1607_p9, %s45_s19), 0  ;;  %p85_p13 = por %p2158_p11, %p83_p10 }
  0x2f   : > { %2184 = sst [smem:[#allocation28_spill]] %s2246_s19  ;;  %s1624_s21 = ssub.s32 %s1437_s16, %s2246_s19 }
  0x30   : > { %p2157_p0 = scmp.lt.s32.totalorder %s1445_s18, 4  ;;  %p74_p1 = scmp.eq.s32.totalorder %s1624_s21, 0 }
  0x31   : > { %s216_s22 = sand.u32 1, %s1445_s18   ;;  %s218_s23 = sand.u32 1, %s1425_s13  }
  0x32   : > { %s1631_s24 = scalar_select %p74_p1, %s1425_s13, %s76_s20  }
  0x33   : > { %s920_s25 = sshll.u32 %s218_s23, 2  ;;  %s921_s26 = sshll.u32 %s1437_s16, 6 }
  0x34   : > { %2185 = sst [smem:[#allocation29_spill]] %s1631_s24  ;;  %s2186_s4 = sld [smem:[#allocation35_spill]] }
  0x35   : > { %s220_s6 = scalar_lea.vmem [#allocation9], %s920_s25  ;;  %p1641_p2 = pnand %p2157_p0, %p85_p13 }
  0x36   : > { %s227_s7 = sshll.u32 %s220_s6, 4  ;;  %s1647_s20 = scalar_lea.sflag [#allocation10], %s216_s22  ;;  %s1645_s7 = int_to_ptr.vmem [resolvable:$true] %s227_s7 }
  0x37   : > { %p1171_p4 = pneg %p1641_p2 }
  0x3a   : > { %s1637_s29 = scalar_lea.hbm %s2186_s4, %s921_s26  ;;  %s1174_s26 = scalar_lea.hbm %s2186_s4, 128 }
  0x3b   : > { %s1169_s23 = scalar_lea.hbm %s1637_s29, 64  ;;  %p1175_p7 = scmp.lt.u32.totalorder %s1637_s29, %s2186_s4 }
  0x3c   : > { %p1170_p3 = scmp.ne.s32.totalorder %s1637_s29, %s1169_s23  ;;  %p1176_p8 = scmp.lt.u32.totalorder %s1174_s26, %s1169_s23 }
  0x3d   : > { %p1178_p13 = scmp.lt.u32.totalorder %s1169_s23, %s1637_s29 }
  0x3e   : > { %p1172_p5 = pnand %p1171_p4, %p1170_p3  ;;  %p1177_p10 = por %p1176_p8, %p1175_p7 }
  0x40   : > { %p1173_p6 = pneg %p1172_p5  ;;  %p1179_p1 = por %p1178_p13, %p1177_p10 }
  0x42   : > { %p1180_p0 = pnand %p1179_p1, %p1173_p6 }
  0x44   : > { %1183 = shalt.err (!%p1180_p0)
}
  0x45   : > { %s1184_s22 = scalar_lea.vmem %s1645_s7, 64  ;;  %s1450_s6 = smov [#allocation9]  }
  0x46   : > { %p1185_p3 = scmp.ne.s32.totalorder %s1645_s7, %s1184_s22  ;;  %s1189_s25 = sshll.u32 %s1450_s6, 4  ;;  %s1190_s25 = int_to_ptr.vmem [resolvable:$false] %s1189_s25 }
  0x47   : > { %s1191_s27 = scalar_lea.vmem %s1190_s25, 128  ;;  %p1192_p12 = scmp.lt.s32.totalorder %s1645_s7, %s1190_s25 }
  0x48   : > { %p1187_p5 = pnand %p1185_p3, %p1171_p4  ;;  %p1193_p7 = scmp.lt.s32.totalorder %s1191_s27, %s1184_s22 }
  0x4a   : > { %p1188_p11 = pneg %p1187_p5  ;;  %p1194_p8 = por %p1193_p7, %p1192_p12 }
  0x4c   : > { %p1195_p10 = pnand %p1194_p8, %p1188_p11 }
  0x4e   : > { %1198 = shalt.err (!%p1195_p10)
}
  0x4f   : > { %1000 = dma.hbm_to_vmem [thread:$0]  (!%p1641_p2), %s1637_s29, 64, %s1645_s7, %s1647_s20  }
  0x50   : > { %s1676_s23 = sadd.s32 4294967295, %s1445_s18   ;;  %s914_s14 = sadd.s32 4294967294, %s1445_s18  }
  0x51   : > { %p2161_p11 = scmp.eq.s32.totalorder %s1676_s23, 0  ;;  %p148_p12 = scmp.ne.s32.totalorder %s1401_s8, %s1397_s30 }
  0x52   : > { %p149_p0 = scmp.eq.s32.totalorder %s1676_s23, 3  ;;  %p154_p4 = scmp.ne.s32.totalorder %s1397_s30, %s1393_s1 }
  0x53   : > { %p2188_p6 = scmp.ne.s32.totalorder %s1421_s12, %s1417_s11  ;;  %p155_p1 = scmp.eq.s32.totalorder %s914_s14, 3 }
  0x54   : > { %p1694_p3 = por %p149_p0, %p148_p12  ;;  %p917_p2 = scmp.ge.s32.totalorder %s1445_s18, 1 }
  0x55   : > { %p1690_p13 = por %p2161_p11, %p2188_p6  ;;  %p1699_p5 = por %p155_p1, %p154_p4 }
  0x56   : > { %s2190_s7 = scalar_select %p1694_p3, 1, 0 }
  0x57   : > { %s2189_s26 = scalar_select %p1690_p13, 1, 0 }
  0x58   : > { %2191 = sst [smem:[#allocation30_spill]] %s2190_s7  ;;  %p190_p7 = scmp.lt.s32.totalorder %s1445_s18, 5 }
  0x59   : > { %s2192_s29 = scalar_select %p1699_p5, 1, 0 }
  0x5a   : > { %p1704_p8 = pnand %p917_p2, %p190_p7  ;;  %s1451_s11 = smov [#allocation6]  }
  0x5b   : > { %2193 = sst [smem:[#allocation31_spill]] %s2192_s29  ;;  %s202_s22 = sshll.u32 %s1451_s11, 4  ;;  %s203_s22 = int_to_ptr.vmem [resolvable:$true] %s202_s22 }
  0x5c   : > { %s2194_s28 = scalar_select %p1704_p8, 1, 0 }
  0x5d   : > { %p993_p10 = pneg %p1704_p8  ;;  %s2196_s3 = sld [smem:[#allocation34_spill]] }
  0x5f   : > { %p1712_p12 = pnand %p993_p10, %p2161_p11 }
  0x61   : > { %p1201_p4 = pneg %p1712_p12 }
  0x63   : > { %s1199_s14 = scalar_lea.hbm %s2196_s3, 2048 }
  0x64   : > { %p1200_p0 = scmp.ne.s32.totalorder %s2196_s3, %s1199_s14  ;;  %p1206_p2 = scmp.lt.u32.totalorder %s1199_s14, %s2196_s3 }
  0x66   : > { %p1202_p6 = pnand %p1201_p4, %p1200_p0 }
  0x68   : > { %p1203_p1 = pneg %p1202_p6 }
  0x6a   : > { %p1208_p7 = pnand %p1206_p2, %p1203_p1 }
  0x6c   : > { %1211 = shalt.err (!%p1208_p7)
}
  0x6d   : > { %s1212_s29 = scalar_lea.vmem %s203_s22, 2048  ;;  %p1220_p3 = scmp.lt.s32.totalorder %s203_s22, %s203_s22 }
  0x6e   : > { %p1213_p10 = scmp.ne.s32.totalorder %s203_s22, %s1212_s29  ;;  %p1221_p13 = scmp.lt.s32.totalorder %s1212_s29, %s1212_s29 }
  0x70   : > { %p1215_p11 = pnand %p1213_p10, %p1201_p4  ;;  %p1222_p8 = por %p1221_p13, %p1220_p3 }
  0x72   : > { %p1216_p5 = pneg %p1215_p11 }
  0x74   : > { %p1223_p9 = pnand %p1222_p8, %p1216_p5 }
  0x76   : > { %1226 = shalt.err (!%p1223_p9)
}
  0x77   : > { %s1452_s4 = smov 128   ;;  %s1453_s13 = smov 8  }
  0x78   : > { %996 = dma.hbm_to_vmem [thread:$0]  (!%p1712_p12), %s2196_s3, 2048, %s203_s22, [#allocation7], %s1452_s4, %s1452_s4, %s1453_s13  }
  0x79   : > { %s48_s25 = sadd.s32 1, %s1441_s17  ;;  %s2166_s27 = sshll.u32 %s1441_s17, 1 }
  0x7a   : > { %p2197_p9 = scmp.ne.s32.totalorder %s2183_s0, 0  ;;  %s100_s14 = sadd.s32 %s1437_s16, %s2166_s27 }
  0x7b   : > { %s101_s11 = sld [smem:[#allocation5 + %s100_s14]]  ;;  %p123_p13 = scmp.ne.s32.totalorder %s1409_s10, %s1405_s9 }
  0x7c   : > { %s2248_s25 = smov (!%p2197_p9, %s48_s25), %s1441_s17  ;;  %p117_p3 = scmp.ne.s32.totalorder %s1413_s2, %s1409_s10 }
  0x7d   : > { %p50_p11 = scmp.ge.s32.totalorder %s2248_s25, 2  ;;  %p2199_p5 = scmp.eq.s32.totalorder %s1676_s23, 0 }
  0x7e   : > { %p2201_p0 = scmp.eq.s32.totalorder %s1445_s18, 0  ;;  %s138_s29 = sadd.s32 1, %s1401_s8 }
  0x7f   : > { %s2250_s25 = smov (%p50_p11, %s2248_s25), 0  ;;  %p1748_p8 = por %p123_p13, %p2199_p5 }
  0x80   : > { %2198 = sst [smem:[#allocation32_spill]] %s2250_s25  ;;  %s916_s0 = sshll.u32 %s2250_s25, 1 }
  0x81   : > { %s105_s6 = ssub.s32 %s1441_s17, %s2250_s25  ;;  %s103_s4 = sadd.s32 %s916_s0, %s2246_s19 }
  0x82   : > { %s135_s13 = sor.u32 %s105_s6, %s1624_s21  ;;  %s104_s24 = sld [smem:[#allocation5 + %s103_s4]] }
  0x83   : > { %p136_p12 = scmp.eq.s32.totalorder %s135_s13, 0  ;;  %p1759_p4 = por %p117_p3, %p2201_p0 }
  0x84   : > { %s236_s3 = sand.u32 1, %s1413_s2   ;;  %p2204_p6 = scmp.lt.s32.totalorder %s1445_s18, 4 }
  0x85   : > { %s1765_s27 = scalar_select %p136_p12, %s1401_s8, %s138_s29  }
  0x86   : > { %p1772_p1 = pnand %p2204_p6, %p1759_p4  ;;  %s110_s13 = sadd.s32 1, %s1413_s2 }
  0x87   : > { %2203 = sst [smem:[#allocation33_spill]] %s1765_s27  ;;  %s922_s19 = sshll.u32 %s236_s3, 1 }
  0x88   : > { %s982_s0 = scalar_select %p1759_p4, [#allocation5], [#allocation15] }
  0x89   : > { %s106_s4 = ssub.s32 %s101_s11, %s104_s24  ;;  %s2252_s14 = smov (!%p1759_p4, %s100_s14), 0 }
  0x8a   : > { %s107_s25 = sor.u32 %s106_s4, %s105_s6  ;;  %p2206_p7 = pmov %p2204_p6 }
  0x8b   : > { %p108_p2 = scmp.eq.s32.totalorder %s107_s25, 0  ;;  %p2207_p10 = pmov %p2204_p6 }
  0x8c   : > { %s2254_s0 = smov (!%p2206_p7, %s982_s0), [#allocation16]  ;;  %s238_s27 = scalar_lea.vmem [#allocation11], %s922_s19 }
  0x8d   : > { %s1782_s29 = scalar_select %p108_p2, %s1413_s2, %s110_s13  }
  0x8e   : > { %s2256_s14 = smov (!%p2207_p10, %s2252_s14), 0  ;;  %s250_s8 = sshll.u32 %s238_s27, 4  ;;  %s1790_s8 = int_to_ptr.vmem [resolvable:$true] %s250_s8 }
  0x8f   : > { %s241_s16 = sld [smem:[%s2254_s0 + %s2256_s14]]  ;;  %s2208_s1 = sshll.u32 %s1441_s17, 1 }
  0x90   : > { %p1229_p11 = pneg %p1772_p1  ;;  %s1232_s27 = scalar_lea.hbm %s2150_s5, 128 }
  0x95   : > { %s246_s7 = sadd.s32 %s2208_s1, %s241_s16 }
  0x96   : > { %s925_s11 = sshll.u32 %s246_s7, 5 }
  0x97   : > { %s248_s25 = scalar_lea.hbm %s2150_s5, %s925_s11 }
  0x98   : > { %s1227_s24 = scalar_lea.hbm %s248_s25, 32  ;;  %p1233_p5 = scmp.lt.u32.totalorder %s248_s25, %s2150_s5 }
  0x99   : > { %p1228_p9 = scmp.ne.s32.totalorder %s248_s25, %s1227_s24  ;;  %p1234_p12 = scmp.lt.u32.totalorder %s1232_s27, %s1227_s24 }
  0x9a   : > { %p1236_p4 = scmp.lt.u32.totalorder %s1227_s24, %s248_s25 }
  0x9b   : > { %p1230_p13 = pnand %p1229_p11, %p1228_p9  ;;  %p1235_p0 = por %p1234_p12, %p1233_p5 }
  0x9d   : > { %p1231_p3 = pneg %p1230_p13  ;;  %p1237_p6 = por %p1236_p4, %p1235_p0 }
  0x9f   : > { %p1238_p2 = pnand %p1237_p6, %p1231_p3 }
  0xa1   : > { %1241 = shalt.err (!%p1238_p2)
}
  0xa2   : > { %s1242_s7 = scalar_lea.vmem %s1790_s8, 32  ;;  %s1454_s9 = smov [#allocation11]  }
  0xa3   : > { %p1243_p7 = scmp.ne.s32.totalorder %s1790_s8, %s1242_s7  ;;  %s1247_s0 = sshll.u32 %s1454_s9, 4  ;;  %s1248_s0 = int_to_ptr.vmem [resolvable:$false] %s1247_s0 }
  0xa4   : > { %s1249_s4 = scalar_lea.vmem %s1248_s0, 64  ;;  %p1250_p13 = scmp.lt.s32.totalorder %s1790_s8, %s1248_s0 }
  0xa5   : > { %p1245_p10 = pnand %p1243_p7, %p1229_p11  ;;  %p1251_p5 = scmp.lt.s32.totalorder %s1249_s4, %s1242_s7 }
  0xa7   : > { %p1246_p9 = pneg %p1245_p10  ;;  %p1252_p12 = por %p1251_p5, %p1250_p13 }
  0xa9   : > { %p1253_p0 = pnand %p1252_p12, %p1246_p9 }
  0xab   : > { %1256 = shalt.err (!%p1253_p0)
}
  0xac   : > { %1005 = dma.hbm_to_vmem [thread:$0]  (!%p1772_p1), %s248_s25, 32, %s1790_s8, %s1647_s20  }
  0xad   : > { %p2209_p3 = scmp.ne.s32.totalorder %s2194_s28, 0 }
  0xae   : > { %p2210_p11 = scmp.eq.s32.totalorder (!%p2209_p3), %s1676_s23, 0 }
  0xaf   : > { %259 = sbr.rel (%p2209_p3) target bundleno = 531 (0x213), region = 32 }
  0xb6   : > { %1372 = dma.done.wait (%p2210_p11), [#allocation7], 2048   ;;  %p2211_p4 = pmov %p2210_p11 }
  0xb7   : > { %s265_s13 = sand.u32 1, %s1676_s23   ;;  %s267_s11 = sand.u32 1, %s1421_s12  }
  0xb8   : > { %1374 = vsyncadd (%p2211_p4), [#allocation7], 4294965248  ;;  %s928_s6 = sshll.u32 %s267_s11, 2  ;;  %s266_s3 = scalar_lea.sflag [#allocation10], %s265_s13 }
  0xb9   : > { %s269_s21 = scalar_lea.vmem [#allocation9], %s928_s6  ;;  %p2212_p6 = scmp.ne.s32.totalorder %s2189_s26, 0 }
  0xbb   : > { %1376 = dma.done.wait (%p2212_p6), %s266_s3, 64  }
  0xbc   : > { %1378 = vsyncadd (%p2212_p6), %s266_s3, 4294967232  ;;  %s276_s8 = sand.u32 1, %s1409_s10  }
  0xbd   : > { %s1829_s20 = sshll.u32 %s276_s8, 1 }
  0xbe   : > { %1380 = dma.done.wait (%p1748_p8), %s266_s3, 32  }
  0xbf   : > { %1382 = vsyncadd (%p1748_p8), %s266_s3, 4294967264  ;;  %s317_s23 = smul.u32 3, %s1433_s15  ;;  %v1455_v0 = vmov 0.0   ;;  %vm1456_vm0 = vmmov 0   ;;  %v316_v1 = vld [vmem:[%s269_s21] sm:$0x7]  ;;  %v466_v54 = vlaneseq }
  0xc0   : > { %951 = vmatprep.subr.bf16.mxu0 %v1455_v0  ;;  %967 = vmatprep.mubr.msk.bf16.mxu0 %vm1456_vm0, %v1455_v0  ;;  %s329_s27 = smul.u32 9, %s1433_s15  ;;  %s2213_s21 = sld [smem:[#allocation26_spill]] }
  0xc1   : > { %s321_s26 = sadd.s32 1, %s317_s23  ;;  %s325_s25 = sadd.s32 2, %s317_s23 }
  0xc2   : > { %s318_s24 = sld [smem:[#allocation4 + %s317_s23]]  ;;  %s331_s1 = sadd.s32 1, %s329_s27 }
  0xc3   : > { %s322_s14 = sld [smem:[#allocation4 + %s321_s26]]  ;;  %s333_s16 = sadd.s32 2, %s329_s27 }
  0xc4   : > { %s326_s19 = sld [smem:[#allocation4 + %s325_s25]]  ;;  %s341_s7 = sadd.s32 6, %s329_s27 }
  0xc5   : > { %s337_s22 = sadd.s32 4, %s329_s27  ;;  %s342_s9 = sld [smem:[#allocation3 + %s341_s7]] }
  0xc6   : > { %s343_s0 = sadd.s32 7, %s329_s27  ;;  %s345_s4 = sadd.s32 8, %s329_s27 }
  0xc7   : > { %s344_s13 = sld [smem:[#allocation3 + %s343_s0]]  ;;  %s335_s8 = sadd.s32 3, %s329_s27 }
  0xc8   : > { %v319_v2 = vstv %s318_s24  ;;  %s346_s11 = sld [smem:[#allocation3 + %s345_s4]]  ;;  %s339_s23 = sadd.s32 5, %s329_s27 }
  0xc9   : > { %v323_v3 = vstv %s322_s14  ;;  %s332_s6 = sld [smem:[#allocation3 + %s331_s1]]  ;;  %v320_v5 = vsub.f32 %v316_v1, %v319_v2  ;;  %s933_s24 = sshll.u32 %s1433_s15, 1 }
  0xca   : > { %v327_v4 = vstv %s326_s19  ;;  %s338_s3 = sld [smem:[#allocation3 + %s337_s22]]  ;;  %v324_v6 = vsub.f32 %v316_v1, %v323_v3  ;;  %s1842_s14 = sadd.s32 %s2213_s21, %s933_s24 }
  0xcb   : > { %v328_v7 = vsub.f32 %v316_v1, %v327_v4  ;;  %s330_s26 = sld [smem:[#allocation3 + %s329_s27]]  ;;  %v375_v8 = vstv %s342_s9  ;;  %v467_v4 = vshrl.u32 %v466_v54, 7  ;;  %s2219_s1 = scalar_lea.vmem [#allocation11], %s1829_s20 }
  0xcc   : > { %s334_s25 = sld [smem:[#allocation3 + %s333_s16]]  ;;  %v376_v11 = vmul.f32 %v375_v8, %v320_v5  ;;  %s2033_s16 = sand.u32 1, %s1397_s30  }
  0xcd   : > { %s336_s28 = sld [smem:[#allocation3 + %s335_s8]]  ;;  %v377_v9 = vstv %s344_s13  ;;  %s311_s22 = scalar_lea.vmem [#allocation13], %s2033_s16 }
  0xce   : > { %s340_s7 = sld [smem:[#allocation3 + %s339_s23]]  ;;  %v383_v10 = vstv %s346_s11  ;;  %v378_v12 = vmul.f32 %v377_v9, %v324_v6  ;;  %s939_s9 = sshll.u32 %s1842_s14, 4 }
  0xcf   : > { %v384_v13 = vmul.f32 %v383_v10, %v328_v7  ;;  %v349_v14 = vstv %s332_s6  ;;  %s434_s19 = sld [smem:[#allocation5 + %s1842_s14]]  ;;  %s766_s0 = sshll.u32 %s311_s22, 4  ;;  %s767_s0 = int_to_ptr.vmem [resolvable:$true] %s766_s0 }
  0xd0   : > { %v363_v15 = vstv %s338_s3  ;;  %v380_v16 = vrot.slane %v378_v12, 1  ;;  %v350_v20 = vmul.f32 %v349_v14, %v324_v6  ;;  %s2218_s27 = sld [smem:[#allocation30_spill]]  ;;  %s2220_s11 = sld [smem:[#allocation37_spill]] }
  0xd1   : > { %v386_v17 = vrot.slane %v384_v13, 2  ;;  %v347_v19 = vstv %s330_s26  ;;  %v364_v22 = vmul.f32 %v363_v15, %v324_v6  ;;  %s737_s20 = scalar_lea.sflag [#allocation14], %s2033_s16  ;;  %s1257_s8 = scalar_lea.vmem %s767_s0, 16 }
  0xd2   : > { %v382_v18 = vadd.f32 %v380_v16, %v376_v11  ;;  %v355_v21 = vstv %s334_s25  ;;  %v348_v26 = vmul.f32 %v347_v19, %v320_v5  ;;  %v352_v29 = vrot.slane %v350_v20, 1  ;;  %p1258_p8 = scmp.ne.s32.totalorder %s767_s0, %s1257_s8  ;;  %s1457_s23 = smov [#allocation13]  }
  0xd3   : > { %v361_v23 = vstv %s336_s28  ;;  %v356_v27 = vmul.f32 %v355_v21, %v328_v7  ;;  %v366_v31 = vrot.slane %v364_v22, 1  ;;  %v1867_v16 = vsub.s32 0, %v467_v4  ;;  %s1261_s26 = sshll.u32 %s1457_s23, 4  ;;  %s1262_s26 = int_to_ptr.vmem [resolvable:$false] %s1261_s26 }
  0xd4   : > { %v369_v24 = vstv %s340_s7  ;;  %v388_v25 = vadd.f32 %v386_v17, %v382_v18  ;;  %v362_v30 = vmul.f32 %v361_v23, %v320_v5  ;;  %v354_v33 = vadd.f32 %v352_v29, %v348_v26  ;;  %v450_v29 = vld [vmem:[#allocation6] sm:$0xff]  ;;  %s1263_s25 = scalar_lea.vmem %s1262_s26, 32  ;;  %p1264_p10 = scmp.lt.s32.totalorder %s767_s0, %s1262_s26 }
  0xd5   : > { %v370_v32 = vmul.f32 %v369_v24, %v328_v7  ;;  %v358_v34 = vrot.slane %v356_v27, 2  ;;  %s934_s15 = sshll.u32 %s434_s19, 2  ;;  %p1265_p9 = scmp.lt.s32.totalorder %s1263_s25, %s1257_s8 }
  0xd6   : > { %v389_v28 = vmax.f32 %v388_v25, 1e-06  ;;  %v368_v35 = vadd.f32 %v366_v31, %v362_v30  ;;  %s436_s28 = scvt.s32.f32 %s934_s15  ;;  %v451_v30 = vld [vmem:[#allocation6 + $0x8] sm:$0xff]  ;;  %s2221_s6 = smov %s2220_s11 }
  0xd7   : > { %v372_v36 = vrot.slane %v370_v32, 2  ;;  %v360_v37 = vadd.f32 %v358_v34, %v354_v33  ;;  %s2042_s3 = scalar_lea.hbm %s2220_s11, %s939_s9  ;;  %p2222_p1 = scmp.ne.s32.totalorder %s2218_s27, 0 }
  0xd8   : > { %1137 = vrcp.f32 %v389_v28  ;;  %vm390_vm1 = vcmp.gt.f32.partialorder %v389_v28, 1e-06  ;;  %v437_v53 = vstv %s436_s28  ;;  %p1266_p13 = por %p1265_p9, %p1264_p10 }
  0xd9   : > { %v374_v38 = vadd.f32 %v372_v36, %v368_v35  ;;  %v1846_v40 = vsel %vm390_vm1, 1.0, %v1455_v0  ;;  %p1259_p2 = pnand %p1258_p8, %p2222_p1 }
  0xdb   : > { %p1260_p7 = pneg %p1259_p2 }
  0xdd   : > { %p1267_p5 = pnand %p1266_p13, %p1260_p7 }
  0xe2   : > { %v1138_v39 = vpop.eup %1137 }
  0xe3   : > { %v395_v41 = vmul.f32 %v1138_v39, %v360_v37  ;;  %v397_v42 = vmul.f32 %v1138_v39, %v374_v38 }
  0xe5   : > { %v396_v43 = vmul.f32 %v1846_v40, %v395_v41  ;;  %v398_v44 = vmul.f32 %v1846_v40, %v397_v42  ;;  %v452_v42 = vld [vmem:[#allocation6 + $0x10] sm:$0xff] }
  0xe7   : > { %v399_v45 = vfloor.f32 %v396_v43  ;;  %v400_v46 = vfloor.f32 %v398_v44  ;;  %vm411_vm2 = vcmp.ge.f32.partialorder %v396_v43, 0.0  ;;  %vm412_vm3 = vcmp.le.f32.partialorder %v396_v43, 31.0 }
  0xe8   : > { %vm414_vm4 = vcmp.ge.f32.partialorder %v398_v44, 0.0  ;;  %vm415_vm5 = vcmp.le.f32.partialorder %v398_v44, 7.0  ;;  %vm1850_vm6 = vmand %vm411_vm2, %vm412_vm3 }
  0xe9   : > { %v401_v47 = vadd.f32 1.0, %v399_v45  ;;  %v402_v48 = vadd.f32 1.0, %v400_v46  ;;  %v403_v49 = vmax.f32 %v399_v45, 0.0  ;;  %v405_v50 = vmax.f32 %v400_v46, 0.0  ;;  %vm1854_vm7 = vmand %vm414_vm4, %vm415_vm5 }
  0xea   : > { %vm417_vm8 = vmand %vm1850_vm6, %vm1854_vm7 }
  0xeb   : > { %v404_v55 = vmin.f32 %v403_v49, 31.0  ;;  %v406_v56 = vmin.f32 %v405_v50, 7.0  ;;  %v407_v57 = vmax.f32 %v401_v47, 0.0  ;;  %v409_v58 = vmax.f32 %v402_v48, 0.0 }
  0xec   : > { %v1863_v5 = vsel %vm417_vm8, 1.0, %v1455_v0 }
  0xed   : > { %v408_v59 = vmin.f32 %v407_v57, 31.0  ;;  %v410_v60 = vmin.f32 %v409_v58, 7.0  ;;  %v424_v61 = vsub.f32 %v396_v43, %v404_v55  ;;  %v427_v62 = vsub.f32 %v398_v44, %v406_v56 }
  0xee   : > { %v438_v63 = vsub.f32 %v406_v56, %v437_v53 }
  0xef   : > { %v420_v1 = vsub.f32 %v408_v59, %v396_v43  ;;  %v421_v2 = vsub.f32 %v410_v60, %v398_v44  ;;  %v444_v3 = vsub.f32 %v410_v60, %v437_v53  ;;  %v430_v10 = vmul.f32 %v427_v62, %v424_v61  ;;  %v453_v43 = vld [vmem:[#allocation6 + $0x18] sm:$0xff] }
  0xf0   : > { %v439_v6 = vmul.f32 32.0, %v438_v63  ;;  %v455_v63 = vld [vmem:[#allocation6 + $0x28] sm:$0xff] }
  0xf1   : > { %v422_v7 = vmul.f32 %v421_v2, %v420_v1  ;;  %v425_v8 = vmul.f32 %v424_v61, %v421_v2  ;;  %v428_v9 = vmul.f32 %v427_v62, %v420_v1  ;;  %v445_v13 = vmul.f32 32.0, %v444_v3  ;;  %v454_v62 = vld [vmem:[#allocation6 + $0x20] sm:$0xff] }
  0xf2   : > { %v440_v11 = vadd.f32 %v439_v6, %v404_v55  ;;  %v442_v12 = vadd.f32 %v439_v6, %v408_v59  ;;  %v431_v22 = vmul.f32 %v1863_v5, %v430_v10 }
  0xf3   : > { %v423_v14 = vmul.f32 %v1863_v5, %v422_v7  ;;  %v426_v15 = vmul.f32 %v1863_v5, %v425_v8  ;;  %v446_v19 = vadd.f32 %v445_v13, %v404_v55  ;;  %v448_v20 = vadd.f32 %v445_v13, %v408_v59 }
  0xf4   : > { %v971_v17 = vtrunc.f32 %v440_v11  ;;  %v973_v18 = vtrunc.f32 %v442_v12  ;;  %v429_v21 = vmul.f32 %v1863_v5, %v428_v9  ;;  %v1887_v36 = vrot.slane %v431_v22, %v1867_v16 }
  0xf5   : > { %v975_v25 = vtrunc.f32 %v446_v19  ;;  %v977_v26 = vtrunc.f32 %v448_v20  ;;  %v1872_v27 = vrot.slane %v423_v14, %v1867_v16  ;;  %v1875_v28 = vrot.slane %v426_v15, %v1867_v16  ;;  %v456_v14 = vld [vmem:[#allocation6 + $0x30] sm:$0xff]  ;;  %v457_v20 = vld [vmem:[#allocation6 + $0x38] sm:$0xff] }
  0xf6   : > { %v972_v23 = vcvt.f32.s32 %v971_v17  ;;  %v974_v24 = vcvt.f32.s32 %v973_v18  ;;  %v1884_v35 = vrot.slane %v429_v21, %v1867_v16 }
  0xf7   : > { %v976_v31 = vcvt.f32.s32 %v975_v25  ;;  %v978_v32 = vcvt.f32.s32 %v977_v26 }
  0xf8   : > { %v1878_v33 = vrot.slane %v972_v23, %v1867_v16  ;;  %v1881_v34 = vrot.slane %v974_v24, %v1867_v16 }
  0xf9   : > { %v1890_v37 = vrot.slane %v976_v31, %v1867_v16  ;;  %v1893_v38 = vrot.slane %v978_v32, %v1867_v16 }
  0xfa   : > { %vm470_vm9 = vcmp.eq.s32.totalorder %v450_v29, %v1878_v33  ;;  %vm471_vm10 = vcmp.eq.s32.totalorder %v451_v30, %v1878_v33  ;;  %vm510_vm11 = vcmp.eq.s32.totalorder %v450_v29, %v1881_v34  ;;  %vm511_vm12 = vcmp.eq.s32.totalorder %v451_v30, %v1881_v34 }
  0xfb   : > { %v490_v39 = vsel %vm470_vm9, %v1872_v27, 0.0  ;;  %v491_v41 = vsel %vm471_vm10, %v1872_v27, 0.0  ;;  %v530_v44 = vsel %vm510_vm11, %v1875_v28, 0.0  ;;  %v531_v45 = vsel %vm511_vm12, %v1875_v28, 0.0 }
  0xfc   : > { %vm566_vm13 = vcmp.eq.s32.totalorder %v450_v29, %v1890_v37  ;;  %vm567_vm14 = vcmp.eq.s32.totalorder %v451_v30, %v1890_v37  ;;  %v546_v46 = vadd.f32 %v530_v44, %v490_v39  ;;  %v547_v47 = vadd.f32 %v531_v45, %v491_v41 }
  0xfd   : > { %v586_v48 = vsel %vm566_vm13, %v1884_v35, 0.0  ;;  %v587_v49 = vsel %vm567_vm14, %v1884_v35, 0.0  ;;  %vm622_vm15 = vcmp.eq.s32.totalorder %v450_v29, %v1893_v38  ;;  %vm623_vm0 = vcmp.eq.s32.totalorder %v451_v30, %v1893_v38 }
  0xfe   : > { %vm472_vm1 = vcmp.eq.s32.totalorder %v452_v42, %v1878_v33  ;;  %vm473_vm2 = vcmp.eq.s32.totalorder %v453_v43, %v1878_v33  ;;  %v602_v50 = vadd.f32 %v586_v48, %v546_v46  ;;  %v603_v51 = vadd.f32 %v587_v49, %v547_v47  ;;  %v459_v46 = vld [vmem:[#allocation6 + $0x48] sm:$0xff] }
  0xff   : > { %v642_v52 = vsel %vm622_vm15, %v1887_v36, 0.0  ;;  %v643_v53 = vsel %vm623_vm0, %v1887_v36, 0.0  ;;  %v492_v54 = vsel %vm472_vm1, %v1872_v27, 0.0  ;;  %v493_v55 = vsel %vm473_vm2, %v1872_v27, 0.0 }
 0x100   : > { %vm512_vm3 = vcmp.eq.s32.totalorder %v452_v42, %v1881_v34  ;;  %vm513_vm4 = vcmp.eq.s32.totalorder %v453_v43, %v1881_v34  ;;  %v658_v56 = vadd.f32 %v642_v52, %v602_v50  ;;  %v659_v57 = vadd.f32 %v643_v53, %v603_v51 }
 0x101   : > { %v532_v58 = vsel %vm512_vm3, %v1875_v28, 0.0  ;;  %v533_v59 = vsel %vm513_vm4, %v1875_v28, 0.0  ;;  %vm568_vm5 = vcmp.eq.s32.totalorder %v452_v42, %v1890_v37  ;;  %vm569_vm6 = vcmp.eq.s32.totalorder %v453_v43, %v1890_v37 }
 0x102   : > { %v548_v60 = vadd.f32 %v532_v58, %v492_v54  ;;  %v549_v61 = vadd.f32 %v533_v59, %v493_v55  ;;  %v674_v1 = vpack.c.bf16 %v659_v57, %v658_v56  ;;  %v588_v2 = vsel %vm568_vm5, %v1884_v35, 0.0  ;;  %v460_v58 = vld [vmem:[#allocation6 + $0x50] sm:$0xff] }
 0x103   : > { %v589_v3 = vsel %vm569_vm6, %v1884_v35, 0.0  ;;  %vm624_vm7 = vcmp.eq.s32.totalorder %v452_v42, %v1893_v38  ;;  %vm625_vm8 = vcmp.eq.s32.totalorder %v453_v43, %v1893_v38  ;;  %vm474_vm9 = vcmp.eq.s32.totalorder %v454_v62, %v1878_v33  ;;  %v458_v43 = vld [vmem:[#allocation6 + $0x40] sm:$0xff] }
 0x104   : > { %v604_v4 = vadd.f32 %v588_v2, %v548_v60  ;;  %v605_v6 = vadd.f32 %v589_v3, %v549_v61  ;;  %v644_v7 = vsel %vm624_vm7, %v1887_v36, 0.0  ;;  %952 = vmatpush3.bf16.msra.mxu0 %v674_v1  ;;  %v645_v8 = vsel %vm625_vm8, %v1887_v36, 0.0  ;;  %v461_v61 = vld [vmem:[#allocation6 + $0x58] sm:$0xff] }
 0x105   : > { %vm475_vm10 = vcmp.eq.s32.totalorder %v455_v63, %v1878_v33  ;;  %vm514_vm11 = vcmp.eq.s32.totalorder %v454_v62, %v1881_v34  ;;  %953 = vmatprep.subr.bf16.mxu0 %v1455_v0  ;;  %v494_v11 = vsel %vm474_vm9, %v1872_v27, 0.0  ;;  %vm515_vm12 = vcmp.eq.s32.totalorder %v455_v63, %v1881_v34 }
 0x106   : > { %v660_v9 = vadd.f32 %v644_v7, %v604_v4  ;;  %v661_v10 = vadd.f32 %v645_v8, %v605_v6  ;;  %v495_v12 = vsel %vm475_vm10, %v1872_v27, 0.0  ;;  %v534_v13 = vsel %vm514_vm11, %v1875_v28, 0.0 }
 0x107   : > { %vm570_vm13 = vcmp.eq.s32.totalorder %v454_v62, %v1890_v37  ;;  %vm571_vm14 = vcmp.eq.s32.totalorder %v455_v63, %v1890_v37  ;;  %v535_v17 = vsel %vm515_vm12, %v1875_v28, 0.0  ;;  %v550_v18 = vadd.f32 %v534_v13, %v494_v11  ;;  %v462_v13 = vld [vmem:[#allocation6 + $0x60] sm:$0xff] }
 0x108   : > { %v675_v15 = vpack.c.bf16 %v661_v10, %v660_v9  ;;  %v590_v19 = vsel %vm570_vm13, %v1884_v35, 0.0  ;;  %v551_v21 = vadd.f32 %v535_v17, %v495_v12  ;;  %v591_v22 = vsel %vm571_vm14, %v1884_v35, 0.0 }
 0x109   : > { %vm626_vm15 = vcmp.eq.s32.totalorder %v454_v62, %v1893_v38  ;;  %vm627_vm0 = vcmp.eq.s32.totalorder %v455_v63, %v1893_v38  ;;  %v606_v23 = vadd.f32 %v590_v19, %v550_v18  ;;  %vm476_vm1 = vcmp.eq.s32.totalorder %v456_v14, %v1878_v33  ;;  %v463_v18 = vld [vmem:[#allocation6 + $0x68] sm:$0xff] }
 0x10a   : > { %954 = vmatpush3.bf16.msra.mxu0 %v675_v15  ;;  %v646_v24 = vsel %vm626_vm15, %v1887_v36, 0.0  ;;  %v647_v25 = vsel %vm627_vm0, %v1887_v36, 0.0  ;;  %v607_v26 = vadd.f32 %v591_v22, %v551_v21  ;;  %vm477_vm2 = vcmp.eq.s32.totalorder %v457_v20, %v1878_v33 }
 0x10b   : > { %955 = vmatprep.subr.bf16.mxu0 %v1455_v0  ;;  %v496_v29 = vsel %vm476_vm1, %v1872_v27, 0.0  ;;  %vm516_vm3 = vcmp.eq.s32.totalorder %v456_v14, %v1881_v34  ;;  %v662_v30 = vadd.f32 %v646_v24, %v606_v23  ;;  %v497_v31 = vsel %vm477_vm2, %v1872_v27, 0.0 }
 0x10c   : > { %vm517_vm4 = vcmp.eq.s32.totalorder %v457_v20, %v1881_v34  ;;  %v536_v32 = vsel %vm516_vm3, %v1875_v28, 0.0  ;;  %v663_v39 = vadd.f32 %v647_v25, %v607_v26  ;;  %vm572_vm5 = vcmp.eq.s32.totalorder %v456_v14, %v1890_v37 }
 0x10d   : > { %v537_v41 = vsel %vm517_vm4, %v1875_v28, 0.0  ;;  %v552_v42 = vadd.f32 %v536_v32, %v496_v29  ;;  %vm573_vm6 = vcmp.eq.s32.totalorder %v457_v20, %v1890_v37  ;;  %v592_v45 = vsel %vm572_vm5, %v1884_v35, 0.0 }
 0x10e   : > { %v553_v44 = vadd.f32 %v537_v41, %v497_v31  ;;  %vm628_vm7 = vcmp.eq.s32.totalorder %v456_v14, %v1893_v38  ;;  %v676_v47 = vpack.c.bf16 %v663_v39, %v662_v30  ;;  %v593_v48 = vsel %vm573_vm6, %v1884_v35, 0.0 }
 0x10f   : > { %v608_v49 = vadd.f32 %v592_v45, %v552_v42  ;;  %vm629_vm8 = vcmp.eq.s32.totalorder %v457_v20, %v1893_v38  ;;  %v648_v51 = vsel %vm628_vm7, %v1887_v36, 0.0  ;;  %vm478_vm9 = vcmp.eq.s32.totalorder %v458_v43, %v1878_v33  ;;  %v465_v45 = vld [vmem:[#allocation6 + $0x78] sm:$0xff] }
 0x110   : > { %v609_v50 = vadd.f32 %v593_v48, %v553_v44  ;;  %v649_v52 = vsel %vm629_vm8, %v1887_v36, 0.0  ;;  %956 = vmatpush3.bf16.msra.mxu0 %v676_v47  ;;  %vm479_vm10 = vcmp.eq.s32.totalorder %v459_v46, %v1878_v33  ;;  %v498_v54 = vsel %vm478_vm9, %v1872_v27, 0.0  ;;  %v464_v44 = vld [vmem:[#allocation6 + $0x70] sm:$0xff] }
 0x111   : > { %v664_v53 = vadd.f32 %v648_v51, %v608_v49  ;;  %vm518_vm11 = vcmp.eq.s32.totalorder %v458_v43, %v1881_v34  ;;  %957 = vmatprep.subr.bf16.mxu0 %v1455_v0  ;;  %v499_v56 = vsel %vm479_vm10, %v1872_v27, 0.0  ;;  %vm519_vm12 = vcmp.eq.s32.totalorder %v459_v46, %v1881_v34 }
 0x112   : > { %v665_v55 = vadd.f32 %v649_v52, %v609_v50  ;;  %v538_v57 = vsel %vm518_vm11, %v1875_v28, 0.0  ;;  %v539_v59 = vsel %vm519_vm12, %v1875_v28, 0.0  ;;  %vm574_vm13 = vcmp.eq.s32.totalorder %v458_v43, %v1890_v37 }
 0x113   : > { %v554_v60 = vadd.f32 %v538_v57, %v498_v54  ;;  %vm575_vm14 = vcmp.eq.s32.totalorder %v459_v46, %v1890_v37  ;;  %v555_v63 = vadd.f32 %v539_v59, %v499_v56  ;;  %v594_v1 = vsel %vm574_vm13, %v1884_v35, 0.0 }
 0x114   : > { %v677_v62 = vpack.c.bf16 %v665_v55, %v664_v53  ;;  %v595_v2 = vsel %vm575_vm14, %v1884_v35, 0.0  ;;  %vm630_vm15 = vcmp.eq.s32.totalorder %v458_v43, %v1893_v38  ;;  %vm631_vm0 = vcmp.eq.s32.totalorder %v459_v46, %v1893_v38 }
 0x115   : > { %v610_v3 = vadd.f32 %v594_v1, %v554_v60  ;;  %vm480_vm1 = vcmp.eq.s32.totalorder %v460_v58, %v1878_v33  ;;  %v611_v4 = vadd.f32 %v595_v2, %v555_v63  ;;  %v650_v6 = vsel %vm630_vm15, %v1887_v36, 0.0 }
 0x116   : > { %958 = vmatpush3.bf16.msra.mxu0 %v677_v62  ;;  %v651_v7 = vsel %vm631_vm0, %v1887_v36, 0.0  ;;  %vm481_vm2 = vcmp.eq.s32.totalorder %v461_v61, %v1878_v33  ;;  %v500_v9 = vsel %vm480_vm1, %v1872_v27, 0.0  ;;  %vm520_vm3 = vcmp.eq.s32.totalorder %v460_v58, %v1881_v34 }
 0x117   : > { %959 = vmatprep.subr.bf16.mxu0 %v1455_v0  ;;  %v666_v8 = vadd.f32 %v650_v6, %v610_v3  ;;  %v501_v10 = vsel %vm481_vm2, %v1872_v27, 0.0  ;;  %v667_v11 = vadd.f32 %v651_v7, %v611_v4  ;;  %vm521_vm4 = vcmp.eq.s32.totalorder %v461_v61, %v1881_v34 }
 0x118   : > { %v540_v12 = vsel %vm520_vm3, %v1875_v28, 0.0  ;;  %vm576_vm5 = vcmp.eq.s32.totalorder %v460_v58, %v1890_v37  ;;  %v541_v14 = vsel %vm521_vm4, %v1875_v28, 0.0  ;;  %vm577_vm6 = vcmp.eq.s32.totalorder %v461_v61, %v1890_v37 }
 0x119   : > { %v556_v15 = vadd.f32 %v540_v12, %v500_v9  ;;  %v596_v17 = vsel %vm576_vm5, %v1884_v35, 0.0  ;;  %v678_v19 = vpack.c.bf16 %v667_v11, %v666_v8  ;;  %v557_v20 = vadd.f32 %v541_v14, %v501_v10 }
 0x11a   : > { %v597_v21 = vsel %vm577_vm6, %v1884_v35, 0.0  ;;  %vm632_vm7 = vcmp.eq.s32.totalorder %v460_v58, %v1893_v38  ;;  %vm633_vm8 = vcmp.eq.s32.totalorder %v461_v61, %v1893_v38  ;;  %vm482_vm9 = vcmp.eq.s32.totalorder %v462_v13, %v1878_v33 }
 0x11b   : > { %v612_v22 = vadd.f32 %v596_v17, %v556_v15  ;;  %v652_v23 = vsel %vm632_vm7, %v1887_v36, 0.0  ;;  %960 = vmatpush3.bf16.msra.mxu0 %v678_v19  ;;  %v613_v24 = vadd.f32 %v597_v21, %v557_v20  ;;  %v653_v25 = vsel %vm633_vm8, %v1887_v36, 0.0 }
 0x11c   : > { %vm483_vm10 = vcmp.eq.s32.totalorder %v463_v18, %v1878_v33  ;;  %v502_v26 = vsel %vm482_vm9, %v1872_v27, 0.0  ;;  %961 = vmatprep.subr.bf16.mxu0 %v1455_v0  ;;  %vm522_vm11 = vcmp.eq.s32.totalorder %v462_v13, %v1881_v34  ;;  %vm523_vm12 = vcmp.eq.s32.totalorder %v463_v18, %v1881_v34 }
 0x11d   : > { %v668_v29 = vadd.f32 %v652_v23, %v612_v22  ;;  %v503_v30 = vsel %vm483_vm10, %v1872_v27, 0.0  ;;  %v669_v31 = vadd.f32 %v653_v25, %v613_v24  ;;  %v542_v32 = vsel %vm522_vm11, %v1875_v28, 0.0 }
 0x11e   : > { %v543_v39 = vsel %vm523_vm12, %v1875_v28, 0.0  ;;  %vm578_vm13 = vcmp.eq.s32.totalorder %v462_v13, %v1890_v37  ;;  %v558_v41 = vadd.f32 %v542_v32, %v502_v26  ;;  %vm579_vm14 = vcmp.eq.s32.totalorder %v463_v18, %v1890_v37 }
 0x11f   : > { %v559_v42 = vadd.f32 %v543_v39, %v503_v30  ;;  %v598_v43 = vsel %vm578_vm13, %v1884_v35, 0.0  ;;  %v679_v46 = vpack.c.bf16 %v669_v31, %v668_v29  ;;  %v599_v47 = vsel %vm579_vm14, %v1884_v35, 0.0 }
 0x120   : > { %vm634_vm15 = vcmp.eq.s32.totalorder %v462_v13, %v1893_v38  ;;  %vm635_vm0 = vcmp.eq.s32.totalorder %v463_v18, %v1893_v38  ;;  %v614_v48 = vadd.f32 %v598_v43, %v558_v41  ;;  %vm484_vm1 = vcmp.eq.s32.totalorder %v464_v44, %v1878_v33 }
 0x121   : > { %v615_v49 = vadd.f32 %v599_v47, %v559_v42  ;;  %v654_v50 = vsel %vm634_vm15, %v1887_v36, 0.0  ;;  %v655_v51 = vsel %vm635_vm0, %v1887_v36, 0.0  ;;  %962 = vmatpush3.bf16.msra.mxu0 %v679_v46  ;;  %vm485_vm2 = vcmp.eq.s32.totalorder %v465_v45, %v1878_v33 }
 0x122   : > { %vm524_vm3 = vcmp.eq.s32.totalorder %v464_v44, %v1881_v34  ;;  %vm525_vm4 = vcmp.eq.s32.totalorder %v465_v45, %v1881_v34  ;;  %963 = vmatprep.subr.bf16.mxu0 %v1455_v0  ;;  %v670_v52 = vadd.f32 %v654_v50, %v614_v48  ;;  %v504_v54 = vsel %vm484_vm1, %v1872_v27, 0.0 }
 0x123   : > { %v671_v53 = vadd.f32 %v655_v51, %v615_v49  ;;  %v505_v55 = vsel %vm485_vm2, %v1872_v27, 0.0  ;;  %v544_v56 = vsel %vm524_vm3, %v1875_v28, 0.0  ;;  %v545_v57 = vsel %vm525_vm4, %v1875_v28, 0.0 }
 0x124   : > { %vm580_vm5 = vcmp.eq.s32.totalorder %v464_v44, %v1890_v37  ;;  %vm581_vm6 = vcmp.eq.s32.totalorder %v465_v45, %v1890_v37  ;;  %v560_v58 = vadd.f32 %v544_v56, %v504_v54  ;;  %v561_v34 = vadd.f32 %v545_v57, %v505_v55 }
 0x125   : > { %v680_v33 = vpack.c.bf16 %v671_v53, %v670_v52  ;;  %v600_v59 = vsel %vm580_vm5, %v1884_v35, 0.0  ;;  %v601_v60 = vsel %vm581_vm6, %v1884_v35, 0.0  ;;  %vm636_vm7 = vcmp.eq.s32.totalorder %v464_v44, %v1893_v38  ;;  %v682_v35 = vld [vmem:[%s2219_s1] sm:$0x3] }
 0x126   : > { %vm637_vm8 = vcmp.eq.s32.totalorder %v465_v45, %v1893_v38  ;;  %v616_v27 = vadd.f32 %v600_v59, %v560_v58  ;;  %v617_v28 = vadd.f32 %v601_v60, %v561_v34  ;;  %v656_v61 = vsel %vm636_vm7, %v1887_v36, 0.0 }
 0x127   : > { %964 = vmatpush3.bf16.msra.mxu0 %v680_v33  ;;  %v657_v37 = vsel %vm637_vm8, %v1887_v36, 0.0  ;;  %v729_v38 = vmul.f32 %v1863_v5, %v1846_v40 }
 0x128   : > { %965 = vmatprep.subr.bf16.mxu0 %v1455_v0  ;;  %v672_v62 = vadd.f32 %v656_v61, %v616_v27  ;;  %v673_v63 = vadd.f32 %v657_v37, %v617_v28 }
 0x129   : > { %730 = vst [vmem:[%s311_s22] sm:$0x1] %v729_v38 }
 0x12a   : > { %v681_v1 = vpack.c.bf16 %v673_v63, %v672_v62 }
 0x12c   : > { %966 = vmatpush3.bf16.msra.mxu0 %v681_v1 }
 0x12f   : > { %968 = vmatmul.mubr.bf16.vlgmr.msra.gmra.mrb[0].mxu0 %v682_v35 }
 0x130   : > { %1270 = shalt.err (!%p1267_p5)
}
 0x131   : > { %s1271_s7 = scalar_lea.hbm %s2042_s3, 16  ;;  %s1275_s19 = scalar_lea.hbm %s2221_s6, 64 }
 0x132   : > { %p1272_p12 = scmp.ne.s32.totalorder %s2042_s3, %s1271_s7  ;;  %p1276_p11 = scmp.lt.u32.totalorder %s2042_s3, %s2221_s6 }
 0x133   : > { %p1277_p4 = scmp.lt.u32.totalorder %s1275_s19, %s1271_s7  ;;  %p1279_p8 = scmp.lt.u32.totalorder %s1271_s7, %s2042_s3 }
 0x134   : > { %p1273_p0 = pnand %p1272_p12, %p2222_p1 }
 0x135   : > { %p1278_p6 = por %p1277_p4, %p1276_p11 }
 0x136   : > { %p1274_p3 = pneg %p1273_p0 }
 0x137   : > { %p1280_p2 = por %p1279_p8, %p1278_p6 }
 0x139   : > { %p1281_p7 = pnand %p1280_p2, %p1274_p3 }
 0x13b   : > { %1284 = shalt.err (!%p1281_p7)
}
 0x13c   : > { %990 = dma.vmem_to_hbm [thread:$0]  (%p2222_p1), %s767_s0, 16, %s2042_s3, %s737_s20   ;;  %v726_v0 = vrot.slane %v1846_v40, %v1867_v16 }
 0x13d   : > { %s930_s1 = sshll.u32 %s2033_s16, 2  ;;  %s937_s22 = sshll.u32 %s1842_s14, 6 }
 0x13e   : > { %s305_s9 = scalar_lea.vmem [#allocation12], %s930_s1  ;;  %s2223_s8 = sld [smem:[#allocation36_spill]] }
 0x13f   : > { %s751_s4 = sshll.u32 %s305_s9, 4  ;;  %s732_s0 = scalar_lea.sflag [#allocation8], %s2033_s16  ;;  %s2071_s4 = int_to_ptr.vmem [resolvable:$true] %s751_s4 }
 0x140   : > { %s1285_s14 = scalar_lea.vmem %s2071_s4, 64  ;;  %s1458_s3 = smov [#allocation12]  }
 0x141   : > { %p1286_p10 = scmp.ne.s32.totalorder %s2071_s4, %s1285_s14  ;;  %s1289_s20 = sshll.u32 %s1458_s3, 4  ;;  %s1290_s20 = int_to_ptr.vmem [resolvable:$false] %s1289_s20 }
 0x142   : > { %s1291_s25 = scalar_lea.vmem %s1290_s20, 128  ;;  %p1292_p5 = scmp.lt.s32.totalorder %s2071_s4, %s1290_s20 }
 0x143   : > { %p1287_p9 = pnand %p1286_p10, %p2222_p1  ;;  %p1293_p12 = scmp.lt.s32.totalorder %s1291_s25, %s1285_s14 }
 0x144   : > { %s2224_s23 = smov %s2223_s8  ;;  %s2069_s26 = scalar_lea.hbm %s2223_s8, %s937_s22 }
 0x145   : > { %p1288_p13 = pneg %p1287_p9  ;;  %p1294_p0 = por %p1293_p12, %p1292_p5 }
 0x147   : > { %p1295_p3 = pnand %p1294_p0, %p1288_p13 }
 0x202   : > { %v717_v5 = vpop.f32.mrb[0].mxu0 }
 0x203   : > { %v727_v36 = vmul.f32 %v726_v0, %v717_v5  ;;  %v969_v2 = vpop.f32.mrb[1].mxu0 }
 0x204   : > { %v720_v3 = vpop.f32.mrb[2].mxu0 }
 0x205   : > { %728 = vst [vmem:[%s305_s9] sm:$0xf] %v727_v36  ;;  %v970_v4 = vpop.f32.mrb[3].mxu0 }
 0x206   : > { %1298 = shalt.err (!%p1295_p3)
}
 0x207   : > { %s1299_s16 = scalar_lea.hbm %s2069_s26, 64  ;;  %s1303_s24 = scalar_lea.hbm %s2224_s23, 256 }
 0x208   : > { %p1300_p11 = scmp.ne.s32.totalorder %s2069_s26, %s1299_s16  ;;  %p1304_p8 = scmp.lt.u32.totalorder %s2069_s26, %s2224_s23 }
 0x209   : > { %p1305_p2 = scmp.lt.u32.totalorder %s1303_s24, %s1299_s16  ;;  %p1307_p10 = scmp.lt.u32.totalorder %s1299_s16, %s2069_s26 }
 0x20a   : > { %p1301_p4 = pnand %p1300_p11, %p2222_p1 }
 0x20b   : > { %p1306_p7 = por %p1305_p2, %p1304_p8 }
 0x20c   : > { %p1302_p6 = pneg %p1301_p4 }
 0x20d   : > { %p1308_p9 = por %p1307_p10, %p1306_p7 }
 0x20f   : > { %p1309_p13 = pnand %p1308_p9, %p1302_p6 }
 0x211   : > { %1312 = shalt.err (!%p1309_p13)
}
 0x212   : > { %989 = dma.vmem_to_hbm [thread:$0]  (%p2222_p1), %s2071_s4, 64, %s2069_s26, %s732_s0  }
 0x213 PF: > { %s2225_s28 = sld [smem:[#allocation23_spill]]  ;;  %s2226_s1 = sld [smem:[#allocation31_spill]] }
 0x214   : > { %p1016_p5 = scmp.ge.s32.totalorder %s1445_s18, 2 }
 0x219   : > { %s778_s22 = sand.u32 1, %s2225_s28   ;;  %p2227_p12 = scmp.ne.s32.totalorder %s2226_s1, 0 }
 0x21a   : > { %s779_s9 = scalar_lea.sflag [#allocation8], %s778_s22 }
 0x21b   : > { %p1007_p0 = pnand %p1016_p5, %p2227_p12 }
 0x21d   : > { %1384 = dma.done.wait (!%p1007_p0), %s779_s9, 64  }
 0x21e   : > { %1386 = vsyncadd (!%p1007_p0), %s779_s9, 4294967232  ;;  %s788_s13 = scalar_lea.sflag [#allocation14], %s778_s22 }
 0x21f   : > { %1388 = dma.done.wait (!%p1007_p0), %s788_s13, 16  }
 0x220   : > { %1390 = vsyncadd (!%p1007_p0), %s788_s13, 4294967280  ;;  %s36_s18 = sadd.s32 1, %s1445_s18   ;;  %s2229_s4 = sld [smem:[#allocation24_spill]] }
 0x221   : > { %p2100_p3 = scmp.ge.s32.totalorder %s36_s18, 6   ;;  %s2230_s8 = sld [smem:[#allocation33_spill]] }
 0x222   : > { %s2231_s26 = sld [smem:[#allocation25_spill]]  ;;  %s2232_s13 = sld [smem:[#allocation29_spill]] }
 0x223   : > { %s2233_s14 = sld [smem:[#allocation27_spill]]  ;;  %s2234_s16 = sld [smem:[#allocation28_spill]] }
 0x224   : > { %s2235_s0 = sld [smem:[#allocation32_spill]]  ;;  %s2236_s1 = smov %s1397_s30 }
 0x225   : > { %s2238_s9 = smov %s1409_s10  ;;  %s2239_s10 = smov %s1413_s2 }
 0x226   : > { %s2237_s30 = smov %s2229_s4  ;;  %s2240_s2 = smov %s1782_s29 }
 0x227   : > { %s2241_s11 = smov %s1421_s12  ;;  %s2243_s15 = smov %s1441_s17 }
 0x228   : > { %s2242_s12 = smov %s2231_s26  ;;  %35 = sbr.rel (!%p2100_p3) target bundleno = 40 (0x28), region = 110 }
 0x22a   : > { %s2244_s17 = smov %s2235_s0 }
 0x22f   :  { %792 = vsyncpa [#allocation7], 1 }
 0x230   :  { %794 = vsyncpa [#allocation7 + $0x1], 1 }
 0x231   :  { %795 = vsyncpa [#allocation10], 1 }
 0x232   :  { %797 = vsyncpa [#allocation10 + $0x1], 1 }
 0x233   :  { %798 = vsyncpa [#allocation8], 1 }
 0x234   :  { %800 = vsyncpa [#allocation8 + $0x1], 1 }
 0x235   :  { %801 = vsyncpa [#allocation14], 1 }
 0x236   :  { %803 = vsyncpa [#allocation14 + $0x1], 1 }

</bundles_post_ra>
